<compile_context>
chip_gen: v6e
topology: v6e:2x2x1
jax: 0.10.0
libtpu: 0.0.40
codegen_flags: <defaults>
</compile_context>

<pallas_src>
from functools import partial

import jax
import jax.numpy as jnp
from jax.experimental import pallas as pl
from jax.experimental.pallas import tpu as pltpu

_EPS = 1e-5


def _round_up(x, m):
    return ((x + m - 1) // m) * m


def _pick_tile(d):
    """Largest lane-aligned tile <= 512 that divides d (d is a multiple of 128)."""
    for c in (512, 384, 256, 128):
        if d % c == 0:
            return c
    return d


# --------------------------------------------------------------------------
# Fused matmul kernel:  out = epilogue( prologue(A) @ B )
#   prologue: per-K-column scale/shift (+ReLU)   -- BN before a 1x1 conv
#   epilogue: per-N-column scale/shift (+ReLU)   -- BN / bias after a conv
# bf16 operands, f32 accumulator, write-back only on the last K step.
# --------------------------------------------------------------------------
def _mm_fused_kernel(*refs, has_a_aff, a_relu, has_o_scale, has_o_shift, o_relu):
    idx = 0
    a_ref = refs[idx]; idx += 1
    b_ref = refs[idx]; idx += 1
    if has_a_aff:
        asc_ref = refs[idx]; ash_ref = refs[idx + 1]; idx += 2
    if has_o_scale:
        osc_ref = refs[idx]; idx += 1
    if has_o_shift:
        osh_ref = refs[idx]; idx += 1
    o_ref = refs[idx]
    acc_ref = refs[idx + 1]

    k = pl.program_id(2)

    @pl.when(k == 0)
    def _():
        acc_ref[...] = jnp.zeros_like(acc_ref)

    a = a_ref[...]
    if has_a_aff:
        a = a.astype(jnp.float32) * asc_ref[...] + ash_ref[...]
        if a_relu:
            a = jnp.maximum(a, 0.0)
        a = a.astype(jnp.bfloat16)
    elif a_relu:
        a = jnp.maximum(a, 0)
    acc_ref[...] += jnp.dot(a, b_ref[...], preferred_element_type=jnp.float32)

    @pl.when(k == pl.num_programs(2) - 1)
    def _():
        y = acc_ref[...]
        if has_o_scale:
            y = y * osc_ref[...]
        if has_o_shift:
            y = y + osh_ref[...]
        if o_relu:
            y = jnp.maximum(y, 0.0)
        o_ref[...] = y.astype(o_ref.dtype)


def pallas_matmul_fused(a, b, *, a_scale=None, a_shift=None, a_relu=False,
                        o_scale=None, o_shift=None, o_relu=False):
    """(M, K) @ (Kp, Np) -> (M, Np) bf16 with f32 MXU accumulation.

    `b` and the optional (1, Kp)/(1, Np) scale/shift vectors are pre-padded to
    lane-aligned shapes at param-prep time (Kp, Np multiples of 128, Kp >= K).
    `a` is padded here only when not already tile-aligned.
    """
    assert (a_scale is None) == (a_shift is None)
    M, K = a.shape
    Kp, Np = b.shape
    a = a.astype(jnp.bfloat16)

    Mp = _round_up(max(M, 1), 16)
    if Mp <= 256:
        tm = Mp
    else:
        tm = 256
        Mp = _round_up(M, tm)
    tk = _pick_tile(Kp)
    tn = _pick_tile(Np)

    if (Mp, Kp) != (M, K):
        a = jnp.pad(a, ((0, Mp - M), (0, Kp - K)))

    has_a_aff = a_scale is not None
    has_o_scale = o_scale is not None
    has_o_shift = o_shift is not None

    inputs = [a, b]
    in_specs = [pl.BlockSpec((tm, tk), lambda i, j, kk: (i, kk)),
                pl.BlockSpec((tk, tn), lambda i, j, kk: (kk, j))]
    if has_a_aff:
        inputs += [a_scale, a_shift]
        in_specs += [pl.BlockSpec((1, tk), lambda i, j, kk: (0, kk)),
                     pl.BlockSpec((1, tk), lambda i, j, kk: (0, kk))]
    if has_o_scale:
        inputs.append(o_scale)
        in_specs.append(pl.BlockSpec((1, tn), lambda i, j, kk: (0, j)))
    if has_o_shift:
        inputs.append(o_shift)
        in_specs.append(pl.BlockSpec((1, tn), lambda i, j, kk: (0, j)))

    kernel = partial(_mm_fused_kernel, has_a_aff=has_a_aff, a_relu=a_relu,
                     has_o_scale=has_o_scale, has_o_shift=has_o_shift,
                     o_relu=o_relu)

    out = pl.pallas_call(
        kernel,
        out_shape=jax.ShapeDtypeStruct((Mp, Np), jnp.bfloat16),
        grid_spec=pltpu.PrefetchScalarGridSpec(
            num_scalar_prefetch=0,
            grid=(Mp // tm, Np // tn, Kp // tk),
            in_specs=in_specs,
            out_specs=pl.BlockSpec((tm, tn), lambda i, j, kk: (i, j)),
            scratch_shapes=[pltpu.VMEM((tm, tn), jnp.float32)]),
        compiler_params=pltpu.CompilerParams(
            dimension_semantics=("parallel", "parallel", "arbitrary")),
    )(*inputs)

    return out[:M] if Mp != M else out


# --------------------------------------------------------------------------
# Sub-pixel (phase) decomposition of ConvTranspose2d (dilation = 1)
# --------------------------------------------------------------------------
def _ntaps(k, s, r):
    return len(range(r, k, s))


def _phase_info(size_in, k, s, p, op):
    """Per-dimension phase decomposition of a 1-D transposed convolution."""
    size_out = (size_in - 1) * s - 2 * p + k + op
    phases = []
    for r in range(s):
        nt = _ntaps(k, s, r)
        if nt == 0:
            continue
        o0 = (r - p) % s
        if o0 >= size_out:
            continue
        q0 = (o0 + p) // s
        n_out = -(-(size_out - o0) // s)
        if n_out <= 0:
            continue
        phases.append(dict(r=r, nt=nt, o0=o0, q0=q0, n_out=n_out))
    lo = min(ph["q0"] - (ph["nt"] - 1) for ph in phases)
    hi = max(ph["q0"] + ph["n_out"] - 1 for ph in phases)
    lpad = max(0, -lo)
    rpad = max(0, hi - (size_in - 1))
    for ph in phases:
        ph["start"] = ph["q0"] - (ph["nt"] - 1) + lpad
    return size_out, lpad, rpad, phases


def conv_transpose_fused(xs, geom, w_by_phase, cout, *, o_shift=None):
    """Phase-decomposed ConvTranspose2d of the K-concatenation of `xs` (NHWC,
    identical spatial dims) against pre-split / flipped / padded bf16 weights,
    with a per-output-channel shift fused into the matmul epilogue."""
    k, s, p, op = geom
    n, h, w = xs[0].shape[:3]
    ho, ly, ry_, phs_y = _phase_info(h, k, s, p, op)
    wo, lx, rx_, phs_x = _phase_info(w, k, s, p, op)
    xps = [jnp.pad(x, ((0, 0), (ly, ry_), (lx, rx_), (0, 0))) for x in xs]

    results = {}
    for py in phs_y:
        for px in phs_x:
            cols = []
            for xp in xps:
                for my in range(py["nt"]):
                    for mx in range(px["nt"]):
                        cols.append(
                            xp[:, py["start"] + my: py["start"] + my + py["n_out"],
                                  px["start"] + mx: px["start"] + mx + px["n_out"], :])
            a = jnp.concatenate(cols, axis=-1)
            a = a.reshape(n * py["n_out"] * px["n_out"], -1)
            o = pallas_matmul_fused(a, w_by_phase[f"p{py['r']}{px['r']}"],
                                    o_shift=o_shift)
            o = o[:, :cout].reshape(n, py["n_out"], px["n_out"], cout)
            results[(py["o0"], px["o0"])] = o

    if s == 1:
        return results[(0, 0)]

    n_y, n_x = phs_y[0]["n_out"], phs_x[0]["n_out"]
    full = (len(results) == s * s
            and all(ph["n_out"] == n_y for ph in phs_y)
            and all(ph["n_out"] == n_x for ph in phs_x)
            and n_y * s == ho and n_x * s == wo)
    if full:  # cheap interleave via stack + reshape (no strided scatter)
        rows = [jnp.stack([results[(oy, ox)] for ox in range(s)], axis=3)
                for oy in range(s)]
        out = jnp.stack(rows, axis=2)             # (n, n_y, s, n_x, s, cout)
        return out.reshape(n, ho, wo, cout)

    out = jnp.zeros((n, ho, wo, cout), jnp.bfloat16)
    for py in phs_y:
        for px in phs_x:
            out = out.at[:, py["o0"]::s, px["o0"]::s, :].set(
                results[(py["o0"], px["o0"])])
    return out


# --------------------------------------------------------------------------
# Residual block & full model forward (eval mode)
# --------------------------------------------------------------------------
def res_block_forward(x, arrs, geom, cout):
    n, h, w, cin = x.shape
    # conv1 (1x1 ConvTranspose == channel matmul) with BN1+ReLU fused as the
    # prologue and BN2+ReLU fused as the epilogue. dropout1/2: identity (eval).
    y1 = pallas_matmul_fused(
        x.reshape(-1, cin), arrs["w1"],
        a_scale=arrs["s1"], a_shift=arrs["t1"], a_relu=True,
        o_scale=arrs["s2"], o_shift=arrs["t2"], o_relu=True)
    y1 = y1[:, :cin].reshape(n, h, w, cin)
    # One fused matmul per output phase computes
    #   a * BN_up(ConvT_up(x) + bias_up)  +  b * ConvT_2(y1)
    # via K-concatenation of the two im2cols against the pre-combined weight.
    return conv_transpose_fused([x, y1], geom, arrs["wc"], cout,
                                o_shift=arrs["shiftc"])


def data_generator_img(feats_nchw, arrs, cfg):
    """feats: (N, 5*DIM, 1, 1) NCHW -> (N, image_channels, 64, 64) NCHW."""
    x = jnp.transpose(feats_nchw, (0, 2, 3, 1)).astype(jnp.bfloat16)
    for blk, geom, cout in zip(arrs["blocks"], cfg["block_geoms"],
                               cfg["block_couts"]):
        x = res_block_forward(x, blk, geom, cout)
    x = conv_transpose_fused([x], cfg["final_geom"], arrs["final"]["wf"],
                             cfg["final_cout"], o_shift=arrs["final"]["biasf"])
    return jnp.transpose(x, (0, 3, 1, 2)).astype(jnp.float32)


# --------------------------------------------------------------------------
# Parameter initialization (PyTorch layout) + one-time fusion / padding prep
# --------------------------------------------------------------------------
def _convT_w(key, cin, cout, k):
    fan = cin * k * k
    return jax.random.normal(key, (cin, cout, k, k), jnp.float32) / jnp.sqrt(fan)


def _bn_params(key, c):
    k1, k2 = jax.random.split(key)
    return dict(gamma=1.0 + 0.1 * jax.random.normal(k1, (c,), jnp.float32),
                beta=0.1 * jax.random.normal(k2, (c,), jnp.float32),
                mean=jnp.zeros((c,), jnp.float32),
                var=jnp.ones((c,), jnp.float32))


def _init_resblock(key, cin, cout, k):
    ks = jax.random.split(key, 7)
    return dict(bn1=_bn_params(ks[0], cin),
                conv1_w=_convT_w(ks[1], cin, cin, 1),
                bn2=_bn_params(ks[2], cin),
                conv2_w=_convT_w(ks[3], cin, cout, k),
                up_w=_convT_w(ks[4], cin, cout, k),
                up_b=0.1 * jax.random.normal(ks[5], (cout,), jnp.float32),
                up_bn=_bn_params(ks[6], cout))


def init_raw_params(key, dim_img, image_channels=3, kernelsize_dec_img=3):
    ks = jax.random.split(key, 6)
    return dict(
        rb=[_init_resblock(ks[0], 5 * dim_img, 4 * dim_img, 4),
            _init_resblock(ks[1], 4 * dim_img, 3 * dim_img, 4),
            _init_resblock(ks[2], 3 * dim_img, 2 * dim_img, 4),
            _init_resblock(ks[3], 2 * dim_img, 1 * dim_img, 4)],
        conv_w=_convT_w(ks[4], dim_img, image_channels, kernelsize_dec_img),
        conv_b=0.1 * jax.random.normal(ks[5], (image_channels,), jnp.float32))


def _bn_scale_shift(bn):
    s = bn["gamma"] / jnp.sqrt(bn["var"] + _EPS)
    return s, bn["beta"] - bn["mean"] * s


def _vec_pad(v, n):
    v = v.astype(jnp.float32)
    if v.shape[0] != n:
        v = jnp.pad(v, (0, n - v.shape[0]))
    return v.reshape(1, n)


def _mat_pad_bf16(w, rows, cols):
    r, c = w.shape
    if (r, c) != (rows, cols):
        w = jnp.pad(w, ((0, rows - r), (0, cols - c)))
    return w.astype(jnp.bfloat16)


def _phase_weight(w, ry, rx, s):
    """Tap subset of a ConvTranspose2d weight (Cin, Cout, k, k) for output
    phase (ry, rx), flipped into correlation order, flattened to (taps*Cin, Cout)."""
    cin, cout, k, _ = w.shape
    kys = list(range(ry, k, s))[::-1]
    kxs = list(range(rx, k, s))[::-1]
    wsub = w[:, :, kys, :][:, :, :, kxs]                # (Cin, Cout, nty, ntx)
    return jnp.transpose(wsub, (2, 3, 0, 1)).reshape(len(kys) * len(kxs) * cin, cout)


def _prep_resblock(raw, geom, a, b):
    k, s, _, _ = geom
    cin = raw["conv1_w"].shape[0]
    cout = raw["conv2_w"].shape[1]
    s1, t1 = _bn_scale_shift(raw["bn1"])
    s2, t2 = _bn_scale_shift(raw["bn2"])
    su, tu = _bn_scale_shift(raw["up_bn"])
    kp1 = _round_up(cin, 128)
    np1 = _round_up(cin, 128)
    npc = _round_up(cout, 128)

    wc = {}
    for ry in range(s):
        if _ntaps(k, s, ry) == 0:
            continue
        for rx in range(s):
            if _ntaps(k, s, rx) == 0:
                continue
            w_up = _phase_weight(raw["up_w"], ry, rx, s) * (a * su)[None, :]
            w_c2 = _phase_weight(raw["conv2_w"], ry, rx, s) * b
            w_comb = jnp.concatenate([w_up, w_c2], axis=0)
            wc[f"p{ry}{rx}"] = _mat_pad_bf16(
                w_comb, _round_up(w_comb.shape[0], 128), npc)

    arrs = dict(
        w1=_mat_pad_bf16(raw["conv1_w"][:, :, 0, 0], kp1, np1),
        s1=_vec_pad(s1, kp1), t1=_vec_pad(t1, kp1),
        s2=_vec_pad(s2, np1), t2=_vec_pad(t2, np1),
        wc=wc,
        shiftc=_vec_pad(a * (raw["up_b"] * su + tu), npc),
    )
    return arrs, cout


def prepare_params(raw, a, b, block_geoms, final_geom):
    blocks, couts = [], []
    for blk, geom in zip(raw["rb"], block_geoms):
        arrs, cout = _prep_resblock(blk, geom, a, b)
        blocks.append(arrs)
        couts.append(cout)

    k, s, _, _ = final_geom
    coutf = raw["conv_w"].shape[1]
    npf = _round_up(coutf, 128)
    wf = {}
    for ry in range(s):
        if _ntaps(k, s, ry) == 0:
            continue
        for rx in range(s):
            if _ntaps(k, s, rx) == 0:
                continue
            wmm = _phase_weight(raw["conv_w"], ry, rx, s)
            wf[f"p{ry}{rx}"] = _mat_pad_bf16(wmm, _round_up(wmm.shape[0], 128), npf)

    arrs = dict(blocks=blocks,
                final=dict(wf=wf, biasf=_vec_pad(raw["conv_b"], npf)))
    cfg = dict(block_geoms=[tuple(g) for g in block_geoms],
               block_couts=couts,
               final_geom=tuple(final_geom),
               final_cout=coutf)
    return arrs, cfg


# --------------------------------------------------------------------------
if __name__ == "__main__":
    DIM_IMG = 16          # small test size (module default is 128)
    IMAGE_CHANNELS = 3
    A_VAL, B_VAL = 0.5, 1.0
    BATCH = 2

    # (kernel, stride, padding, output_padding) per layer, as in the module.
    BLOCK_GEOMS = [(4, 1, 0, 0), (4, 2, 1, 0), (4, 2, 1, 0), (4, 2, 1, 0)]
    FINAL_GEOM = (3, 2, 1, 1)

    key = jax.random.PRNGKey(0)
    k_params, k_feats = jax.random.split(key)
    raw = init_raw_params(k_params, DIM_IMG, IMAGE_CHANNELS, kernelsize_dec_img=3)
    arrs, cfg = prepare_params(raw, A_VAL, B_VAL, BLOCK_GEOMS, FINAL_GEOM)

    # input: latent feature map (N, 5*DIM_img, 1, 1), NCHW as in PyTorch
    feats = jax.random.normal(k_feats, (BATCH, 5 * DIM_IMG, 1, 1), jnp.float32)

    fwd = jax.jit(partial(data_generator_img, cfg=cfg))
    out = jax.block_until_ready(fwd(feats, arrs))

    assert out.shape == (BATCH, IMAGE_CHANNELS, 64, 64), out.shape
    assert bool(jnp.all(jnp.isfinite(out)))
    print("KERNEL_OK")
</pallas_src>

<mosaic_0001>
module attributes {stable_mosaic.version = 11 : i64} {
  func.func @_mm_fused_kernel(%arg0: i32, %arg1: i32, %arg2: i32, %arg3: memref<16x128xbf16, #tpu.memory_space<vmem>>, %arg4: memref<128x128xbf16, #tpu.memory_space<vmem>>, %arg5: memref<1x128xf32, #tpu.memory_space<vmem>>, %arg6: memref<1x128xf32, #tpu.memory_space<vmem>>, %arg7: memref<1x128xf32, #tpu.memory_space<vmem>>, %arg8: memref<1x128xf32, #tpu.memory_space<vmem>>, %arg9: memref<16x128xbf16, #tpu.memory_space<vmem>>, %arg10: memref<16x128xf32, #tpu.memory_space<vmem>>) attributes {dimension_semantics = [#tpu.dimension_semantics<parallel>, #tpu.dimension_semantics<parallel>, #tpu.dimension_semantics<arbitrary>], iteration_bounds = array<i64: 1, 1, 1>, scalar_prefetch = 0 : i64, scratch_operands = 1 : i64, tpu.core_type = #tpu.core_type<tc>, window_params = [{transform_indices = @transform_0, window_bounds = array<i64: 16, 128>}, {transform_indices = @transform_1, window_bounds = array<i64: 128, 128>}, {transform_indices = @transform_2, window_bounds = array<i64: 1, 128>}, {transform_indices = @transform_3, window_bounds = array<i64: 1, 128>}, {transform_indices = @transform_4, window_bounds = array<i64: 1, 128>}, {transform_indices = @transform_5, window_bounds = array<i64: 1, 128>}, {transform_indices = @transform_6, window_bounds = array<i64: 16, 128>}]} {
    %c0_i32 = arith.constant 0 : i32
    %0 = arith.cmpi eq, %arg2, %c0_i32 : i32
    %1 = arith.extui %0 : i1 to i32
    %c0_i32_0 = arith.constant 0 : i32
    %2 = arith.cmpi ne, %1, %c0_i32_0 : i32
    scf.if %2 {
      %cst_15 = arith.constant 0.000000e+00 : f32
      %22 = vector.broadcast %cst_15 : f32 to vector<16x128xf32>
      %c0_16 = arith.constant 0 : index
      %c0_17 = arith.constant 0 : index
      %23 = vector.load %arg10[%c0_16, %c0_17] : memref<16x128xf32, #tpu.memory_space<vmem>>, vector<16x128xf32>
      tpu.vector_store %arg10[%c0_16, %c0_17], %22 {strides = array<i32>} : memref<16x128xf32, #tpu.memory_space<vmem>>, vector<16x128xf32>,
    } else {
    }
    %c0 = arith.constant 0 : index
    %c0_1 = arith.constant 0 : index
    %3 = vector.load %arg3[%c0, %c0_1] : memref<16x128xbf16, #tpu.memory_space<vmem>>, vector<16x128xbf16>
    %4 = arith.extf %3 : vector<16x128xbf16> to vector<16x128xf32>
    %c0_2 = arith.constant 0 : index
    %c0_3 = arith.constant 0 : index
    %5 = vector.load %arg5[%c0_2, %c0_3] : memref<1x128xf32, #tpu.memory_space<vmem>>, vector<1x128xf32>
    %6 = vector.broadcast %5 : vector<1x128xf32> to vector<16x128xf32>
    %7 = arith.mulf %4, %6 : vector<16x128xf32>
    %c0_4 = arith.constant 0 : index
    %c0_5 = arith.constant 0 : index
    %8 = vector.load %arg6[%c0_4, %c0_5] : memref<1x128xf32, #tpu.memory_space<vmem>>, vector<1x128xf32>
    %9 = vector.broadcast %8 : vector<1x128xf32> to vector<16x128xf32>
    %10 = arith.addf %7, %9 : vector<16x128xf32>
    %cst = arith.constant 0.000000e+00 : f32
    %11 = vector.broadcast %cst : f32 to vector<16x128xf32>
    %12 = arith.maximumf %10, %11 : vector<16x128xf32>
    %13 = arith.truncf %12 : vector<16x128xf32> to vector<16x128xbf16>
    %c0_6 = arith.constant 0 : index
    %c0_7 = arith.constant 0 : index
    %14 = vector.load %arg10[%c0_6, %c0_7] : memref<16x128xf32, #tpu.memory_space<vmem>>, vector<16x128xf32>
    %c0_8 = arith.constant 0 : index
    %c0_9 = arith.constant 0 : index
    %15 = vector.load %arg4[%c0_8, %c0_9] : memref<128x128xbf16, #tpu.memory_space<vmem>>, vector<128x128xbf16>
    %cst_10 = arith.constant dense<0.000000e+00> : vector<16x128xf32>
    %16 = tpu.matmul %13, %15, %cst_10 {dimension_numbers = #tpu.dot_dimension_numbers<[1], [0], [0], [1], [0, 0, 1, 1], [], []>} : vector<16x128xbf16>, vector<128x128xbf16>, vector<16x128xf32> -> vector<16x128xf32>
    %17 = arith.addf %14, %16 : vector<16x128xf32>
    %c0_11 = arith.constant 0 : index
    %c0_12 = arith.constant 0 : index
    %18 = vector.load %arg10[%c0_11, %c0_12] : memref<16x128xf32, #tpu.memory_space<vmem>>, vector<16x128xf32>
    tpu.vector_store %arg10[%c0_11, %c0_12], %17 {strides = array<i32>} : memref<16x128xf32, #tpu.memory_space<vmem>>, vector<16x128xf32>,
    %c0_i32_13 = arith.constant 0 : i32
    %19 = arith.cmpi eq, %arg2, %c0_i32_13 : i32
    %20 = arith.extui %19 : i1 to i32
    %c0_i32_14 = arith.constant 0 : i32
    %21 = arith.cmpi ne, %20, %c0_i32_14 : i32
    scf.if %21 {
      %c0_15 = arith.constant 0 : index
      %c0_16 = arith.constant 0 : index
      %22 = vector.load %arg10[%c0_15, %c0_16] : memref<16x128xf32, #tpu.memory_space<vmem>>, vector<16x128xf32>
      %c0_17 = arith.constant 0 : index
      %c0_18 = arith.constant 0 : index
      %23 = vector.load %arg7[%c0_17, %c0_18] : memref<1x128xf32, #tpu.memory_space<vmem>>, vector<1x128xf32>
      %24 = vector.broadcast %23 : vector<1x128xf32> to vector<16x128xf32>
      %25 = arith.mulf %22, %24 : vector<16x128xf32>
      %c0_19 = arith.constant 0 : index
      %c0_20 = arith.constant 0 : index
      %26 = vector.load %arg8[%c0_19, %c0_20] : memref<1x128xf32, #tpu.memory_space<vmem>>, vector<1x128xf32>
      %27 = vector.broadcast %26 : vector<1x128xf32> to vector<16x128xf32>
      %28 = arith.addf %25, %27 : vector<16x128xf32>
      %cst_21 = arith.constant 0.000000e+00 : f32
      %29 = vector.broadcast %cst_21 : f32 to vector<16x128xf32>
      %30 = arith.maximumf %28, %29 : vector<16x128xf32>
      %31 = arith.truncf %30 : vector<16x128xf32> to vector<16x128xbf16>
      %c0_22 = arith.constant 0 : index
      %c0_23 = arith.constant 0 : index
      %32 = vector.load %arg9[%c0_22, %c0_23] : memref<16x128xbf16, #tpu.memory_space<vmem>>, vector<16x128xbf16>
      tpu.vector_store %arg9[%c0_22, %c0_23], %31 {strides = array<i32>} : memref<16x128xbf16, #tpu.memory_space<vmem>>, vector<16x128xbf16>,
    } else {
    }
    return
  }
  func.func @transform_0(%arg0: i32, %arg1: i32, %arg2: i32) -> (i32, i32) {
    %c0_i32 = arith.constant 0 : i32
    return %arg0, %arg2 : i32, i32
  }
  func.func @transform_1(%arg0: i32, %arg1: i32, %arg2: i32) -> (i32, i32) {
    %c0_i32 = arith.constant 0 : i32
    return %arg2, %arg1 : i32, i32
  }
  func.func @transform_2(%arg0: i32, %arg1: i32, %arg2: i32) -> (i32, i32) {
    %c0_i32 = arith.constant 0 : i32
    %c0_i32_0 = arith.constant 0 : i32
    return %c0_i32, %arg2 : i32, i32
  }
  func.func @transform_3(%arg0: i32, %arg1: i32, %arg2: i32) -> (i32, i32) {
    %c0_i32 = arith.constant 0 : i32
    %c0_i32_0 = arith.constant 0 : i32
    return %c0_i32, %arg2 : i32, i32
  }
  func.func @transform_4(%arg0: i32, %arg1: i32, %arg2: i32) -> (i32, i32) {
    %c0_i32 = arith.constant 0 : i32
    %c0_i32_0 = arith.constant 0 : i32
    return %c0_i32, %arg1 : i32, i32
  }
  func.func @transform_5(%arg0: i32, %arg1: i32, %arg2: i32) -> (i32, i32) {
    %c0_i32 = arith.constant 0 : i32
    %c0_i32_0 = arith.constant 0 : i32
    return %c0_i32, %arg1 : i32, i32
  }
  func.func @transform_6(%arg0: i32, %arg1: i32, %arg2: i32) -> (i32, i32) {
    %c0_i32 = arith.constant 0 : i32
    return %arg0, %arg1 : i32, i32
  }
}

module attributes {stable_mosaic.version = 11 : i64} {
  func.func @_mm_fused_kernel(%arg0: i32, %arg1: i32, %arg2: i32, %arg3: memref<32x512xbf16, #tpu.memory_space<vmem>>, %arg4: memref<512x128xbf16, #tpu.memory_space<vmem>>, %arg5: memref<1x128xf32, #tpu.memory_space<vmem>>, %arg6: memref<32x128xbf16, #tpu.memory_space<vmem>>, %arg7: memref<32x128xf32, #tpu.memory_space<vmem>>) attributes {dimension_semantics = [#tpu.dimension_semantics<parallel>, #tpu.dimension_semantics<parallel>, #tpu.dimension_semantics<arbitrary>], iteration_bounds = array<i64: 1, 1, 5>, scalar_prefetch = 0 : i64, scratch_operands = 1 : i64, tpu.core_type = #tpu.core_type<tc>, window_params = [{transform_indices = @transform_0, window_bounds = array<i64: 32, 512>}, {transform_indices = @transform_1, window_bounds = array<i64: 512, 128>}, {transform_indices = @transform_2, window_bounds = array<i64: 1, 128>}, {transform_indices = @transform_3, window_bounds = array<i64: 32, 128>}]} {
    %c0_i32 = arith.constant 0 : i32
    %0 = arith.cmpi eq, %arg2, %c0_i32 : i32
    %1 = arith.extui %0 : i1 to i32
    %c0_i32_0 = arith.constant 0 : i32
    %2 = arith.cmpi ne, %1, %c0_i32_0 : i32
    scf.if %2 {
      %cst_9 = arith.constant 0.000000e+00 : f32
      %12 = vector.broadcast %cst_9 : f32 to vector<32x128xf32>
      %c0_10 = arith.constant 0 : index
      %c0_11 = arith.constant 0 : index
      %13 = vector.load %arg7[%c0_10, %c0_11] : memref<32x128xf32, #tpu.memory_space<vmem>>, vector<32x128xf32>
      tpu.vector_store %arg7[%c0_10, %c0_11], %12 {strides = array<i32>} : memref<32x128xf32, #tpu.memory_space<vmem>>, vector<32x128xf32>,
    } else {
    }
    %c0 = arith.constant 0 : index
    %c0_1 = arith.constant 0 : index
    %3 = vector.load %arg3[%c0, %c0_1] : memref<32x512xbf16, #tpu.memory_space<vmem>>, vector<32x512xbf16>
    %c0_2 = arith.constant 0 : index
    %c0_3 = arith.constant 0 : index
    %4 = vector.load %arg7[%c0_2, %c0_3] : memref<32x128xf32, #tpu.memory_space<vmem>>, vector<32x128xf32>
    %c0_4 = arith.constant 0 : index
    %c0_5 = arith.constant 0 : index
    %5 = vector.load %arg4[%c0_4, %c0_5] : memref<512x128xbf16, #tpu.memory_space<vmem>>, vector<512x128xbf16>
    %cst = arith.constant dense<0.000000e+00> : vector<32x128xf32>
    %6 = tpu.matmul %3, %5, %cst {dimension_numbers = #tpu.dot_dimension_numbers<[1], [0], [0], [1], [0, 0, 1, 1], [], []>} : vector<32x512xbf16>, vector<512x128xbf16>, vector<32x128xf32> -> vector<32x128xf32>
    %7 = arith.addf %4, %6 : vector<32x128xf32>
    %c0_6 = arith.constant 0 : index
    %c0_7 = arith.constant 0 : index
    %8 = vector.load %arg7[%c0_6, %c0_7] : memref<32x128xf32, #tpu.memory_space<vmem>>, vector<32x128xf32>
    tpu.vector_store %arg7[%c0_6, %c0_7], %7 {strides = array<i32>} : memref<32x128xf32, #tpu.memory_space<vmem>>, vector<32x128xf32>,
    %c4_i32 = arith.constant 4 : i32
    %9 = arith.cmpi eq, %arg2, %c4_i32 : i32
    %10 = arith.extui %9 : i1 to i32
    %c0_i32_8 = arith.constant 0 : i32
    %11 = arith.cmpi ne, %10, %c0_i32_8 : i32
    scf.if %11 {
      %c0_9 = arith.constant 0 : index
      %c0_10 = arith.constant 0 : index
      %12 = vector.load %arg7[%c0_9, %c0_10] : memref<32x128xf32, #tpu.memory_space<vmem>>, vector<32x128xf32>
      %c0_11 = arith.constant 0 : index
      %c0_12 = arith.constant 0 : index
      %13 = vector.load %arg5[%c0_11, %c0_12] : memref<1x128xf32, #tpu.memory_space<vmem>>, vector<1x128xf32>
      %14 = vector.broadcast %13 : vector<1x128xf32> to vector<32x128xf32>
      %15 = arith.addf %12, %14 : vector<32x128xf32>
      %16 = arith.truncf %15 : vector<32x128xf32> to vector<32x128xbf16>
      %c0_13 = arith.constant 0 : index
      %c0_14 = arith.constant 0 : index
      %17 = vector.load %arg6[%c0_13, %c0_14] : memref<32x128xbf16, #tpu.memory_space<vmem>>, vector<32x128xbf16>
      tpu.vector_store %arg6[%c0_13, %c0_14], %16 {strides = array<i32>} : memref<32x128xbf16, #tpu.memory_space<vmem>>, vector<32x128xbf16>,
    } else {
    }
    return
  }
  func.func @transform_0(%arg0: i32, %arg1: i32, %arg2: i32) -> (i32, i32) {
    %c0_i32 = arith.constant 0 : i32
    return %arg0, %arg2 : i32, i32
  }
  func.func @transform_1(%arg0: i32, %arg1: i32, %arg2: i32) -> (i32, i32) {
    %c0_i32 = arith.constant 0 : i32
    return %arg2, %arg1 : i32, i32
  }
  func.func @transform_2(%arg0: i32, %arg1: i32, %arg2: i32) -> (i32, i32) {
    %c0_i32 = arith.constant 0 : i32
    %c0_i32_0 = arith.constant 0 : i32
    return %c0_i32, %arg1 : i32, i32
  }
  func.func @transform_3(%arg0: i32, %arg1: i32, %arg2: i32) -> (i32, i32) {
    %c0_i32 = arith.constant 0 : i32
    return %arg0, %arg1 : i32, i32
  }
}

module attributes {stable_mosaic.version = 11 : i64} {
  func.func @_mm_fused_kernel(%arg0: i32, %arg1: i32, %arg2: i32, %arg3: memref<32x128xbf16, #tpu.memory_space<vmem>>, %arg4: memref<128x128xbf16, #tpu.memory_space<vmem>>, %arg5: memref<1x128xf32, #tpu.memory_space<vmem>>, %arg6: memref<1x128xf32, #tpu.memory_space<vmem>>, %arg7: memref<1x128xf32, #tpu.memory_space<vmem>>, %arg8: memref<1x128xf32, #tpu.memory_space<vmem>>, %arg9: memref<32x128xbf16, #tpu.memory_space<vmem>>, %arg10: memref<32x128xf32, #tpu.memory_space<vmem>>) attributes {dimension_semantics = [#tpu.dimension_semantics<parallel>, #tpu.dimension_semantics<parallel>, #tpu.dimension_semantics<arbitrary>], iteration_bounds = array<i64: 1, 1, 1>, scalar_prefetch = 0 : i64, scratch_operands = 1 : i64, tpu.core_type = #tpu.core_type<tc>, window_params = [{transform_indices = @transform_0, window_bounds = array<i64: 32, 128>}, {transform_indices = @transform_1, window_bounds = array<i64: 128, 128>}, {transform_indices = @transform_2, window_bounds = array<i64: 1, 128>}, {transform_indices = @transform_3, window_bounds = array<i64: 1, 128>}, {transform_indices = @transform_4, window_bounds = array<i64: 1, 128>}, {transform_indices = @transform_5, window_bounds = array<i64: 1, 128>}, {transform_indices = @transform_6, window_bounds = array<i64: 32, 128>}]} {
    %c0_i32 = arith.constant 0 : i32
    %0 = arith.cmpi eq, %arg2, %c0_i32 : i32
    %1 = arith.extui %0 : i1 to i32
    %c0_i32_0 = arith.constant 0 : i32
    %2 = arith.cmpi ne, %1, %c0_i32_0 : i32
    scf.if %2 {
      %cst_15 = arith.constant 0.000000e+00 : f32
      %22 = vector.broadcast %cst_15 : f32 to vector<32x128xf32>
      %c0_16 = arith.constant 0 : index
      %c0_17 = arith.constant 0 : index
      %23 = vector.load %arg10[%c0_16, %c0_17] : memref<32x128xf32, #tpu.memory_space<vmem>>, vector<32x128xf32>
      tpu.vector_store %arg10[%c0_16, %c0_17], %22 {strides = array<i32>} : memref<32x128xf32, #tpu.memory_space<vmem>>, vector<32x128xf32>,
    } else {
    }
    %c0 = arith.constant 0 : index
    %c0_1 = arith.constant 0 : index
    %3 = vector.load %arg3[%c0, %c0_1] : memref<32x128xbf16, #tpu.memory_space<vmem>>, vector<32x128xbf16>
    %4 = arith.extf %3 : vector<32x128xbf16> to vector<32x128xf32>
    %c0_2 = arith.constant 0 : index
    %c0_3 = arith.constant 0 : index
    %5 = vector.load %arg5[%c0_2, %c0_3] : memref<1x128xf32, #tpu.memory_space<vmem>>, vector<1x128xf32>
    %6 = vector.broadcast %5 : vector<1x128xf32> to vector<32x128xf32>
    %7 = arith.mulf %4, %6 : vector<32x128xf32>
    %c0_4 = arith.constant 0 : index
    %c0_5 = arith.constant 0 : index
    %8 = vector.load %arg6[%c0_4, %c0_5] : memref<1x128xf32, #tpu.memory_space<vmem>>, vector<1x128xf32>
    %9 = vector.broadcast %8 : vector<1x128xf32> to vector<32x128xf32>
    %10 = arith.addf %7, %9 : vector<32x128xf32>
    %cst = arith.constant 0.000000e+00 : f32
    %11 = vector.broadcast %cst : f32 to vector<32x128xf32>
    %12 = arith.maximumf %10, %11 : vector<32x128xf32>
    %13 = arith.truncf %12 : vector<32x128xf32> to vector<32x128xbf16>
    %c0_6 = arith.constant 0 : index
    %c0_7 = arith.constant 0 : index
    %14 = vector.load %arg10[%c0_6, %c0_7] : memref<32x128xf32, #tpu.memory_space<vmem>>, vector<32x128xf32>
    %c0_8 = arith.constant 0 : index
    %c0_9 = arith.constant 0 : index
    %15 = vector.load %arg4[%c0_8, %c0_9] : memref<128x128xbf16, #tpu.memory_space<vmem>>, vector<128x128xbf16>
    %cst_10 = arith.constant dense<0.000000e+00> : vector<32x128xf32>
    %16 = tpu.matmul %13, %15, %cst_10 {dimension_numbers = #tpu.dot_dimension_numbers<[1], [0], [0], [1], [0, 0, 1, 1], [], []>} : vector<32x128xbf16>, vector<128x128xbf16>, vector<32x128xf32> -> vector<32x128xf32>
    %17 = arith.addf %14, %16 : vector<32x128xf32>
    %c0_11 = arith.constant 0 : index
    %c0_12 = arith.constant 0 : index
    %18 = vector.load %arg10[%c0_11, %c0_12] : memref<32x128xf32, #tpu.memory_space<vmem>>, vector<32x128xf32>
    tpu.vector_store %arg10[%c0_11, %c0_12], %17 {strides = array<i32>} : memref<32x128xf32, #tpu.memory_space<vmem>>, vector<32x128xf32>,
    %c0_i32_13 = arith.constant 0 : i32
    %19 = arith.cmpi eq, %arg2, %c0_i32_13 : i32
    %20 = arith.extui %19 : i1 to i32
    %c0_i32_14 = arith.constant 0 : i32
    %21 = arith.cmpi ne, %20, %c0_i32_14 : i32
    scf.if %21 {
      %c0_15 = arith.constant 0 : index
      %c0_16 = arith.constant 0 : index
      %22 = vector.load %arg10[%c0_15, %c0_16] : memref<32x128xf32, #tpu.memory_space<vmem>>, vector<32x128xf32>
      %c0_17 = arith.constant 0 : index
      %c0_18 = arith.constant 0 : index
      %23 = vector.load %arg7[%c0_17, %c0_18] : memref<1x128xf32, #tpu.memory_space<vmem>>, vector<1x128xf32>
      %24 = vector.broadcast %23 : vector<1x128xf32> to vector<32x128xf32>
      %25 = arith.mulf %22, %24 : vector<32x128xf32>
      %c0_19 = arith.constant 0 : index
      %c0_20 = arith.constant 0 : index
      %26 = vector.load %arg8[%c0_19, %c0_20] : memref<1x128xf32, #tpu.memory_space<vmem>>, vector<1x128xf32>
      %27 = vector.broadcast %26 : vector<1x128xf32> to vector<32x128xf32>
      %28 = arith.addf %25, %27 : vector<32x128xf32>
      %cst_21 = arith.constant 0.000000e+00 : f32
      %29 = vector.broadcast %cst_21 : f32 to vector<32x128xf32>
      %30 = arith.maximumf %28, %29 : vector<32x128xf32>
      %31 = arith.truncf %30 : vector<32x128xf32> to vector<32x128xbf16>
      %c0_22 = arith.constant 0 : index
      %c0_23 = arith.constant 0 : index
      %32 = vector.load %arg9[%c0_22, %c0_23] : memref<32x128xbf16, #tpu.memory_space<vmem>>, vector<32x128xbf16>
      tpu.vector_store %arg9[%c0_22, %c0_23], %31 {strides = array<i32>} : memref<32x128xbf16, #tpu.memory_space<vmem>>, vector<32x128xbf16>,
    } else {
    }
    return
  }
  func.func @transform_0(%arg0: i32, %arg1: i32, %arg2: i32) -> (i32, i32) {
    %c0_i32 = arith.constant 0 : i32
    return %arg0, %arg2 : i32, i32
  }
  func.func @transform_1(%arg0: i32, %arg1: i32, %arg2: i32) -> (i32, i32) {
    %c0_i32 = arith.constant 0 : i32
    return %arg2, %arg1 : i32, i32
  }
  func.func @transform_2(%arg0: i32, %arg1: i32, %arg2: i32) -> (i32, i32) {
    %c0_i32 = arith.constant 0 : i32
    %c0_i32_0 = arith.constant 0 : i32
    return %c0_i32, %arg2 : i32, i32
  }
  func.func @transform_3(%arg0: i32, %arg1: i32, %arg2: i32) -> (i32, i32) {
    %c0_i32 = arith.constant 0 : i32
    %c0_i32_0 = arith.constant 0 : i32
    return %c0_i32, %arg2 : i32, i32
  }
  func.func @transform_4(%arg0: i32, %arg1: i32, %arg2: i32) -> (i32, i32) {
    %c0_i32 = arith.constant 0 : i32
    %c0_i32_0 = arith.constant 0 : i32
    return %c0_i32, %arg1 : i32, i32
  }
  func.func @transform_5(%arg0: i32, %arg1: i32, %arg2: i32) -> (i32, i32) {
    %c0_i32 = arith.constant 0 : i32
    %c0_i32_0 = arith.constant 0 : i32
    return %c0_i32, %arg1 : i32, i32
  }
  func.func @transform_6(%arg0: i32, %arg1: i32, %arg2: i32) -> (i32, i32) {
    %c0_i32 = arith.constant 0 : i32
    return %arg0, %arg1 : i32, i32
  }
}

module attributes {stable_mosaic.version = 11 : i64} {
  func.func @_mm_fused_kernel(%arg0: i32, %arg1: i32, %arg2: i32, %arg3: memref<32x512xbf16, #tpu.memory_space<vmem>>, %arg4: memref<512x128xbf16, #tpu.memory_space<vmem>>, %arg5: memref<1x128xf32, #tpu.memory_space<vmem>>, %arg6: memref<32x128xbf16, #tpu.memory_space<vmem>>, %arg7: memref<32x128xf32, #tpu.memory_space<vmem>>) attributes {dimension_semantics = [#tpu.dimension_semantics<parallel>, #tpu.dimension_semantics<parallel>, #tpu.dimension_semantics<arbitrary>], iteration_bounds = array<i64: 1, 1, 1>, scalar_prefetch = 0 : i64, scratch_operands = 1 : i64, tpu.core_type = #tpu.core_type<tc>, window_params = [{transform_indices = @transform_0, window_bounds = array<i64: 32, 512>}, {transform_indices = @transform_1, window_bounds = array<i64: 512, 128>}, {transform_indices = @transform_2, window_bounds = array<i64: 1, 128>}, {transform_indices = @transform_3, window_bounds = array<i64: 32, 128>}]} {
    %c0_i32 = arith.constant 0 : i32
    %0 = arith.cmpi eq, %arg2, %c0_i32 : i32
    %1 = arith.extui %0 : i1 to i32
    %c0_i32_0 = arith.constant 0 : i32
    %2 = arith.cmpi ne, %1, %c0_i32_0 : i32
    scf.if %2 {
      %cst_10 = arith.constant 0.000000e+00 : f32
      %12 = vector.broadcast %cst_10 : f32 to vector<32x128xf32>
      %c0_11 = arith.constant 0 : index
      %c0_12 = arith.constant 0 : index
      %13 = vector.load %arg7[%c0_11, %c0_12] : memref<32x128xf32, #tpu.memory_space<vmem>>, vector<32x128xf32>
      tpu.vector_store %arg7[%c0_11, %c0_12], %12 {strides = array<i32>} : memref<32x128xf32, #tpu.memory_space<vmem>>, vector<32x128xf32>,
    } else {
    }
    %c0 = arith.constant 0 : index
    %c0_1 = arith.constant 0 : index
    %3 = vector.load %arg3[%c0, %c0_1] : memref<32x512xbf16, #tpu.memory_space<vmem>>, vector<32x512xbf16>
    %c0_2 = arith.constant 0 : index
    %c0_3 = arith.constant 0 : index
    %4 = vector.load %arg7[%c0_2, %c0_3] : memref<32x128xf32, #tpu.memory_space<vmem>>, vector<32x128xf32>
    %c0_4 = arith.constant 0 : index
    %c0_5 = arith.constant 0 : index
    %5 = vector.load %arg4[%c0_4, %c0_5] : memref<512x128xbf16, #tpu.memory_space<vmem>>, vector<512x128xbf16>
    %cst = arith.constant dense<0.000000e+00> : vector<32x128xf32>
    %6 = tpu.matmul %3, %5, %cst {dimension_numbers = #tpu.dot_dimension_numbers<[1], [0], [0], [1], [0, 0, 1, 1], [], []>} : vector<32x512xbf16>, vector<512x128xbf16>, vector<32x128xf32> -> vector<32x128xf32>
    %7 = arith.addf %4, %6 : vector<32x128xf32>
    %c0_6 = arith.constant 0 : index
    %c0_7 = arith.constant 0 : index
    %8 = vector.load %arg7[%c0_6, %c0_7] : memref<32x128xf32, #tpu.memory_space<vmem>>, vector<32x128xf32>
    tpu.vector_store %arg7[%c0_6, %c0_7], %7 {strides = array<i32>} : memref<32x128xf32, #tpu.memory_space<vmem>>, vector<32x128xf32>,
    %c0_i32_8 = arith.constant 0 : i32
    %9 = arith.cmpi eq, %arg2, %c0_i32_8 : i32
    %10 = arith.extui %9 : i1 to i32
    %c0_i32_9 = arith.constant 0 : i32
    %11 = arith.cmpi ne, %10, %c0_i32_9 : i32
    scf.if %11 {
      %c0_10 = arith.constant 0 : index
      %c0_11 = arith.constant 0 : index
      %12 = vector.load %arg7[%c0_10, %c0_11] : memref<32x128xf32, #tpu.memory_space<vmem>>, vector<32x128xf32>
      %c0_12 = arith.constant 0 : index
      %c0_13 = arith.constant 0 : index
      %13 = vector.load %arg5[%c0_12, %c0_13] : memref<1x128xf32, #tpu.memory_space<vmem>>, vector<1x128xf32>
      %14 = vector.broadcast %13 : vector<1x128xf32> to vector<32x128xf32>
      %15 = arith.addf %12, %14 : vector<32x128xf32>
      %16 = arith.truncf %15 : vector<32x128xf32> to vector<32x128xbf16>
      %c0_14 = arith.constant 0 : index
      %c0_15 = arith.constant 0 : index
      %17 = vector.load %arg6[%c0_14, %c0_15] : memref<32x128xbf16, #tpu.memory_space<vmem>>, vector<32x128xbf16>
      tpu.vector_store %arg6[%c0_14, %c0_15], %16 {strides = array<i32>} : memref<32x128xbf16, #tpu.memory_space<vmem>>, vector<32x128xbf16>,
    } else {
    }
    return
  }
  func.func @transform_0(%arg0: i32, %arg1: i32, %arg2: i32) -> (i32, i32) {
    %c0_i32 = arith.constant 0 : i32
    return %arg0, %arg2 : i32, i32
  }
  func.func @transform_1(%arg0: i32, %arg1: i32, %arg2: i32) -> (i32, i32) {
    %c0_i32 = arith.constant 0 : i32
    return %arg2, %arg1 : i32, i32
  }
  func.func @transform_2(%arg0: i32, %arg1: i32, %arg2: i32) -> (i32, i32) {
    %c0_i32 = arith.constant 0 : i32
    %c0_i32_0 = arith.constant 0 : i32
    return %c0_i32, %arg1 : i32, i32
  }
  func.func @transform_3(%arg0: i32, %arg1: i32, %arg2: i32) -> (i32, i32) {
    %c0_i32 = arith.constant 0 : i32
    return %arg0, %arg1 : i32, i32
  }
}

module attributes {stable_mosaic.version = 11 : i64} {
  func.func @_mm_fused_kernel(%arg0: i32, %arg1: i32, %arg2: i32, %arg3: memref<128x128xbf16, #tpu.memory_space<vmem>>, %arg4: memref<128x128xbf16, #tpu.memory_space<vmem>>, %arg5: memref<1x128xf32, #tpu.memory_space<vmem>>, %arg6: memref<1x128xf32, #tpu.memory_space<vmem>>, %arg7: memref<1x128xf32, #tpu.memory_space<vmem>>, %arg8: memref<1x128xf32, #tpu.memory_space<vmem>>, %arg9: memref<128x128xbf16, #tpu.memory_space<vmem>>, %arg10: memref<128x128xf32, #tpu.memory_space<vmem>>) attributes {dimension_semantics = [#tpu.dimension_semantics<parallel>, #tpu.dimension_semantics<parallel>, #tpu.dimension_semantics<arbitrary>], iteration_bounds = array<i64: 1, 1, 1>, scalar_prefetch = 0 : i64, scratch_operands = 1 : i64, tpu.core_type = #tpu.core_type<tc>, window_params = [{transform_indices = @transform_0, window_bounds = array<i64: 128, 128>}, {transform_indices = @transform_1, window_bounds = array<i64: 128, 128>}, {transform_indices = @transform_2, window_bounds = array<i64: 1, 128>}, {transform_indices = @transform_3, window_bounds = array<i64: 1, 128>}, {transform_indices = @transform_4, window_bounds = array<i64: 1, 128>}, {transform_indices = @transform_5, window_bounds = array<i64: 1, 128>}, {transform_indices = @transform_6, window_bounds = array<i64: 128, 128>}]} {
    %c0_i32 = arith.constant 0 : i32
    %0 = arith.cmpi eq, %arg2, %c0_i32 : i32
    %1 = arith.extui %0 : i1 to i32
    %c0_i32_0 = arith.constant 0 : i32
    %2 = arith.cmpi ne, %1, %c0_i32_0 : i32
    scf.if %2 {
      %cst_15 = arith.constant 0.000000e+00 : f32
      %22 = vector.broadcast %cst_15 : f32 to vector<128x128xf32>
      %c0_16 = arith.constant 0 : index
      %c0_17 = arith.constant 0 : index
      %23 = vector.load %arg10[%c0_16, %c0_17] : memref<128x128xf32, #tpu.memory_space<vmem>>, vector<128x128xf32>
      tpu.vector_store %arg10[%c0_16, %c0_17], %22 {strides = array<i32>} : memref<128x128xf32, #tpu.memory_space<vmem>>, vector<128x128xf32>,
    } else {
    }
    %c0 = arith.constant 0 : index
    %c0_1 = arith.constant 0 : index
    %3 = vector.load %arg3[%c0, %c0_1] : memref<128x128xbf16, #tpu.memory_space<vmem>>, vector<128x128xbf16>
    %4 = arith.extf %3 : vector<128x128xbf16> to vector<128x128xf32>
    %c0_2 = arith.constant 0 : index
    %c0_3 = arith.constant 0 : index
    %5 = vector.load %arg5[%c0_2, %c0_3] : memref<1x128xf32, #tpu.memory_space<vmem>>, vector<1x128xf32>
    %6 = vector.broadcast %5 : vector<1x128xf32> to vector<128x128xf32>
    %7 = arith.mulf %4, %6 : vector<128x128xf32>
    %c0_4 = arith.constant 0 : index
    %c0_5 = arith.constant 0 : index
    %8 = vector.load %arg6[%c0_4, %c0_5] : memref<1x128xf32, #tpu.memory_space<vmem>>, vector<1x128xf32>
    %9 = vector.broadcast %8 : vector<1x128xf32> to vector<128x128xf32>
    %10 = arith.addf %7, %9 : vector<128x128xf32>
    %cst = arith.constant 0.000000e+00 : f32
    %11 = vector.broadcast %cst : f32 to vector<128x128xf32>
    %12 = arith.maximumf %10, %11 : vector<128x128xf32>
    %13 = arith.truncf %12 : vector<128x128xf32> to vector<128x128xbf16>
    %c0_6 = arith.constant 0 : index
    %c0_7 = arith.constant 0 : index
    %14 = vector.load %arg10[%c0_6, %c0_7] : memref<128x128xf32, #tpu.memory_space<vmem>>, vector<128x128xf32>
    %c0_8 = arith.constant 0 : index
    %c0_9 = arith.constant 0 : index
    %15 = vector.load %arg4[%c0_8, %c0_9] : memref<128x128xbf16, #tpu.memory_space<vmem>>, vector<128x128xbf16>
    %cst_10 = arith.constant dense<0.000000e+00> : vector<128x128xf32>
    %16 = tpu.matmul %13, %15, %cst_10 {dimension_numbers = #tpu.dot_dimension_numbers<[1], [0], [0], [1], [0, 0, 1, 1], [], []>} : vector<128x128xbf16>, vector<128x128xbf16>, vector<128x128xf32> -> vector<128x128xf32>
    %17 = arith.addf %14, %16 : vector<128x128xf32>
    %c0_11 = arith.constant 0 : index
    %c0_12 = arith.constant 0 : index
    %18 = vector.load %arg10[%c0_11, %c0_12] : memref<128x128xf32, #tpu.memory_space<vmem>>, vector<128x128xf32>
    tpu.vector_store %arg10[%c0_11, %c0_12], %17 {strides = array<i32>} : memref<128x128xf32, #tpu.memory_space<vmem>>, vector<128x128xf32>,
    %c0_i32_13 = arith.constant 0 : i32
    %19 = arith.cmpi eq, %arg2, %c0_i32_13 : i32
    %20 = arith.extui %19 : i1 to i32
    %c0_i32_14 = arith.constant 0 : i32
    %21 = arith.cmpi ne, %20, %c0_i32_14 : i32
    scf.if %21 {
      %c0_15 = arith.constant 0 : index
      %c0_16 = arith.constant 0 : index
      %22 = vector.load %arg10[%c0_15, %c0_16] : memref<128x128xf32, #tpu.memory_space<vmem>>, vector<128x128xf32>
      %c0_17 = arith.constant 0 : index
      %c0_18 = arith.constant 0 : index
      %23 = vector.load %arg7[%c0_17, %c0_18] : memref<1x128xf32, #tpu.memory_space<vmem>>, vector<1x128xf32>
      %24 = vector.broadcast %23 : vector<1x128xf32> to vector<128x128xf32>
      %25 = arith.mulf %22, %24 : vector<128x128xf32>
      %c0_19 = arith.constant 0 : index
      %c0_20 = arith.constant 0 : index
      %26 = vector.load %arg8[%c0_19, %c0_20] : memref<1x128xf32, #tpu.memory_space<vmem>>, vector<1x128xf32>
      %27 = vector.broadcast %26 : vector<1x128xf32> to vector<128x128xf32>
      %28 = arith.addf %25, %27 : vector<128x128xf32>
      %cst_21 = arith.constant 0.000000e+00 : f32
      %29 = vector.broadcast %cst_21 : f32 to vector<128x128xf32>
      %30 = arith.maximumf %28, %29 : vector<128x128xf32>
      %31 = arith.truncf %30 : vector<128x128xf32> to vector<128x128xbf16>
      %c0_22 = arith.constant 0 : index
      %c0_23 = arith.constant 0 : index
      %32 = vector.load %arg9[%c0_22, %c0_23] : memref<128x128xbf16, #tpu.memory_space<vmem>>, vector<128x128xbf16>
      tpu.vector_store %arg9[%c0_22, %c0_23], %31 {strides = array<i32>} : memref<128x128xbf16, #tpu.memory_space<vmem>>, vector<128x128xbf16>,
    } else {
    }
    return
  }
  func.func @transform_0(%arg0: i32, %arg1: i32, %arg2: i32) -> (i32, i32) {
    %c0_i32 = arith.constant 0 : i32
    return %arg0, %arg2 : i32, i32
  }
  func.func @transform_1(%arg0: i32, %arg1: i32, %arg2: i32) -> (i32, i32) {
    %c0_i32 = arith.constant 0 : i32
    return %arg2, %arg1 : i32, i32
  }
  func.func @transform_2(%arg0: i32, %arg1: i32, %arg2: i32) -> (i32, i32) {
    %c0_i32 = arith.constant 0 : i32
    %c0_i32_0 = arith.constant 0 : i32
    return %c0_i32, %arg2 : i32, i32
  }
  func.func @transform_3(%arg0: i32, %arg1: i32, %arg2: i32) -> (i32, i32) {
    %c0_i32 = arith.constant 0 : i32
    %c0_i32_0 = arith.constant 0 : i32
    return %c0_i32, %arg2 : i32, i32
  }
  func.func @transform_4(%arg0: i32, %arg1: i32, %arg2: i32) -> (i32, i32) {
    %c0_i32 = arith.constant 0 : i32
    %c0_i32_0 = arith.constant 0 : i32
    return %c0_i32, %arg1 : i32, i32
  }
  func.func @transform_5(%arg0: i32, %arg1: i32, %arg2: i32) -> (i32, i32) {
    %c0_i32 = arith.constant 0 : i32
    %c0_i32_0 = arith.constant 0 : i32
    return %c0_i32, %arg1 : i32, i32
  }
  func.func @transform_6(%arg0: i32, %arg1: i32, %arg2: i32) -> (i32, i32) {
    %c0_i32 = arith.constant 0 : i32
    return %arg0, %arg1 : i32, i32
  }
}

module attributes {stable_mosaic.version = 11 : i64} {
  func.func @_mm_fused_kernel(%arg0: i32, %arg1: i32, %arg2: i32, %arg3: memref<128x384xbf16, #tpu.memory_space<vmem>>, %arg4: memref<384x128xbf16, #tpu.memory_space<vmem>>, %arg5: memref<1x128xf32, #tpu.memory_space<vmem>>, %arg6: memref<128x128xbf16, #tpu.memory_space<vmem>>, %arg7: memref<128x128xf32, #tpu.memory_space<vmem>>) attributes {dimension_semantics = [#tpu.dimension_semantics<parallel>, #tpu.dimension_semantics<parallel>, #tpu.dimension_semantics<arbitrary>], iteration_bounds = array<i64: 1, 1, 1>, scalar_prefetch = 0 : i64, scratch_operands = 1 : i64, tpu.core_type = #tpu.core_type<tc>, window_params = [{transform_indices = @transform_0, window_bounds = array<i64: 128, 384>}, {transform_indices = @transform_1, window_bounds = array<i64: 384, 128>}, {transform_indices = @transform_2, window_bounds = array<i64: 1, 128>}, {transform_indices = @transform_3, window_bounds = array<i64: 128, 128>}]} {
    %c0_i32 = arith.constant 0 : i32
    %0 = arith.cmpi eq, %arg2, %c0_i32 : i32
    %1 = arith.extui %0 : i1 to i32
    %c0_i32_0 = arith.constant 0 : i32
    %2 = arith.cmpi ne, %1, %c0_i32_0 : i32
    scf.if %2 {
      %cst_10 = arith.constant 0.000000e+00 : f32
      %12 = vector.broadcast %cst_10 : f32 to vector<128x128xf32>
      %c0_11 = arith.constant 0 : index
      %c0_12 = arith.constant 0 : index
      %13 = vector.load %arg7[%c0_11, %c0_12] : memref<128x128xf32, #tpu.memory_space<vmem>>, vector<128x128xf32>
      tpu.vector_store %arg7[%c0_11, %c0_12], %12 {strides = array<i32>} : memref<128x128xf32, #tpu.memory_space<vmem>>, vector<128x128xf32>,
    } else {
    }
    %c0 = arith.constant 0 : index
    %c0_1 = arith.constant 0 : index
    %3 = vector.load %arg3[%c0, %c0_1] : memref<128x384xbf16, #tpu.memory_space<vmem>>, vector<128x384xbf16>
    %c0_2 = arith.constant 0 : index
    %c0_3 = arith.constant 0 : index
    %4 = vector.load %arg7[%c0_2, %c0_3] : memref<128x128xf32, #tpu.memory_space<vmem>>, vector<128x128xf32>
    %c0_4 = arith.constant 0 : index
    %c0_5 = arith.constant 0 : index
    %5 = vector.load %arg4[%c0_4, %c0_5] : memref<384x128xbf16, #tpu.memory_space<vmem>>, vector<384x128xbf16>
    %cst = arith.constant dense<0.000000e+00> : vector<128x128xf32>
    %6 = tpu.matmul %3, %5, %cst {dimension_numbers = #tpu.dot_dimension_numbers<[1], [0], [0], [1], [0, 0, 1, 1], [], []>} : vector<128x384xbf16>, vector<384x128xbf16>, vector<128x128xf32> -> vector<128x128xf32>
    %7 = arith.addf %4, %6 : vector<128x128xf32>
    %c0_6 = arith.constant 0 : index
    %c0_7 = arith.constant 0 : index
    %8 = vector.load %arg7[%c0_6, %c0_7] : memref<128x128xf32, #tpu.memory_space<vmem>>, vector<128x128xf32>
    tpu.vector_store %arg7[%c0_6, %c0_7], %7 {strides = array<i32>} : memref<128x128xf32, #tpu.memory_space<vmem>>, vector<128x128xf32>,
    %c0_i32_8 = arith.constant 0 : i32
    %9 = arith.cmpi eq, %arg2, %c0_i32_8 : i32
    %10 = arith.extui %9 : i1 to i32
    %c0_i32_9 = arith.constant 0 : i32
    %11 = arith.cmpi ne, %10, %c0_i32_9 : i32
    scf.if %11 {
      %c0_10 = arith.constant 0 : index
      %c0_11 = arith.constant 0 : index
      %12 = vector.load %arg7[%c0_10, %c0_11] : memref<128x128xf32, #tpu.memory_space<vmem>>, vector<128x128xf32>
      %c0_12 = arith.constant 0 : index
      %c0_13 = arith.constant 0 : index
      %13 = vector.load %arg5[%c0_12, %c0_13] : memref<1x128xf32, #tpu.memory_space<vmem>>, vector<1x128xf32>
      %14 = vector.broadcast %13 : vector<1x128xf32> to vector<128x128xf32>
      %15 = arith.addf %12, %14 : vector<128x128xf32>
      %16 = arith.truncf %15 : vector<128x128xf32> to vector<128x128xbf16>
      %c0_14 = arith.constant 0 : index
      %c0_15 = arith.constant 0 : index
      %17 = vector.load %arg6[%c0_14, %c0_15] : memref<128x128xbf16, #tpu.memory_space<vmem>>, vector<128x128xbf16>
      tpu.vector_store %arg6[%c0_14, %c0_15], %16 {strides = array<i32>} : memref<128x128xbf16, #tpu.memory_space<vmem>>, vector<128x128xbf16>,
    } else {
    }
    return
  }
  func.func @transform_0(%arg0: i32, %arg1: i32, %arg2: i32) -> (i32, i32) {
    %c0_i32 = arith.constant 0 : i32
    return %arg0, %arg2 : i32, i32
  }
  func.func @transform_1(%arg0: i32, %arg1: i32, %arg2: i32) -> (i32, i32) {
    %c0_i32 = arith.constant 0 : i32
    return %arg2, %arg1 : i32, i32
  }
  func.func @transform_2(%arg0: i32, %arg1: i32, %arg2: i32) -> (i32, i32) {
    %c0_i32 = arith.constant 0 : i32
    %c0_i32_0 = arith.constant 0 : i32
    return %c0_i32, %arg1 : i32, i32
  }
  func.func @transform_3(%arg0: i32, %arg1: i32, %arg2: i32) -> (i32, i32) {
    %c0_i32 = arith.constant 0 : i32
    return %arg0, %arg1 : i32, i32
  }
}

module attributes {stable_mosaic.version = 11 : i64} {
  func.func @_mm_fused_kernel(%arg0: i32, %arg1: i32, %arg2: i32, %arg3: memref<128x384xbf16, #tpu.memory_space<vmem>>, %arg4: memref<384x128xbf16, #tpu.memory_space<vmem>>, %arg5: memref<1x128xf32, #tpu.memory_space<vmem>>, %arg6: memref<128x128xbf16, #tpu.memory_space<vmem>>, %arg7: memref<128x128xf32, #tpu.memory_space<vmem>>) attributes {dimension_semantics = [#tpu.dimension_semantics<parallel>, #tpu.dimension_semantics<parallel>, #tpu.dimension_semantics<arbitrary>], iteration_bounds = array<i64: 1, 1, 1>, scalar_prefetch = 0 : i64, scratch_operands = 1 : i64, tpu.core_type = #tpu.core_type<tc>, window_params = [{transform_indices = @transform_0, window_bounds = array<i64: 128, 384>}, {transform_indices = @transform_1, window_bounds = array<i64: 384, 128>}, {transform_indices = @transform_2, window_bounds = array<i64: 1, 128>}, {transform_indices = @transform_3, window_bounds = array<i64: 128, 128>}]} {
    %c0_i32 = arith.constant 0 : i32
    %0 = arith.cmpi eq, %arg2, %c0_i32 : i32
    %1 = arith.extui %0 : i1 to i32
    %c0_i32_0 = arith.constant 0 : i32
    %2 = arith.cmpi ne, %1, %c0_i32_0 : i32
    scf.if %2 {
      %cst_10 = arith.constant 0.000000e+00 : f32
      %12 = vector.broadcast %cst_10 : f32 to vector<128x128xf32>
      %c0_11 = arith.constant 0 : index
      %c0_12 = arith.constant 0 : index
      %13 = vector.load %arg7[%c0_11, %c0_12] : memref<128x128xf32, #tpu.memory_space<vmem>>, vector<128x128xf32>
      tpu.vector_store %arg7[%c0_11, %c0_12], %12 {strides = array<i32>} : memref<128x128xf32, #tpu.memory_space<vmem>>, vector<128x128xf32>,
    } else {
    }
    %c0 = arith.constant 0 : index
    %c0_1 = arith.constant 0 : index
    %3 = vector.load %arg3[%c0, %c0_1] : memref<128x384xbf16, #tpu.memory_space<vmem>>, vector<128x384xbf16>
    %c0_2 = arith.constant 0 : index
    %c0_3 = arith.constant 0 : index
    %4 = vector.load %arg7[%c0_2, %c0_3] : memref<128x128xf32, #tpu.memory_space<vmem>>, vector<128x128xf32>
    %c0_4 = arith.constant 0 : index
    %c0_5 = arith.constant 0 : index
    %5 = vector.load %arg4[%c0_4, %c0_5] : memref<384x128xbf16, #tpu.memory_space<vmem>>, vector<384x128xbf16>
    %cst = arith.constant dense<0.000000e+00> : vector<128x128xf32>
    %6 = tpu.matmul %3, %5, %cst {dimension_numbers = #tpu.dot_dimension_numbers<[1], [0], [0], [1], [0, 0, 1, 1], [], []>} : vector<128x384xbf16>, vector<384x128xbf16>, vector<128x128xf32> -> vector<128x128xf32>
    %7 = arith.addf %4, %6 : vector<128x128xf32>
    %c0_6 = arith.constant 0 : index
    %c0_7 = arith.constant 0 : index
    %8 = vector.load %arg7[%c0_6, %c0_7] : memref<128x128xf32, #tpu.memory_space<vmem>>, vector<128x128xf32>
    tpu.vector_store %arg7[%c0_6, %c0_7], %7 {strides = array<i32>} : memref<128x128xf32, #tpu.memory_space<vmem>>, vector<128x128xf32>,
    %c0_i32_8 = arith.constant 0 : i32
    %9 = arith.cmpi eq, %arg2, %c0_i32_8 : i32
    %10 = arith.extui %9 : i1 to i32
    %c0_i32_9 = arith.constant 0 : i32
    %11 = arith.cmpi ne, %10, %c0_i32_9 : i32
    scf.if %11 {
      %c0_10 = arith.constant 0 : index
      %c0_11 = arith.constant 0 : index
      %12 = vector.load %arg7[%c0_10, %c0_11] : memref<128x128xf32, #tpu.memory_space<vmem>>, vector<128x128xf32>
      %c0_12 = arith.constant 0 : index
      %c0_13 = arith.constant 0 : index
      %13 = vector.load %arg5[%c0_12, %c0_13] : memref<1x128xf32, #tpu.memory_space<vmem>>, vector<1x128xf32>
      %14 = vector.broadcast %13 : vector<1x128xf32> to vector<128x128xf32>
      %15 = arith.addf %12, %14 : vector<128x128xf32>
      %16 = arith.truncf %15 : vector<128x128xf32> to vector<128x128xbf16>
      %c0_14 = arith.constant 0 : index
      %c0_15 = arith.constant 0 : index
      %17 = vector.load %arg6[%c0_14, %c0_15] : memref<128x128xbf16, #tpu.memory_space<vmem>>, vector<128x128xbf16>
      tpu.vector_store %arg6[%c0_14, %c0_15], %16 {strides = array<i32>} : memref<128x128xbf16, #tpu.memory_space<vmem>>, vector<128x128xbf16>,
    } else {
    }
    return
  }
  func.func @transform_0(%arg0: i32, %arg1: i32, %arg2: i32) -> (i32, i32) {
    %c0_i32 = arith.constant 0 : i32
    return %arg0, %arg2 : i32, i32
  }
  func.func @transform_1(%arg0: i32, %arg1: i32, %arg2: i32) -> (i32, i32) {
    %c0_i32 = arith.constant 0 : i32
    return %arg2, %arg1 : i32, i32
  }
  func.func @transform_2(%arg0: i32, %arg1: i32, %arg2: i32) -> (i32, i32) {
    %c0_i32 = arith.constant 0 : i32
    %c0_i32_0 = arith.constant 0 : i32
    return %c0_i32, %arg1 : i32, i32
  }
  func.func @transform_3(%arg0: i32, %arg1: i32, %arg2: i32) -> (i32, i32) {
    %c0_i32 = arith.constant 0 : i32
    return %arg0, %arg1 : i32, i32
  }
}

module attributes {stable_mosaic.version = 11 : i64} {
  func.func @_mm_fused_kernel(%arg0: i32, %arg1: i32, %arg2: i32, %arg3: memref<256x128xbf16, #tpu.memory_space<vmem>>, %arg4: memref<128x128xbf16, #tpu.memory_space<vmem>>, %arg5: memref<1x128xf32, #tpu.memory_space<vmem>>, %arg6: memref<1x128xf32, #tpu.memory_space<vmem>>, %arg7: memref<1x128xf32, #tpu.memory_space<vmem>>, %arg8: memref<1x128xf32, #tpu.memory_space<vmem>>, %arg9: memref<256x128xbf16, #tpu.memory_space<vmem>>, %arg10: memref<256x128xf32, #tpu.memory_space<vmem>>) attributes {dimension_semantics = [#tpu.dimension_semantics<parallel>, #tpu.dimension_semantics<parallel>, #tpu.dimension_semantics<arbitrary>], iteration_bounds = array<i64: 2, 1, 1>, scalar_prefetch = 0 : i64, scratch_operands = 1 : i64, tpu.core_type = #tpu.core_type<tc>, window_params = [{transform_indices = @transform_0, window_bounds = array<i64: 256, 128>}, {transform_indices = @transform_1, window_bounds = array<i64: 128, 128>}, {transform_indices = @transform_2, window_bounds = array<i64: 1, 128>}, {transform_indices = @transform_3, window_bounds = array<i64: 1, 128>}, {transform_indices = @transform_4, window_bounds = array<i64: 1, 128>}, {transform_indices = @transform_5, window_bounds = array<i64: 1, 128>}, {transform_indices = @transform_6, window_bounds = array<i64: 256, 128>}]} {
    %c0_i32 = arith.constant 0 : i32
    %0 = arith.cmpi eq, %arg2, %c0_i32 : i32
    %1 = arith.extui %0 : i1 to i32
    %c0_i32_0 = arith.constant 0 : i32
    %2 = arith.cmpi ne, %1, %c0_i32_0 : i32
    scf.if %2 {
      %cst_15 = arith.constant 0.000000e+00 : f32
      %22 = vector.broadcast %cst_15 : f32 to vector<256x128xf32>
      %c0_16 = arith.constant 0 : index
      %c0_17 = arith.constant 0 : index
      %23 = vector.load %arg10[%c0_16, %c0_17] : memref<256x128xf32, #tpu.memory_space<vmem>>, vector<256x128xf32>
      tpu.vector_store %arg10[%c0_16, %c0_17], %22 {strides = array<i32>} : memref<256x128xf32, #tpu.memory_space<vmem>>, vector<256x128xf32>,
    } else {
    }
    %c0 = arith.constant 0 : index
    %c0_1 = arith.constant 0 : index
    %3 = vector.load %arg3[%c0, %c0_1] : memref<256x128xbf16, #tpu.memory_space<vmem>>, vector<256x128xbf16>
    %4 = arith.extf %3 : vector<256x128xbf16> to vector<256x128xf32>
    %c0_2 = arith.constant 0 : index
    %c0_3 = arith.constant 0 : index
    %5 = vector.load %arg5[%c0_2, %c0_3] : memref<1x128xf32, #tpu.memory_space<vmem>>, vector<1x128xf32>
    %6 = vector.broadcast %5 : vector<1x128xf32> to vector<256x128xf32>
    %7 = arith.mulf %4, %6 : vector<256x128xf32>
    %c0_4 = arith.constant 0 : index
    %c0_5 = arith.constant 0 : index
    %8 = vector.load %arg6[%c0_4, %c0_5] : memref<1x128xf32, #tpu.memory_space<vmem>>, vector<1x128xf32>
    %9 = vector.broadcast %8 : vector<1x128xf32> to vector<256x128xf32>
    %10 = arith.addf %7, %9 : vector<256x128xf32>
    %cst = arith.constant 0.000000e+00 : f32
    %11 = vector.broadcast %cst : f32 to vector<256x128xf32>
    %12 = arith.maximumf %10, %11 : vector<256x128xf32>
    %13 = arith.truncf %12 : vector<256x128xf32> to vector<256x128xbf16>
    %c0_6 = arith.constant 0 : index
    %c0_7 = arith.constant 0 : index
    %14 = vector.load %arg10[%c0_6, %c0_7] : memref<256x128xf32, #tpu.memory_space<vmem>>, vector<256x128xf32>
    %c0_8 = arith.constant 0 : index
    %c0_9 = arith.constant 0 : index
    %15 = vector.load %arg4[%c0_8, %c0_9] : memref<128x128xbf16, #tpu.memory_space<vmem>>, vector<128x128xbf16>
    %cst_10 = arith.constant dense<0.000000e+00> : vector<256x128xf32>
    %16 = tpu.matmul %13, %15, %cst_10 {dimension_numbers = #tpu.dot_dimension_numbers<[1], [0], [0], [1], [0, 0, 1, 1], [], []>} : vector<256x128xbf16>, vector<128x128xbf16>, vector<256x128xf32> -> vector<256x128xf32>
    %17 = arith.addf %14, %16 : vector<256x128xf32>
    %c0_11 = arith.constant 0 : index
    %c0_12 = arith.constant 0 : index
    %18 = vector.load %arg10[%c0_11, %c0_12] : memref<256x128xf32, #tpu.memory_space<vmem>>, vector<256x128xf32>
    tpu.vector_store %arg10[%c0_11, %c0_12], %17 {strides = array<i32>} : memref<256x128xf32, #tpu.memory_space<vmem>>, vector<256x128xf32>,
    %c0_i32_13 = arith.constant 0 : i32
    %19 = arith.cmpi eq, %arg2, %c0_i32_13 : i32
    %20 = arith.extui %19 : i1 to i32
    %c0_i32_14 = arith.constant 0 : i32
    %21 = arith.cmpi ne, %20, %c0_i32_14 : i32
    scf.if %21 {
      %c0_15 = arith.constant 0 : index
      %c0_16 = arith.constant 0 : index
      %22 = vector.load %arg10[%c0_15, %c0_16] : memref<256x128xf32, #tpu.memory_space<vmem>>, vector<256x128xf32>
      %c0_17 = arith.constant 0 : index
      %c0_18 = arith.constant 0 : index
      %23 = vector.load %arg7[%c0_17, %c0_18] : memref<1x128xf32, #tpu.memory_space<vmem>>, vector<1x128xf32>
      %24 = vector.broadcast %23 : vector<1x128xf32> to vector<256x128xf32>
      %25 = arith.mulf %22, %24 : vector<256x128xf32>
      %c0_19 = arith.constant 0 : index
      %c0_20 = arith.constant 0 : index
      %26 = vector.load %arg8[%c0_19, %c0_20] : memref<1x128xf32, #tpu.memory_space<vmem>>, vector<1x128xf32>
      %27 = vector.broadcast %26 : vector<1x128xf32> to vector<256x128xf32>
      %28 = arith.addf %25, %27 : vector<256x128xf32>
      %cst_21 = arith.constant 0.000000e+00 : f32
      %29 = vector.broadcast %cst_21 : f32 to vector<256x128xf32>
      %30 = arith.maximumf %28, %29 : vector<256x128xf32>
      %31 = arith.truncf %30 : vector<256x128xf32> to vector<256x128xbf16>
      %c0_22 = arith.constant 0 : index
      %c0_23 = arith.constant 0 : index
      %32 = vector.load %arg9[%c0_22, %c0_23] : memref<256x128xbf16, #tpu.memory_space<vmem>>, vector<256x128xbf16>
      tpu.vector_store %arg9[%c0_22, %c0_23], %31 {strides = array<i32>} : memref<256x128xbf16, #tpu.memory_space<vmem>>, vector<256x128xbf16>,
    } else {
    }
    return
  }
  func.func @transform_0(%arg0: i32, %arg1: i32, %arg2: i32) -> (i32, i32) {
    %c0_i32 = arith.constant 0 : i32
    return %arg0, %arg2 : i32, i32
  }
  func.func @transform_1(%arg0: i32, %arg1: i32, %arg2: i32) -> (i32, i32) {
    %c0_i32 = arith.constant 0 : i32
    return %arg2, %arg1 : i32, i32
  }
  func.func @transform_2(%arg0: i32, %arg1: i32, %arg2: i32) -> (i32, i32) {
    %c0_i32 = arith.constant 0 : i32
    %c0_i32_0 = arith.constant 0 : i32
    return %c0_i32, %arg2 : i32, i32
  }
  func.func @transform_3(%arg0: i32, %arg1: i32, %arg2: i32) -> (i32, i32) {
    %c0_i32 = arith.constant 0 : i32
    %c0_i32_0 = arith.constant 0 : i32
    return %c0_i32, %arg2 : i32, i32
  }
  func.func @transform_4(%arg0: i32, %arg1: i32, %arg2: i32) -> (i32, i32) {
    %c0_i32 = arith.constant 0 : i32
    %c0_i32_0 = arith.constant 0 : i32
    return %c0_i32, %arg1 : i32, i32
  }
  func.func @transform_5(%arg0: i32, %arg1: i32, %arg2: i32) -> (i32, i32) {
    %c0_i32 = arith.constant 0 : i32
    %c0_i32_0 = arith.constant 0 : i32
    return %c0_i32, %arg1 : i32, i32
  }
  func.func @transform_6(%arg0: i32, %arg1: i32, %arg2: i32) -> (i32, i32) {
    %c0_i32 = arith.constant 0 : i32
    return %arg0, %arg1 : i32, i32
  }
}

module attributes {stable_mosaic.version = 11 : i64} {
  func.func @_mm_fused_kernel(%arg0: i32, %arg1: i32, %arg2: i32, %arg3: memref<256x256xbf16, #tpu.memory_space<vmem>>, %arg4: memref<256x128xbf16, #tpu.memory_space<vmem>>, %arg5: memref<1x128xf32, #tpu.memory_space<vmem>>, %arg6: memref<256x128xbf16, #tpu.memory_space<vmem>>, %arg7: memref<256x128xf32, #tpu.memory_space<vmem>>) attributes {dimension_semantics = [#tpu.dimension_semantics<parallel>, #tpu.dimension_semantics<parallel>, #tpu.dimension_semantics<arbitrary>], iteration_bounds = array<i64: 2, 1, 1>, scalar_prefetch = 0 : i64, scratch_operands = 1 : i64, tpu.core_type = #tpu.core_type<tc>, window_params = [{transform_indices = @transform_0, window_bounds = array<i64: 256, 256>}, {transform_indices = @transform_1, window_bounds = array<i64: 256, 128>}, {transform_indices = @transform_2, window_bounds = array<i64: 1, 128>}, {transform_indices = @transform_3, window_bounds = array<i64: 256, 128>}]} {
    %c0_i32 = arith.constant 0 : i32
    %0 = arith.cmpi eq, %arg2, %c0_i32 : i32
    %1 = arith.extui %0 : i1 to i32
    %c0_i32_0 = arith.constant 0 : i32
    %2 = arith.cmpi ne, %1, %c0_i32_0 : i32
    scf.if %2 {
      %cst_10 = arith.constant 0.000000e+00 : f32
      %12 = vector.broadcast %cst_10 : f32 to vector<256x128xf32>
      %c0_11 = arith.constant 0 : index
      %c0_12 = arith.constant 0 : index
      %13 = vector.load %arg7[%c0_11, %c0_12] : memref<256x128xf32, #tpu.memory_space<vmem>>, vector<256x128xf32>
      tpu.vector_store %arg7[%c0_11, %c0_12], %12 {strides = array<i32>} : memref<256x128xf32, #tpu.memory_space<vmem>>, vector<256x128xf32>,
    } else {
    }
    %c0 = arith.constant 0 : index
    %c0_1 = arith.constant 0 : index
    %3 = vector.load %arg3[%c0, %c0_1] : memref<256x256xbf16, #tpu.memory_space<vmem>>, vector<256x256xbf16>
    %c0_2 = arith.constant 0 : index
    %c0_3 = arith.constant 0 : index
    %4 = vector.load %arg7[%c0_2, %c0_3] : memref<256x128xf32, #tpu.memory_space<vmem>>, vector<256x128xf32>
    %c0_4 = arith.constant 0 : index
    %c0_5 = arith.constant 0 : index
    %5 = vector.load %arg4[%c0_4, %c0_5] : memref<256x128xbf16, #tpu.memory_space<vmem>>, vector<256x128xbf16>
    %cst = arith.constant dense<0.000000e+00> : vector<256x128xf32>
    %6 = tpu.matmul %3, %5, %cst {dimension_numbers = #tpu.dot_dimension_numbers<[1], [0], [0], [1], [0, 0, 1, 1], [], []>} : vector<256x256xbf16>, vector<256x128xbf16>, vector<256x128xf32> -> vector<256x128xf32>
    %7 = arith.addf %4, %6 : vector<256x128xf32>
    %c0_6 = arith.constant 0 : index
    %c0_7 = arith.constant 0 : index
    %8 = vector.load %arg7[%c0_6, %c0_7] : memref<256x128xf32, #tpu.memory_space<vmem>>, vector<256x128xf32>
    tpu.vector_store %arg7[%c0_6, %c0_7], %7 {strides = array<i32>} : memref<256x128xf32, #tpu.memory_space<vmem>>, vector<256x128xf32>,
    %c0_i32_8 = arith.constant 0 : i32
    %9 = arith.cmpi eq, %arg2, %c0_i32_8 : i32
    %10 = arith.extui %9 : i1 to i32
    %c0_i32_9 = arith.constant 0 : i32
    %11 = arith.cmpi ne, %10, %c0_i32_9 : i32
    scf.if %11 {
      %c0_10 = arith.constant 0 : index
      %c0_11 = arith.constant 0 : index
      %12 = vector.load %arg7[%c0_10, %c0_11] : memref<256x128xf32, #tpu.memory_space<vmem>>, vector<256x128xf32>
      %c0_12 = arith.constant 0 : index
      %c0_13 = arith.constant 0 : index
      %13 = vector.load %arg5[%c0_12, %c0_13] : memref<1x128xf32, #tpu.memory_space<vmem>>, vector<1x128xf32>
      %14 = vector.broadcast %13 : vector<1x128xf32> to vector<256x128xf32>
      %15 = arith.addf %12, %14 : vector<256x128xf32>
      %16 = arith.truncf %15 : vector<256x128xf32> to vector<256x128xbf16>
      %c0_14 = arith.constant 0 : index
      %c0_15 = arith.constant 0 : index
      %17 = vector.load %arg6[%c0_14, %c0_15] : memref<256x128xbf16, #tpu.memory_space<vmem>>, vector<256x128xbf16>
      tpu.vector_store %arg6[%c0_14, %c0_15], %16 {strides = array<i32>} : memref<256x128xbf16, #tpu.memory_space<vmem>>, vector<256x128xbf16>,
    } else {
    }
    return
  }
  func.func @transform_0(%arg0: i32, %arg1: i32, %arg2: i32) -> (i32, i32) {
    %c0_i32 = arith.constant 0 : i32
    return %arg0, %arg2 : i32, i32
  }
  func.func @transform_1(%arg0: i32, %arg1: i32, %arg2: i32) -> (i32, i32) {
    %c0_i32 = arith.constant 0 : i32
    return %arg2, %arg1 : i32, i32
  }
  func.func @transform_2(%arg0: i32, %arg1: i32, %arg2: i32) -> (i32, i32) {
    %c0_i32 = arith.constant 0 : i32
    %c0_i32_0 = arith.constant 0 : i32
    return %c0_i32, %arg1 : i32, i32
  }
  func.func @transform_3(%arg0: i32, %arg1: i32, %arg2: i32) -> (i32, i32) {
    %c0_i32 = arith.constant 0 : i32
    return %arg0, %arg1 : i32, i32
  }
}

module attributes {stable_mosaic.version = 11 : i64} {
  func.func @_mm_fused_kernel(%arg0: i32, %arg1: i32, %arg2: i32, %arg3: memref<256x128xbf16, #tpu.memory_space<vmem>>, %arg4: memref<128x128xbf16, #tpu.memory_space<vmem>>, %arg5: memref<1x128xf32, #tpu.memory_space<vmem>>, %arg6: memref<256x128xbf16, #tpu.memory_space<vmem>>, %arg7: memref<256x128xf32, #tpu.memory_space<vmem>>) attributes {dimension_semantics = [#tpu.dimension_semantics<parallel>, #tpu.dimension_semantics<parallel>, #tpu.dimension_semantics<arbitrary>], iteration_bounds = array<i64: 8, 1, 1>, scalar_prefetch = 0 : i64, scratch_operands = 1 : i64, tpu.core_type = #tpu.core_type<tc>, window_params = [{transform_indices = @transform_0, window_bounds = array<i64: 256, 128>}, {transform_indices = @transform_1, window_bounds = array<i64: 128, 128>}, {transform_indices = @transform_2, window_bounds = array<i64: 1, 128>}, {transform_indices = @transform_3, window_bounds = array<i64: 256, 128>}]} {
    %c0_i32 = arith.constant 0 : i32
    %0 = arith.cmpi eq, %arg2, %c0_i32 : i32
    %1 = arith.extui %0 : i1 to i32
    %c0_i32_0 = arith.constant 0 : i32
    %2 = arith.cmpi ne, %1, %c0_i32_0 : i32
    scf.if %2 {
      %cst_10 = arith.constant 0.000000e+00 : f32
      %12 = vector.broadcast %cst_10 : f32 to vector<256x128xf32>
      %c0_11 = arith.constant 0 : index
      %c0_12 = arith.constant 0 : index
      %13 = vector.load %arg7[%c0_11, %c0_12] : memref<256x128xf32, #tpu.memory_space<vmem>>, vector<256x128xf32>
      tpu.vector_store %arg7[%c0_11, %c0_12], %12 {strides = array<i32>} : memref<256x128xf32, #tpu.memory_space<vmem>>, vector<256x128xf32>,
    } else {
    }
    %c0 = arith.constant 0 : index
    %c0_1 = arith.constant 0 : index
    %3 = vector.load %arg3[%c0, %c0_1] : memref<256x128xbf16, #tpu.memory_space<vmem>>, vector<256x128xbf16>
    %c0_2 = arith.constant 0 : index
    %c0_3 = arith.constant 0 : index
    %4 = vector.load %arg7[%c0_2, %c0_3] : memref<256x128xf32, #tpu.memory_space<vmem>>, vector<256x128xf32>
    %c0_4 = arith.constant 0 : index
    %c0_5 = arith.constant 0 : index
    %5 = vector.load %arg4[%c0_4, %c0_5] : memref<128x128xbf16, #tpu.memory_space<vmem>>, vector<128x128xbf16>
    %cst = arith.constant dense<0.000000e+00> : vector<256x128xf32>
    %6 = tpu.matmul %3, %5, %cst {dimension_numbers = #tpu.dot_dimension_numbers<[1], [0], [0], [1], [0, 0, 1, 1], [], []>} : vector<256x128xbf16>, vector<128x128xbf16>, vector<256x128xf32> -> vector<256x128xf32>
    %7 = arith.addf %4, %6 : vector<256x128xf32>
    %c0_6 = arith.constant 0 : index
    %c0_7 = arith.constant 0 : index
    %8 = vector.load %arg7[%c0_6, %c0_7] : memref<256x128xf32, #tpu.memory_space<vmem>>, vector<256x128xf32>
    tpu.vector_store %arg7[%c0_6, %c0_7], %7 {strides = array<i32>} : memref<256x128xf32, #tpu.memory_space<vmem>>, vector<256x128xf32>,
    %c0_i32_8 = arith.constant 0 : i32
    %9 = arith.cmpi eq, %arg2, %c0_i32_8 : i32
    %10 = arith.extui %9 : i1 to i32
    %c0_i32_9 = arith.constant 0 : i32
    %11 = arith.cmpi ne, %10, %c0_i32_9 : i32
    scf.if %11 {
      %c0_10 = arith.constant 0 : index
      %c0_11 = arith.constant 0 : index
      %12 = vector.load %arg7[%c0_10, %c0_11] : memref<256x128xf32, #tpu.memory_space<vmem>>, vector<256x128xf32>
      %c0_12 = arith.constant 0 : index
      %c0_13 = arith.constant 0 : index
      %13 = vector.load %arg5[%c0_12, %c0_13] : memref<1x128xf32, #tpu.memory_space<vmem>>, vector<1x128xf32>
      %14 = vector.broadcast %13 : vector<1x128xf32> to vector<256x128xf32>
      %15 = arith.addf %12, %14 : vector<256x128xf32>
      %16 = arith.truncf %15 : vector<256x128xf32> to vector<256x128xbf16>
      %c0_14 = arith.constant 0 : index
      %c0_15 = arith.constant 0 : index
      %17 = vector.load %arg6[%c0_14, %c0_15] : memref<256x128xbf16, #tpu.memory_space<vmem>>, vector<256x128xbf16>
      tpu.vector_store %arg6[%c0_14, %c0_15], %16 {strides = array<i32>} : memref<256x128xbf16, #tpu.memory_space<vmem>>, vector<256x128xbf16>,
    } else {
    }
    return
  }
  func.func @transform_0(%arg0: i32, %arg1: i32, %arg2: i32) -> (i32, i32) {
    %c0_i32 = arith.constant 0 : i32
    return %arg0, %arg2 : i32, i32
  }
  func.func @transform_1(%arg0: i32, %arg1: i32, %arg2: i32) -> (i32, i32) {
    %c0_i32 = arith.constant 0 : i32
    return %arg2, %arg1 : i32, i32
  }
  func.func @transform_2(%arg0: i32, %arg1: i32, %arg2: i32) -> (i32, i32) {
    %c0_i32 = arith.constant 0 : i32
    %c0_i32_0 = arith.constant 0 : i32
    return %c0_i32, %arg1 : i32, i32
  }
  func.func @transform_3(%arg0: i32, %arg1: i32, %arg2: i32) -> (i32, i32) {
    %c0_i32 = arith.constant 0 : i32
    return %arg0, %arg1 : i32, i32
  }
}

</mosaic_0001>

<bundles_post_ra>
// kernel: data_generator_img.21
= control target key start
LH: loop header
LB: loop body
LE: loop exit
PB: predicated region body
PF: predicated region fallthrough
CT: control target
= control target key end

     0   :  { %11 = vsyncpa [#allocation4], 0  ;;  %s510_s0 = inlined_call_operand.vmem [shape: bf16[16,128], index: 0, kind: input, shape index: {}]   ;;  %s511_s1 = inlined_call_operand.hbm [shape: bf16[128,128], index: 1, kind: input, shape index: {}]   ;;  %s512_s2 = inlined_call_operand.hbm [shape: f32[1,128], index: 2, kind: input, shape index: {}]   ;;  %s513_s3 = inlined_call_operand.hbm [shape: f32[1,128], index: 3, kind: input, shape index: {}]   ;;  %s514_s4 = inlined_call_operand.hbm [shape: f32[1,128], index: 4, kind: input, shape index: {}]   ;;  %s515_s5 = inlined_call_operand.hbm [shape: f32[1,128], index: 5, kind: input, shape index: {}]   ;;  %s516_s6 = inlined_call_operand.vmem [shape: bf16[16,128], index: 6, kind: output, shape index: {}]  }
   0x1   :  { %12 = vsyncpa [#allocation6], 0 }
   0x2   :  { %13 = vsyncpa [#allocation9], 0  ;;  %s445_s21 = smov [#allocation5]   ;;  %s446_s23 = smov [#allocation8]  }
   0x3   :  { %s34_s22 = sshll.u32 %s445_s21, 4  ;;  %s54_s24 = sshll.u32 %s446_s23, 4  ;;  %s35_s22 = int_to_ptr.vmem [resolvable:$true] %s34_s22  ;;  %s55_s24 = int_to_ptr.vmem [resolvable:$true] %s54_s24 }
   0x4   :  { %s347_s25 = scalar_lea.vmem %s35_s22, 16  ;;  %s351_s26 = scalar_lea.vmem %s35_s22, 32 }
   0x5   :  { %p348_p0 = scmp.ne.s32.totalorder %s35_s22, %s347_s25  ;;  %p352_p1 = scmp.lt.s32.totalorder %s35_s22, %s35_s22 }
   0x6   :  { %p353_p2 = scmp.lt.s32.totalorder %s351_s26, %s347_s25 }
   0x8   :  { %p354_p3 = por %p353_p2, %p352_p1 }
   0xa   :  { %p355_p4 = pnand %p354_p3, %p348_p0 }
   0xc   :  { %358 = shalt.err (!%p355_p4)
}
   0xd   :  { %37 = dma.hbm_to_vmem [thread:$0]  %s512_s2, 16, %s35_s22, [#allocation6]  }
   0xe   :  { %s367_s29 = scalar_lea.vmem %s55_s24, 16  ;;  %s371_s30 = scalar_lea.vmem %s55_s24, 32 }
   0xf   :  { %p368_p5 = scmp.ne.s32.totalorder %s55_s24, %s367_s29  ;;  %p372_p6 = scmp.lt.s32.totalorder %s55_s24, %s55_s24 }
  0x10   :  { %p373_p7 = scmp.lt.s32.totalorder %s371_s30, %s367_s29 }
  0x12   :  { %p374_p8 = por %p373_p7, %p372_p6 }
  0x14   :  { %p375_p9 = pnand %p374_p8, %p368_p5 }
  0x16   :  { %378 = shalt.err (!%p375_p9)
}
  0x17   :  { %57 = dma.hbm_to_vmem [thread:$0]  %s514_s4, 16, %s55_s24, [#allocation9]  }
  0x18   :  { %s447_s9 = smov [#allocation3]  }
  0x19   :  { %s21_s10 = sshll.u32 %s447_s9, 4  ;;  %s22_s10 = int_to_ptr.vmem [resolvable:$true] %s21_s10 }
  0x1a   :  { %s387_s11 = scalar_lea.vmem %s22_s10, 1024  ;;  %p392_p11 = scmp.lt.s32.totalorder %s22_s10, %s22_s10 }
  0x1b   :  { %p388_p10 = scmp.ne.s32.totalorder %s22_s10, %s387_s11  ;;  %p393_p12 = scmp.lt.s32.totalorder %s387_s11, %s387_s11 }
  0x1d   :  { %p394_p13 = por %p393_p12, %p392_p11 }
  0x1f   :  { %p395_p0 = pnand %p394_p13, %p388_p10 }
  0x21   :  { %398 = shalt.err (!%p395_p0)
}
  0x22   :  { %s448_s2 = smov 64   ;;  %s449_s12 = smov 4  }
  0x23   :  { %27 = dma.hbm_to_vmem [thread:$0]  %s511_s1, 1024, %s22_s10, [#allocation4], %s448_s2, %s448_s2, %s449_s12  }
  0x24   :  { %s450_s15 = smov [#allocation7]   ;;  %s451_s4 = smov [#allocation10]  }
  0x25   :  { %s44_s16 = sshll.u32 %s450_s15, 4  ;;  %s64_s17 = sshll.u32 %s451_s4, 4  ;;  %s45_s16 = int_to_ptr.vmem [resolvable:$true] %s44_s16  ;;  %s65_s17 = int_to_ptr.vmem [resolvable:$true] %s64_s17 }
  0x26   :  { %s407_s18 = scalar_lea.vmem %s45_s16, 16  ;;  %s411_s19 = scalar_lea.vmem %s45_s16, 32 }
  0x27   :  { %p408_p1 = scmp.ne.s32.totalorder %s45_s16, %s407_s18  ;;  %p412_p2 = scmp.lt.s32.totalorder %s45_s16, %s45_s16 }
  0x28   :  { %p413_p3 = scmp.lt.s32.totalorder %s411_s19, %s407_s18 }
  0x2a   :  { %p414_p4 = por %p413_p3, %p412_p2 }
  0x2c   :  { %p415_p5 = pnand %p414_p4, %p408_p1 }
  0x2e   :  { %418 = shalt.err (!%p415_p5)
}
  0x2f   :  { %47 = dma.hbm_to_vmem [thread:$0]  %s513_s3, 16, %s45_s16, [#allocation6]  }
  0x30   :  { %s427_s22 = scalar_lea.vmem %s65_s17, 16  ;;  %s431_s1 = scalar_lea.vmem %s65_s17, 32 }
  0x31   :  { %p428_p6 = scmp.ne.s32.totalorder %s65_s17, %s427_s22  ;;  %p432_p7 = scmp.lt.s32.totalorder %s65_s17, %s65_s17 }
  0x32   :  { %p433_p8 = scmp.lt.s32.totalorder %s431_s1, %s427_s22 }
  0x34   :  { %p434_p9 = por %p433_p8, %p432_p7 }
  0x36   :  { %p435_p10 = pnand %p434_p9, %p428_p6 }
  0x38   :  { %438 = shalt.err (!%p435_p10)
}
  0x39   :  { %67 = dma.hbm_to_vmem [thread:$0]  %s515_s5, 16, %s65_s17, [#allocation9]  }
  0x3a   :  { %439 = dma.done.wait [#allocation4], 1024  }
  0x3b   :  { %440 = vsyncadd [#allocation4], 4294966272 }
  0x3c   :  { %441 = dma.done.wait [#allocation6], 32  }
  0x3d   :  { %442 = vsyncadd [#allocation6], 4294967264 }
  0x3e   :  { %443 = dma.done.wait [#allocation9], 32  }
  0x3f   :  { %444 = vsyncadd [#allocation9], 4294967264  ;;  %v452_v0 = vmov 0.0   ;;  %vm453_vm0 = vmmov 0   ;;  %v331_v1 = vld [vmem:[#allocation3 + $0x38] sm:$0xff]   ;;  %v332_v2 = vld [vmem:[#allocation3 + $0x30] sm:$0xff]  }
  0x40   :  { %302 = vmatprep.subr.bf16.mxu0 %v452_v0  ;;  %318 = vmatprep.mubr.msk.bf16.mxu0 %vm453_vm0, %v452_v0  ;;  %v333_v3 = vld [vmem:[#allocation3 + $0x28] sm:$0xff]   ;;  %v334_v4 = vld [vmem:[#allocation3 + $0x20] sm:$0xff]   ;;  %v335_v8 = vld [vmem:[#allocation3 + $0x18] sm:$0xff]  }
  0x41   :  { %303 = vmatpush3.bf16.msra.mxu0 %v331_v1  ;;  %v285_v5 = vld [vmem:[%s510_s0] sm:$0xff]   ;;  %v336_v12 = vld [vmem:[#allocation3 + $0x10] sm:$0xff]   ;;  %v337_v16 = vld [vmem:[#allocation3 + $0x8] sm:$0xff]  }
  0x42   :  { %304 = vmatprep.subr.bf16.mxu0 %v452_v0  ;;  %v286_v6 = vunpack.c.l.bf16 %v285_v5  ;;  %v287_v7 = vunpack.c.h.bf16 %v285_v5  ;;  %v268_v9 = vld [vmem:[#allocation5] ss:$0 sm:$0xff]  ;;  %v269_v13 = vld [vmem:[#allocation7] ss:$0 sm:$0xff]  ;;  %v278_v21 = vld [vmem:[#allocation8] ss:$0 sm:$0xff] }
  0x43   :  { %v338_v19 = vld [vmem:[#allocation3] sm:$0xff]  }
  0x44   :  { %v101_v10 = vmul.f32 %v286_v6, %v268_v9  ;;  %v102_v11 = vmul.f32 %v287_v7, %v268_v9  ;;  %v279_v24 = vld [vmem:[#allocation10] ss:$0 sm:$0xff] }
  0x45   :  { %305 = vmatpush3.bf16.msra.mxu0 %v332_v2 }
  0x46   :  { %306 = vmatprep.subr.bf16.mxu0 %v452_v0  ;;  %v110_v14 = vadd.f32 %v269_v13, %v101_v10  ;;  %v111_v15 = vadd.f32 %v269_v13, %v102_v11 }
  0x48   :  { %v112_v17 = vmax.f32 %v110_v14, 0.0  ;;  %v113_v18 = vmax.f32 %v111_v15, 0.0 }
  0x49   :  { %307 = vmatpush3.bf16.msra.mxu0 %v333_v3 }
  0x4a   :  { %308 = vmatprep.subr.bf16.mxu0 %v452_v0  ;;  %v114_v20 = vpack.c.bf16 %v113_v18, %v112_v17 }
  0x4d   :  { %309 = vmatpush3.bf16.msra.mxu0 %v334_v4 }
  0x4e   :  { %310 = vmatprep.subr.bf16.mxu0 %v452_v0 }
  0x51   :  { %311 = vmatpush3.bf16.msra.mxu0 %v335_v8 }
  0x52   :  { %312 = vmatprep.subr.bf16.mxu0 %v452_v0 }
  0x55   :  { %313 = vmatpush3.bf16.msra.mxu0 %v336_v12 }
  0x56   :  { %314 = vmatprep.subr.bf16.mxu0 %v452_v0 }
  0x59   :  { %315 = vmatpush3.bf16.msra.mxu0 %v337_v16 }
  0x5a   :  { %316 = vmatprep.subr.bf16.mxu0 %v452_v0 }
  0x5d   :  { %317 = vmatpush3.bf16.msra.mxu0 %v338_v19 }
  0x60   :  { %319 = vmatmul.mubr.bf16.vlgmr.msra.gmra.mxu0 %v114_v20 }
 0x120   :  { %v215_v22 = vpop.f32.mrf.mxu0 }
 0x121   :  { %v238_v23 = vmul.f32 %v278_v21, %v215_v22 }
 0x122   :  { %v320_v25 = vpop.f32.mrf.mxu0 }
 0x123   :  { %v247_v27 = vadd.f32 %v279_v24, %v238_v23 }
 0x124   :  { %v218_v26 = vpop.f32.mrf.mxu0 }
 0x125   :  { %v239_v28 = vmul.f32 %v278_v21, %v218_v26  ;;  %v249_v31 = vmax.f32 %v247_v27, 0.0 }
 0x126   :  { %v321_v29 = vpop.f32.mrf.mxu0 }
 0x127   :  { %v248_v30 = vadd.f32 %v279_v24, %v239_v28 }
 0x129   :  { %v250_v32 = vmax.f32 %v248_v30, 0.0 }
 0x12b   :  { %v291_v33 = vpack.c.bf16 %v250_v32, %v249_v31 }
 0x12d   :  { %292 = vst [vmem:[%s516_s6] sm:$0xff] %v291_v33  }
 0x12e   :  { %265 = vsyncpa [#allocation4], 1 }
 0x12f   :  { %266 = vsyncpa [#allocation6], 1 }
 0x130   :  { %267 = vsyncpa [#allocation9], 1 }

// kernel: data_generator_img.23
= control target key start
LH: loop header
LB: loop body
LE: loop exit
PB: predicated region body
PF: predicated region fallthrough
CT: control target
= control target key end

     0   :  { %11 = vsyncpa [#allocation4], 0  ;;  %s573_s0 = inlined_call_operand.vmem [shape: bf16[32,128], index: 0, kind: input, shape index: {}]   ;;  %s574_s1 = inlined_call_operand.hbm [shape: bf16[128,128], index: 1, kind: input, shape index: {}]   ;;  %s575_s2 = inlined_call_operand.hbm [shape: f32[1,128], index: 2, kind: input, shape index: {}]   ;;  %s576_s3 = inlined_call_operand.hbm [shape: f32[1,128], index: 3, kind: input, shape index: {}]   ;;  %s577_s4 = inlined_call_operand.hbm [shape: f32[1,128], index: 4, kind: input, shape index: {}]   ;;  %s578_s5 = inlined_call_operand.hbm [shape: f32[1,128], index: 5, kind: input, shape index: {}]   ;;  %s579_s6 = inlined_call_operand.vmem [shape: bf16[32,128], index: 6, kind: output, shape index: {}]  }
   0x1   :  { %12 = vsyncpa [#allocation6], 0 }
   0x2   :  { %13 = vsyncpa [#allocation9], 0  ;;  %s504_s21 = smov [#allocation5]   ;;  %s505_s23 = smov [#allocation8]  }
   0x3   :  { %s34_s22 = sshll.u32 %s504_s21, 4  ;;  %s54_s24 = sshll.u32 %s505_s23, 4  ;;  %s35_s22 = int_to_ptr.vmem [resolvable:$true] %s34_s22  ;;  %s55_s24 = int_to_ptr.vmem [resolvable:$true] %s54_s24 }
   0x4   :  { %s406_s25 = scalar_lea.vmem %s35_s22, 16  ;;  %s410_s26 = scalar_lea.vmem %s35_s22, 32 }
   0x5   :  { %p407_p0 = scmp.ne.s32.totalorder %s35_s22, %s406_s25  ;;  %p411_p1 = scmp.lt.s32.totalorder %s35_s22, %s35_s22 }
   0x6   :  { %p412_p2 = scmp.lt.s32.totalorder %s410_s26, %s406_s25 }
   0x8   :  { %p413_p3 = por %p412_p2, %p411_p1 }
   0xa   :  { %p414_p4 = pnand %p413_p3, %p407_p0 }
   0xc   :  { %417 = shalt.err (!%p414_p4)
}
   0xd   :  { %37 = dma.hbm_to_vmem [thread:$0]  %s575_s2, 16, %s35_s22, [#allocation6]  }
   0xe   :  { %s426_s29 = scalar_lea.vmem %s55_s24, 16  ;;  %s430_s30 = scalar_lea.vmem %s55_s24, 32 }
   0xf   :  { %p427_p5 = scmp.ne.s32.totalorder %s55_s24, %s426_s29  ;;  %p431_p6 = scmp.lt.s32.totalorder %s55_s24, %s55_s24 }
  0x10   :  { %p432_p7 = scmp.lt.s32.totalorder %s430_s30, %s426_s29 }
  0x12   :  { %p433_p8 = por %p432_p7, %p431_p6 }
  0x14   :  { %p434_p9 = pnand %p433_p8, %p427_p5 }
  0x16   :  { %437 = shalt.err (!%p434_p9)
}
  0x17   :  { %57 = dma.hbm_to_vmem [thread:$0]  %s577_s4, 16, %s55_s24, [#allocation9]  }
  0x18   :  { %s506_s9 = smov [#allocation3]  }
  0x19   :  { %s21_s10 = sshll.u32 %s506_s9, 4  ;;  %s22_s10 = int_to_ptr.vmem [resolvable:$true] %s21_s10 }
  0x1a   :  { %s446_s11 = scalar_lea.vmem %s22_s10, 1024  ;;  %p451_p11 = scmp.lt.s32.totalorder %s22_s10, %s22_s10 }
  0x1b   :  { %p447_p10 = scmp.ne.s32.totalorder %s22_s10, %s446_s11  ;;  %p452_p12 = scmp.lt.s32.totalorder %s446_s11, %s446_s11 }
  0x1d   :  { %p453_p13 = por %p452_p12, %p451_p11 }
  0x1f   :  { %p454_p0 = pnand %p453_p13, %p447_p10 }
  0x21   :  { %457 = shalt.err (!%p454_p0)
}
  0x22   :  { %s507_s2 = smov 64   ;;  %s508_s12 = smov 4  }
  0x23   :  { %27 = dma.hbm_to_vmem [thread:$0]  %s574_s1, 1024, %s22_s10, [#allocation4], %s507_s2, %s507_s2, %s508_s12  }
  0x24   :  { %s509_s15 = smov [#allocation7]   ;;  %s510_s4 = smov [#allocation10]  }
  0x25   :  { %s44_s16 = sshll.u32 %s509_s15, 4  ;;  %s64_s17 = sshll.u32 %s510_s4, 4  ;;  %s45_s16 = int_to_ptr.vmem [resolvable:$true] %s44_s16  ;;  %s65_s17 = int_to_ptr.vmem [resolvable:$true] %s64_s17 }
  0x26   :  { %s466_s18 = scalar_lea.vmem %s45_s16, 16  ;;  %s470_s19 = scalar_lea.vmem %s45_s16, 32 }
  0x27   :  { %p467_p1 = scmp.ne.s32.totalorder %s45_s16, %s466_s18  ;;  %p471_p2 = scmp.lt.s32.totalorder %s45_s16, %s45_s16 }
  0x28   :  { %p472_p3 = scmp.lt.s32.totalorder %s470_s19, %s466_s18 }
  0x2a   :  { %p473_p4 = por %p472_p3, %p471_p2 }
  0x2c   :  { %p474_p5 = pnand %p473_p4, %p467_p1 }
  0x2e   :  { %477 = shalt.err (!%p474_p5)
}
  0x2f   :  { %47 = dma.hbm_to_vmem [thread:$0]  %s576_s3, 16, %s45_s16, [#allocation6]  }
  0x30   :  { %s486_s22 = scalar_lea.vmem %s65_s17, 16  ;;  %s490_s1 = scalar_lea.vmem %s65_s17, 32 }
  0x31   :  { %p487_p6 = scmp.ne.s32.totalorder %s65_s17, %s486_s22  ;;  %p491_p7 = scmp.lt.s32.totalorder %s65_s17, %s65_s17 }
  0x32   :  { %p492_p8 = scmp.lt.s32.totalorder %s490_s1, %s486_s22 }
  0x34   :  { %p493_p9 = por %p492_p8, %p491_p7 }
  0x36   :  { %p494_p10 = pnand %p493_p9, %p487_p6 }
  0x38   :  { %497 = shalt.err (!%p494_p10)
}
  0x39   :  { %67 = dma.hbm_to_vmem [thread:$0]  %s578_s5, 16, %s65_s17, [#allocation9]  }
  0x3a   :  { %498 = dma.done.wait [#allocation4], 1024  }
  0x3b   :  { %499 = vsyncadd [#allocation4], 4294966272 }
  0x3c   :  { %500 = dma.done.wait [#allocation6], 32  }
  0x3d   :  { %501 = vsyncadd [#allocation6], 4294967264 }
  0x3e   :  { %502 = dma.done.wait [#allocation9], 32  }
  0x3f   :  { %503 = vsyncadd [#allocation9], 4294967264  ;;  %v390_v0 = vld [vmem:[#allocation3 + $0x38] sm:$0xff]   ;;  %v391_v1 = vld [vmem:[#allocation3 + $0x30] sm:$0xff]  }
  0x40   :  { %363 = vmatprep.subr.bf16.mxu0 %v390_v0  ;;  %v392_v2 = vld [vmem:[#allocation3 + $0x28] sm:$0xff]   ;;  %v393_v3 = vld [vmem:[#allocation3 + $0x20] sm:$0xff]   ;;  %v394_v12 = vld [vmem:[#allocation3 + $0x18] sm:$0xff]  }
  0x41   :  { %364 = vmatpush3.bf16.msra.mxu0 %v390_v0  ;;  %v334_v4 = vld [vmem:[%s573_s0] sm:$0xff]   ;;  %v351_v11 = vld [vmem:[%s573_s0 + $0x8] sm:$0xff]   ;;  %v395_v19 = vld [vmem:[#allocation3 + $0x10] sm:$0xff]  }
  0x42   :  { %365 = vmatprep.subr.bf16.mxu0 %v391_v1  ;;  %v313_v5 = vld [vmem:[#allocation5] ss:$0 sm:$0xff]  ;;  %v335_v6 = vunpack.c.l.bf16 %v334_v4  ;;  %v336_v7 = vunpack.c.h.bf16 %v334_v4  ;;  %v314_v8 = vld [vmem:[#allocation7] ss:$0 sm:$0xff]  ;;  %v339_v15 = vunpack.c.l.bf16 %v351_v11  ;;  %v340_v16 = vunpack.c.h.bf16 %v351_v11  ;;  %v396_v23 = vld [vmem:[#allocation3 + $0x8] sm:$0xff]  }
  0x43   :  { %v397_v26 = vld [vmem:[#allocation3] sm:$0xff]  }
  0x44   :  { %v107_v9 = vmul.f32 %v335_v6, %v313_v5  ;;  %v108_v10 = vmul.f32 %v336_v7, %v313_v5  ;;  %v109_v21 = vmul.f32 %v339_v15, %v313_v5  ;;  %v110_v22 = vmul.f32 %v340_v16, %v313_v5  ;;  %v323_v30 = vld [vmem:[#allocation8] ss:$0 sm:$0xff]  ;;  %v324_v33 = vld [vmem:[#allocation10] ss:$0 sm:$0xff] }
  0x45   :  { %366 = vmatpush3.bf16.msra.mxu0 %v391_v1 }
  0x46   :  { %367 = vmatprep.subr.bf16.mxu0 %v392_v2  ;;  %v118_v13 = vadd.f32 %v314_v8, %v107_v9  ;;  %v119_v14 = vadd.f32 %v314_v8, %v108_v10  ;;  %v120_v24 = vadd.f32 %v314_v8, %v109_v21  ;;  %v121_v25 = vadd.f32 %v314_v8, %v110_v22 }
  0x48   :  { %v122_v17 = vmax.f32 %v118_v13, 0.0  ;;  %v123_v18 = vmax.f32 %v119_v14, 0.0  ;;  %v124_v27 = vmax.f32 %v120_v24, 0.0  ;;  %v125_v28 = vmax.f32 %v121_v25, 0.0 }
  0x49   :  { %368 = vmatpush3.bf16.msra.mxu0 %v392_v2 }
  0x4a   :  { %369 = vmatprep.subr.bf16.mxu0 %v393_v3  ;;  %v126_v20 = vpack.c.bf16 %v123_v18, %v122_v17  ;;  %v127_v29 = vpack.c.bf16 %v125_v28, %v124_v27 }
  0x4c   :  { %379 = vmatprep.mubr.bf16.mxu0 %v126_v20 }
  0x4d   :  { %370 = vmatpush3.bf16.msra.mxu0 %v393_v3 }
  0x4e   :  { %371 = vmatprep.subr.bf16.mxu0 %v394_v12 }
  0x51   :  { %372 = vmatpush3.bf16.msra.mxu0 %v394_v12 }
  0x52   :  { %373 = vmatprep.subr.bf16.mxu0 %v395_v19 }
  0x55   :  { %374 = vmatpush3.bf16.msra.mxu0 %v395_v19 }
  0x56   :  { %375 = vmatprep.subr.bf16.mxu0 %v396_v23 }
  0x59   :  { %376 = vmatpush3.bf16.msra.mxu0 %v396_v23 }
  0x5a   :  { %377 = vmatprep.subr.bf16.mxu0 %v397_v26 }
  0x5d   :  { %378 = vmatpush3.bf16.msra.mxu0 %v397_v26 }
  0x60   :  { %380 = vmatmul.mubr.bf16.vlgmr.msra.gmra.mxu0 %v127_v29 }
 0x120   :  { %v381_v31 = vpop.f32.mrf.mxu0 }
 0x121   :  { %v269_v32 = vmul.f32 %v381_v31, %v323_v30 }
 0x122   :  { %v230_v34 = vpop.f32.mrf.mxu0 }
 0x123   :  { %v267_v35 = vmul.f32 %v323_v30, %v230_v34  ;;  %v280_v37 = vadd.f32 %v324_v33, %v269_v32 }
 0x124   :  { %v382_v36 = vpop.f32.mrf.mxu0 }
 0x125   :  { %v270_v38 = vmul.f32 %v382_v36, %v323_v30  ;;  %v278_v40 = vadd.f32 %v324_v33, %v267_v35  ;;  %v284_v43 = vmax.f32 %v280_v37, 0.0 }
 0x126   :  { %v233_v39 = vpop.f32.mrf.mxu0 }
 0x127   :  { %v281_v41 = vadd.f32 %v324_v33, %v270_v38  ;;  %v268_v42 = vmul.f32 %v323_v30, %v233_v39  ;;  %v282_v46 = vmax.f32 %v278_v40, 0.0 }
 0x129   :  { %v285_v44 = vmax.f32 %v281_v41, 0.0  ;;  %v279_v45 = vadd.f32 %v324_v33, %v268_v42 }
 0x12b   :  { %v349_v47 = vpack.c.bf16 %v285_v44, %v284_v43  ;;  %v283_v48 = vmax.f32 %v279_v45, 0.0 }
 0x12d   :  { %352 = vst [vmem:[%s579_s6 + $0x8] sm:$0xff] %v349_v47   ;;  %v344_v49 = vpack.c.bf16 %v283_v48, %v282_v46 }
 0x12f   :  { %345 = vst [vmem:[%s579_s6] sm:$0xff] %v344_v49  }
 0x130   :  { %310 = vsyncpa [#allocation4], 1 }
 0x131   :  { %311 = vsyncpa [#allocation6], 1 }
 0x132   :  { %312 = vsyncpa [#allocation9], 1 }

// kernel: data_generator_img.22
= control target key start
LH: loop header
LB: loop body
LE: loop exit
PB: predicated region body
PF: predicated region fallthrough
CT: control target
= control target key end

     0   :  { %8 = vsyncpa [#allocation5], 0  ;;  %s1433_s0 = inlined_call_operand.vmem [shape: bf16[32,2560], index: 0, kind: input, shape index: {}]   ;;  %s1434_s1 = inlined_call_operand.hbm [shape: bf16[2560,128], index: 1, kind: input, shape index: {}]   ;;  %s1435_s2 = inlined_call_operand.hbm [shape: f32[1,128], index: 2, kind: input, shape index: {}]   ;;  %s1436_s3 = inlined_call_operand.vmem [shape: bf16[32,128], index: 3, kind: output, shape index: {}]  }
   0x1   :  { %10 = vsyncpa [#allocation5 + $0x1], 0 }
   0x2   :  { %11 = vsyncpa [#allocation7], 0  ;;  %s1266_s12 = smov 0   ;;  %s1268_s13 = smov 0  }
   0x3   :  { %s1270_s14 = smov 0   ;;  %s1272_s15 = smov 0  }
   0x4   :  { %s1274_s16 = smov 0   ;;  %s1276_s17 = smov 0  }
   0x5 LB: > { %s887_s18 = sadd.s32 4294967295, %s1239_s17   ;;  %s29_s19 = sadd.s32 1, %s1235_s16  ;;  %s1239_s17 = sphi %s1276_s17, %s17_s17   ;;  %s1235_s16 = sphi %s1274_s16, %s1447_s16   ;;  %s1231_s15 = sphi %s1272_s15, %s1446_s15   ;;  %s1227_s14 = sphi %s1270_s14, %s1445_s14   ;;  %s1223_s13 = sphi %s1268_s13, %s1444_s13   ;;  %s1219_s12 = sphi %s1266_s12, %s1443_s12  }
   0x6   : > { %p30_p0 = scmp.ge.s32.totalorder %s29_s19, 5  ;;  %s45_s20 = sadd.s32 1, %s1227_s14 }
   0x7   : > { %p52_p1 = scmp.ne.s32.totalorder %s1227_s14, %s1223_s13  ;;  %p53_p2 = scmp.eq.s32.totalorder %s1239_s17, 0 }
   0x8   : > { %s1449_s19 = smov (%p30_p0, %s29_s19), 0  ;;  %p86_p4 = scmp.ne.s32.totalorder %s1223_s13, %s1219_s12 }
   0x9   : > { %p1302_p3 = por %p53_p2, %p52_p1  ;;  %s41_s22 = ssub.s32 %s1235_s16, %s1449_s19 }
   0xa   : > { %p1309_p5 = scmp.eq.s32.totalorder %s887_s18, 0  ;;  %p43_p6 = scmp.eq.s32.totalorder %s41_s22, 0 }
   0xb   : > { %p888_p7 = scmp.ge.s32.totalorder %s1239_s17, 1  ;;  %p151_p9 = scmp.lt.s32.totalorder %s1239_s17, 6 }
   0xc   : > { %p1316_p8 = por %p1309_p5, %p86_p4  ;;  %s1241_s27 = smov [#allocation6]  }
   0xd   : > { %s1322_s25 = scalar_select %p43_p6, %s1227_s14, %s45_s20  }
   0xe   : > { %s1440_s24 = scalar_select %p1316_p8, 1, 0 }
   0xf   : > { %p1324_p10 = pnand %p888_p7, %p151_p9  ;;  %s166_s28 = sshll.u32 %s1241_s27, 4  ;;  %s167_s28 = int_to_ptr.vmem [resolvable:$true] %s166_s28 }
  0x10   : > { %s1144_s29 = scalar_lea.vmem %s167_s28, 16  ;;  %s1151_s30 = scalar_lea.vmem %s167_s28, 32 }
  0x11   : > { %p1031_p11 = pneg %p1324_p10  ;;  %p1145_p0 = scmp.ne.s32.totalorder %s167_s28, %s1144_s29 }
  0x12   : > { %p1152_p4 = scmp.lt.s32.totalorder %s167_s28, %s167_s28  ;;  %p1153_p6 = scmp.lt.s32.totalorder %s1151_s30, %s1144_s29 }
  0x13   : > { %p1032_p12 = pnand %p1031_p11, %p1309_p5 }
  0x14   : > { %p1154_p7 = por %p1153_p6, %p1152_p4 }
  0x15   : > { %p1135_p13 = pneg %p1032_p12 }
  0x17   : > { %p1147_p1 = pnand %p1145_p0, %p1135_p13 }
  0x19   : > { %p1148_p2 = pneg %p1147_p1 }
  0x1b   : > { %p1155_p9 = pnand %p1154_p7, %p1148_p2 }
  0x1d   : > { %1158 = shalt.err (!%p1155_p9)
}
  0x1e   : > { %1034 = dma.hbm_to_vmem [thread:$0]  (!%p1032_p12), %s1435_s2, 16, %s167_s28, [#allocation7]  }
  0x1f   : > { %p890_p8 = scmp.ge.s32.totalorder %s1239_s17, 5 }
  0x21   : > { %173 = sbr.rel (%p890_p8) target bundleno = 62 (0x3e), region = 20 }
  0x26   : > { %176 = sbr.rel (!%p1302_p3) target bundleno = 46 (0x2e), region = 24  ;;  %s178_s6 = sand.u32 (%p1302_p3), 1, %s1227_s14  }
  0x27   : > { %s952_s7 = sshll.u32 (%p1302_p3), %s1235_s16, 4  ;;  %s891_s8 = sshll.u32 (%p1302_p3), %s178_s6, 6 }
  0x28   : > { %s186_s11 = scalar_lea.vmem (%p1302_p3), %s1433_s0, %s952_s7  ;;  %s180_s12 = scalar_lea.vmem (%p1302_p3), [#allocation3], %s891_s8 }
  0x29   : > { %v199_v0 = vld [vmem:[%s186_s11] sm:$0xff] (%p1302_p3)  ;;  %v201_v1 = vld [vmem:[%s186_s11 + $0x8] sm:$0xff] (%p1302_p3)  ;;  %v203_v2 = vld [vmem:[%s186_s11 + $0x50] sm:$0xff] (%p1302_p3) }
  0x2a   : > { %200 = vst [vmem:[%s180_s12] sm:$0xff] (%p1302_p3), %v199_v0  ;;  %202 = vst [vmem:[%s180_s12 + $0x8] sm:$0xff] (%p1302_p3), %v201_v1  ;;  %v205_v3 = vld [vmem:[%s186_s11 + $0x58] sm:$0xff] (%p1302_p3)  ;;  %v207_v4 = vld [vmem:[%s186_s11 + $0xa0] sm:$0xff] (%p1302_p3) }
  0x2b   : > { %204 = vst [vmem:[%s180_s12 + $0x10] sm:$0xff] %v203_v2  ;;  %v209_v5 = vld [vmem:[%s186_s11 + $0xa8] sm:$0xff]  ;;  %206 = vst [vmem:[%s180_s12 + $0x18] sm:$0xff] %v205_v3  ;;  %v211_v6 = vld [vmem:[%s186_s11 + $0xf0] sm:$0xff] }
  0x2c   : > { %208 = vst [vmem:[%s180_s12 + $0x20] sm:$0xff] %v207_v4  ;;  %210 = vst [vmem:[%s180_s12 + $0x28] sm:$0xff] %v209_v5  ;;  %v213_v7 = vld [vmem:[%s186_s11 + $0xf8] sm:$0xff] }
  0x2d   : > { %212 = vst [vmem:[%s180_s12 + $0x30] sm:$0xff] %v211_v6  ;;  %214 = vst [vmem:[%s180_s12 + $0x38] sm:$0xff] %v213_v7 }
  0x2e PF: > { %s221_s18 = sand.u32 1, %s1227_s14   ;;  %s953_s20 = sshll.u32 %s1235_s16, 12 }
  0x2f   : > { %s894_s22 = sshll.u32 %s221_s18, 8  ;;  %s232_s29 = scalar_lea.hbm %s1434_s1, %s953_s20 }
  0x30   : > { %s225_s30 = scalar_lea.vmem [#allocation4], %s894_s22  ;;  %s222_s5 = scalar_lea.sflag [#allocation5], %s221_s18 }
  0x31   : > { %s233_s4 = sshll.u32 %s225_s30, 4  ;;  %s1242_s7 = smov [#allocation4]   ;;  %s234_s4 = int_to_ptr.vmem [resolvable:$true] %s233_s4 }
  0x32   : > { %s1171_s6 = scalar_lea.vmem %s234_s4, 4096  ;;  %s1175_s8 = sshll.u32 %s1242_s7, 4  ;;  %s1176_s8 = int_to_ptr.vmem [resolvable:$false] %s1175_s8 }
  0x33   : > { %p1172_p8 = scmp.ne.s32.totalorder %s234_s4, %s1171_s6  ;;  %s1177_s9 = scalar_lea.vmem %s1176_s8, 8192 }
  0x34   : > { %p1178_p13 = scmp.lt.s32.totalorder %s234_s4, %s1176_s8  ;;  %p1179_p0 = scmp.lt.s32.totalorder %s1177_s9, %s1171_s6 }
  0x35   : > { %p1173_p11 = pnand %p1172_p8, %p1302_p3 }
  0x36   : > { %p1180_p1 = por %p1179_p0, %p1178_p13 }
  0x37   : > { %p1174_p12 = pneg %p1173_p11 }
  0x39   : > { %p1181_p2 = pnand %p1180_p1, %p1174_p12 }
  0x3b   : > { %1184 = shalt.err (!%p1181_p2)
}
  0x3c   : > { %s1243_s10 = smov 64   ;;  %s1244_s11 = smov 4  }
  0x3d   : > { %1027 = dma.hbm_to_vmem [thread:$0]  (%p1302_p3), %s232_s29, 4096, %s234_s4, %s222_s5, %s1243_s10, %s1243_s10, %s1244_s11  }
  0x3e PF: > { %245 = sbr.rel (%p1324_p10) target bundleno = 341 (0x155), region = 51  ;;  %s248_s12 = sand.u32 (!%p1324_p10), 1, %s1223_s13  }
  0x3f   : > { %s898_s18 = sshll.u32 (!%p1324_p10), %s248_s12, 6  ;;  %s899_s20 = sshll.u32 (!%p1324_p10), %s248_s12, 8 }
  0x40   : > { %s1355_s22 = scalar_lea.vmem (!%p1324_p10), [#allocation3], %s898_s18  ;;  %s255_s27 = scalar_lea.sflag (!%p1324_p10), [#allocation5], %s248_s12 }
  0x41   : > { %s1357_s28 = scalar_lea.vmem (!%p1324_p10), [#allocation4], %s899_s20  ;;  %p1442_p4 = scmp.ne.s32.totalorder (!%p1324_p10), %s1440_s24, 0 }
  0x43   : > { %1210 = dma.done.wait (%p1442_p4), %s255_s27, 4096  }
  0x44   : > { %1212 = vsyncadd (%p1442_p4), %s255_s27, 4294963200 }
  0x45   : > { %1214 = dma.done.wait (%p1309_p5), [#allocation7], 16  }
  0x46   : > { %1216 = vsyncadd (%p1309_p5), [#allocation7], 4294967280  ;;  %p901_p3 = scmp.ne.s32.totalorder %s1231_s15, 0 }
  0x48   : > { %308 = sbr.rel (%p901_p3) target bundleno = 80 (0x50), region = 67 }
  0x4d   : > { %v1245_v8 = vmov 0.0  }
  0x4e   : > { %309 = vst [vmem:[#allocation2 + $0x10] sm:$0xff] %v1245_v8  ;;  %310 = vst [vmem:[#allocation2] sm:$0xff] %v1245_v8 }
  0x4f   : > { %311 = vst [vmem:[#allocation2 + $0x18] sm:$0xff] %v1245_v8  ;;  %312 = vst [vmem:[#allocation2 + $0x8] sm:$0xff] %v1245_v8 }
  0x50 PF: > { %v1089_v9 = vld [vmem:[%s1357_s28 + $0x78] sm:$0xff]   ;;  %v1093_v13 = vld [vmem:[%s1357_s28 + $0x70] sm:$0xff]   ;;  %v1097_v17 = vld [vmem:[%s1357_s28 + $0x68] sm:$0xff]   ;;  %p942_p5 = scmp.ne.s32.totalorder %s1231_s15, 4 }
  0x51   : > { %v1090_v10 = vld [vmem:[%s1357_s28 + $0xf8] sm:$0xff]   ;;  %969 = vmatprep.subr.bf16.mxu0 %v1089_v9  ;;  %v1094_v14 = vld [vmem:[%s1357_s28 + $0xf0] sm:$0xff]   ;;  %v1098_v18 = vld [vmem:[%s1357_s28 + $0xe8] sm:$0xff]  }
  0x52   : > { %v1091_v11 = vld [vmem:[%s1357_s28 + $0x38] sm:$0xff]   ;;  %997 = vmatprep.subr.bf16.mxu1 %v1090_v10  ;;  %v1095_v15 = vld [vmem:[%s1357_s28 + $0x30] sm:$0xff]   ;;  %v1099_v19 = vld [vmem:[%s1357_s28 + $0x28] sm:$0xff]  }
  0x53   : > { %v1092_v12 = vld [vmem:[%s1357_s28 + $0xb8] sm:$0xff]   ;;  %970 = vmatpush3.bf16.msra.mxu0 %v1091_v11  ;;  %v1096_v16 = vld [vmem:[%s1357_s28 + $0xb0] sm:$0xff]   ;;  %v1100_v20 = vld [vmem:[%s1357_s28 + $0xa8] sm:$0xff]  }
  0x54   : > { %998 = vmatpush3.bf16.msra.mxu1 %v1092_v12  ;;  %971 = vmatprep.subr.bf16.mxu0 %v1093_v13  ;;  %v1101_v21 = vld [vmem:[%s1357_s28 + $0x60] sm:$0xff]   ;;  %v1105_v25 = vld [vmem:[%s1357_s28 + $0x58] sm:$0xff]   ;;  %v1109_v29 = vld [vmem:[%s1357_s28 + $0x50] sm:$0xff]  }
  0x55   : > { %999 = vmatprep.subr.bf16.mxu1 %v1094_v14  ;;  %v1102_v22 = vld [vmem:[%s1357_s28 + $0xe0] sm:$0xff]   ;;  %v1106_v26 = vld [vmem:[%s1357_s28 + $0xd8] sm:$0xff]   ;;  %v1110_v30 = vld [vmem:[%s1357_s28 + $0xd0] sm:$0xff]  }
  0x56   : > { %v1103_v23 = vld [vmem:[%s1357_s28 + $0x20] sm:$0xff]   ;;  %v1107_v27 = vld [vmem:[%s1357_s28 + $0x18] sm:$0xff]   ;;  %v1111_v31 = vld [vmem:[%s1357_s28 + $0x10] sm:$0xff]  }
  0x57   : > { %972 = vmatpush3.bf16.msra.mxu0 %v1095_v15  ;;  %v1104_v24 = vld [vmem:[%s1357_s28 + $0xa0] sm:$0xff]   ;;  %v1108_v28 = vld [vmem:[%s1357_s28 + $0x98] sm:$0xff]   ;;  %v1112_v32 = vld [vmem:[%s1357_s28 + $0x90] sm:$0xff]  }
  0x58   : > { %1000 = vmatpush3.bf16.msra.mxu1 %v1096_v16  ;;  %973 = vmatprep.subr.bf16.mxu0 %v1097_v17  ;;  %v1113_v33 = vld [vmem:[%s1357_s28 + $0x48] sm:$0xff]   ;;  %v1117_v37 = vld [vmem:[%s1357_s28 + $0x40] sm:$0xff]   ;;  %v321_v56 = vld [vmem:[#allocation2 + $0x10] sm:$0xff] }
  0x59   : > { %1001 = vmatprep.subr.bf16.mxu1 %v1098_v18  ;;  %v1114_v34 = vld [vmem:[%s1357_s28 + $0xc8] sm:$0xff]   ;;  %v1118_v38 = vld [vmem:[%s1357_s28 + $0xc0] sm:$0xff]   ;;  %v323_v10 = vld [vmem:[#allocation2 + $0x18] sm:$0xff] }
  0x5a   : > { %v1115_v35 = vld [vmem:[%s1357_s28 + $0x8] sm:$0xff]   ;;  %v1119_v39 = vld [vmem:[%s1357_s28] sm:$0xff]  }
  0x5b   : > { %974 = vmatpush3.bf16.msra.mxu0 %v1099_v19  ;;  %v1116_v36 = vld [vmem:[%s1357_s28 + $0x88] sm:$0xff]   ;;  %v1120_v40 = vld [vmem:[%s1357_s28 + $0x80] sm:$0xff]  }
  0x5c   : > { %1002 = vmatpush3.bf16.msra.mxu1 %v1100_v20  ;;  %975 = vmatprep.subr.bf16.mxu0 %v1101_v21  ;;  %v1121_v41 = vld [vmem:[%s1355_s22] ss:$16 sps:$4 sm:$0xff]   ;;  %v1123_v42 = vld [vmem:[%s1355_s22 + $0x4] ss:$16 sps:$4 sm:$0xff]   ;;  %v1124_v43 = vld [vmem:[%s1355_s22 + $0x8] ss:$16 sps:$4 sm:$0xff]  }
  0x5d   : > { %1003 = vmatprep.subr.bf16.mxu1 %v1102_v22  ;;  %v1126_v44 = vld [vmem:[%s1355_s22 + $0xc] ss:$16 sps:$4 sm:$0xff]   ;;  %653 = vmatprep.mubr.bf16.mxu0 %v1123_v42  ;;  %v1127_v45 = vld [vmem:[%s1355_s22 + $0x24] ss:$16 sps:$4 sm:$0xff]   ;;  %v1131_v47 = vld [vmem:[%s1355_s22 + $0x20] ss:$16 sps:$4 sm:$0xff]  }
  0x5e   : > { %702 = vmatprep.mubr.bf16.mxu1 %v1126_v44  ;;  %v1129_v46 = vld [vmem:[%s1355_s22 + $0x2c] ss:$16 sps:$4 sm:$0xff]   ;;  %v1132_v48 = vld [vmem:[%s1355_s22 + $0x28] ss:$16 sps:$4 sm:$0xff]   ;;  %v322_v1 = vld [vmem:[#allocation2] sm:$0xff] }
  0x5f   : > { %976 = vmatpush3.bf16.msra.mxu0 %v1103_v23  ;;  %v324_v18 = vld [vmem:[#allocation2 + $0x8] sm:$0xff] }
  0x60   : > { %1004 = vmatpush3.bf16.msra.mxu1 %v1104_v24  ;;  %977 = vmatprep.subr.bf16.mxu0 %v1105_v25 }
  0x61   : > { %1005 = vmatprep.subr.bf16.mxu1 %v1106_v26 }
  0x63   : > { %978 = vmatpush3.bf16.msra.mxu0 %v1107_v27 }
  0x64   : > { %1006 = vmatpush3.bf16.msra.mxu1 %v1108_v28  ;;  %979 = vmatprep.subr.bf16.mxu0 %v1109_v29 }
  0x65   : > { %1007 = vmatprep.subr.bf16.mxu1 %v1110_v30 }
  0x67   : > { %980 = vmatpush3.bf16.msra.mxu0 %v1111_v31 }
  0x68   : > { %1008 = vmatpush3.bf16.msra.mxu1 %v1112_v32  ;;  %981 = vmatprep.subr.bf16.mxu0 %v1113_v33 }
  0x69   : > { %1009 = vmatprep.subr.bf16.mxu1 %v1114_v34 }
  0x6b   : > { %982 = vmatpush3.bf16.msra.mxu0 %v1115_v35 }
  0x6c   : > { %1010 = vmatpush3.bf16.msra.mxu1 %v1116_v36  ;;  %983 = vmatprep.subr.bf16.mxu0 %v1117_v37 }
  0x6d   : > { %1011 = vmatprep.subr.bf16.mxu1 %v1118_v38 }
  0x6f   : > { %984 = vmatpush3.bf16.msra.mxu0 %v1119_v39 }
  0x70   : > { %1012 = vmatpush3.bf16.msra.mxu1 %v1120_v40 }
  0x72   : > { %654 = vmatmul.mubr.bf16.vlgmr.msra.gmra.mxu0 %v1121_v41 }
  0x73   : > { %703 = vmatmul.mubr.bf16.vlgmr.msra.gmra.mxu1 %v1124_v43  ;;  %661 = vmatprep.mubr.bf16.mxu0 %v1127_v45 }
  0x74   : > { %710 = vmatprep.mubr.bf16.mxu1 %v1129_v46 }
  0x7a   : > { %662 = vmatmul.mubr.bf16.gmra.mxu0 %v1131_v47 }
  0x7b   : > { %711 = vmatmul.mubr.bf16.gmra.mxu1 %v1132_v48 }
 0x132   : > { %v985_v49 = vpop.f32.mrf.mxu0 }
 0x133   : > { %v1013_v50 = vpop.f32.mrf.mxu1 }
 0x134   : > { %v986_v51 = vpop.f32.mrf.mxu0 }
 0x135   : > { %v987_v52 = vadd.f32 %v986_v51, %v985_v49  ;;  %v1014_v53 = vpop.f32.mrf.mxu1 }
 0x136   : > { %v1015_v54 = vadd.f32 %v1014_v53, %v1013_v50  ;;  %v988_v55 = vpop.f32.mrf.mxu0 }
 0x137   : > { %v1016_v57 = vpop.f32.mrf.mxu1 }
 0x138   : > { %v705_v58 = vadd.f32 %v1015_v54, %v987_v52  ;;  %v989_v59 = vpop.f32.mrf.mxu0 }
 0x139   : > { %v990_v60 = vadd.f32 %v989_v59, %v988_v55  ;;  %v1017_v61 = vpop.f32.mrf.mxu1 }
 0x13a   : > { %v719_v62 = vadd.f32 %v705_v58, %v321_v56  ;;  %v1018_v63 = vadd.f32 %v1017_v61, %v1016_v57  ;;  %v991_v0 = vpop.f32.mrf.mxu0 }
 0x13b   : > { %v1019_v2 = vpop.f32.mrf.mxu1 }
 0x13c   : > { %723 = vst [vmem:[#allocation2 + $0x10] sm:$0xff] %v719_v62  ;;  %v708_v3 = vadd.f32 %v1018_v63, %v990_v60  ;;  %v992_v4 = vpop.f32.mrf.mxu0 }
 0x13d   : > { %v993_v5 = vadd.f32 %v992_v4, %v991_v0  ;;  %v1020_v6 = vpop.f32.mrf.mxu1 }
 0x13e   : > { %v720_v7 = vadd.f32 %v708_v3, %v322_v1  ;;  %v1021_v8 = vadd.f32 %v1020_v6, %v1019_v2  ;;  %v994_v9 = vpop.f32.mrf.mxu0 }
 0x13f   : > { %v1022_v11 = vpop.f32.mrf.mxu1 }
 0x140   : > { %724 = vst [vmem:[#allocation2] sm:$0xff] %v720_v7  ;;  %v713_v12 = vadd.f32 %v1021_v8, %v993_v5  ;;  %v995_v13 = vpop.f32.mrf.mxu0 }
 0x141   : > { %v996_v14 = vadd.f32 %v995_v13, %v994_v9  ;;  %v1023_v15 = vpop.f32.mrf.mxu1 }
 0x142   : > { %v721_v16 = vadd.f32 %v713_v12, %v323_v10  ;;  %v1024_v17 = vadd.f32 %v1023_v15, %v1022_v11 }
 0x144   : > { %725 = vst [vmem:[#allocation2 + $0x18] sm:$0xff] %v721_v16  ;;  %v716_v19 = vadd.f32 %v1024_v17, %v996_v14  ;;  %730 = sbr.rel (%p942_p5) target bundleno = 341 (0x155), region = 71 }
 0x146   : > { %v722_v20 = vadd.f32 %v716_v19, %v324_v18 }
 0x148   : > { %726 = vst [vmem:[#allocation2 + $0x8] sm:$0xff] %v722_v20 }
 0x149   : > { %v731_v21 = vld [vmem:[#allocation2 + $0x10] sm:$0xff]  ;;  %v732_v22 = vld [vmem:[#allocation2] sm:$0xff] }
 0x14a   : > { %v943_v23 = vld [vmem:[#allocation6] ss:$0 sm:$0xff] }
 0x14b   : > { %v742_v24 = vadd.f32 %v943_v23, %v731_v21  ;;  %v743_v25 = vadd.f32 %v943_v23, %v732_v22  ;;  %v733_v26 = vld [vmem:[#allocation2 + $0x18] sm:$0xff] }
 0x14c   : > { %v744_v28 = vadd.f32 %v943_v23, %v733_v26 }
 0x14d   : > { %v961_v30 = vpack.c.bf16 %v743_v25, %v742_v24 }
 0x14f   : > { %v734_v27 = vld [vmem:[#allocation2 + $0x8] sm:$0xff]  ;;  %962 = vst [vmem:[%s1436_s3] sm:$0xff] %v961_v30  }
 0x150   : > { %v745_v29 = vadd.f32 %v943_v23, %v734_v27 }
 0x152   : > { %v966_v31 = vpack.c.bf16 %v745_v29, %v744_v28 }
 0x154   : > { %968 = vst [vmem:[%s1436_s3 + $0x8] sm:$0xff] %v966_v31  }
 0x155 PF: > { %s17_s17 = sadd.s32 1, %s1239_s17   ;;  %s1443_s12 = smov %s1223_s13 }
 0x156   : > { %p14_p10 = scmp.ge.s32.totalorder %s17_s17, 7   ;;  %s1444_s13 = smov %s1227_s14 }
 0x157   : > { %s1445_s14 = smov %s1322_s25  ;;  %s1446_s15 = smov %s1235_s16 }
 0x158   : > { %s1447_s16 = smov %s1449_s19  ;;  %16 = sbr.rel (!%p14_p10) target bundleno = 5 (0x5), region = 116 }
 0x15d   :  { %794 = vsyncpa [#allocation5], 1 }
 0x15e   :  { %796 = vsyncpa [#allocation5 + $0x1], 1 }
 0x15f   :  { %797 = vsyncpa [#allocation7], 1 }

// kernel: data_generator_img.27
= control target key start
LH: loop header
LB: loop body
LE: loop exit
PB: predicated region body
PF: predicated region fallthrough
CT: control target
= control target key end

     0   :  { %8 = vsyncpa [#allocation4], 0  ;;  %s775_s0 = inlined_call_operand.vmem [shape: bf16[32,512], index: 0, kind: input, shape index: {}]   ;;  %s776_s1 = inlined_call_operand.hbm [shape: bf16[512,128], index: 1, kind: input, shape index: {}]   ;;  %s777_s2 = inlined_call_operand.hbm [shape: f32[1,128], index: 2, kind: input, shape index: {}]   ;;  %s778_s3 = inlined_call_operand.vmem [shape: bf16[32,128], index: 3, kind: output, shape index: {}]  }
   0x1   :  { %9 = vsyncpa [#allocation6], 0  ;;  %s715_s12 = smov [#allocation3]  }
   0x2   :  { %s17_s13 = sshll.u32 %s715_s12, 4  ;;  %s18_s13 = int_to_ptr.vmem [resolvable:$true] %s17_s13 }
   0x3   :  { %s679_s14 = scalar_lea.vmem %s18_s13, 4096  ;;  %p684_p1 = scmp.lt.s32.totalorder %s18_s13, %s18_s13 }
   0x4   :  { %p680_p0 = scmp.ne.s32.totalorder %s18_s13, %s679_s14  ;;  %p685_p2 = scmp.lt.s32.totalorder %s679_s14, %s679_s14 }
   0x6   :  { %p686_p3 = por %p685_p2, %p684_p1 }
   0x8   :  { %p687_p4 = pnand %p686_p3, %p680_p0 }
   0xa   :  { %690 = shalt.err (!%p687_p4)
}
   0xb   :  { %s716_s15 = smov 64   ;;  %s717_s16 = smov 4  }
   0xc   :  { %23 = dma.hbm_to_vmem [thread:$0]  %s776_s1, 4096, %s18_s13, [#allocation4], %s716_s15, %s716_s15, %s717_s16  }
   0xd   :  { %s718_s19 = smov [#allocation5]  }
   0xe   :  { %s30_s20 = sshll.u32 %s718_s19, 4  ;;  %s31_s20 = int_to_ptr.vmem [resolvable:$true] %s30_s20 }
   0xf   :  { %s699_s21 = scalar_lea.vmem %s31_s20, 16  ;;  %s703_s22 = scalar_lea.vmem %s31_s20, 32 }
  0x10   :  { %p700_p5 = scmp.ne.s32.totalorder %s31_s20, %s699_s21  ;;  %p704_p6 = scmp.lt.s32.totalorder %s31_s20, %s31_s20 }
  0x11   :  { %p705_p7 = scmp.lt.s32.totalorder %s703_s22, %s699_s21 }
  0x13   :  { %p706_p8 = por %p705_p7, %p704_p6 }
  0x15   :  { %p707_p9 = pnand %p706_p8, %p700_p5 }
  0x17   :  { %710 = shalt.err (!%p707_p9)
}
  0x18   :  { %33 = dma.hbm_to_vmem [thread:$0]  %s777_s2, 16, %s31_s20, [#allocation6]  }
  0x19   :  { %711 = dma.done.wait [#allocation4], 4096  }
  0x1a   :  { %712 = vsyncadd [#allocation4], 4294963200 }
  0x1b   :  { %713 = dma.done.wait [#allocation6], 16  }
  0x1c   :  { %714 = vsyncadd [#allocation6], 4294967280  ;;  %v627_v0 = vld [vmem:[#allocation3 + $0x78] sm:$0xff]   ;;  %v631_v4 = vld [vmem:[#allocation3 + $0x70] sm:$0xff]  }
  0x1d   :  { %v628_v1 = vld [vmem:[#allocation3 + $0xf8] sm:$0xff]   ;;  %567 = vmatprep.subr.bf16.mxu0 %v627_v0  ;;  %v632_v5 = vld [vmem:[#allocation3 + $0xf0] sm:$0xff]   ;;  %v635_v8 = vld [vmem:[#allocation3 + $0x68] sm:$0xff]  }
  0x1e   :  { %v629_v2 = vld [vmem:[#allocation3 + $0x38] sm:$0xff]   ;;  %595 = vmatprep.subr.bf16.mxu1 %v628_v1  ;;  %v633_v6 = vld [vmem:[#allocation3 + $0x30] sm:$0xff]   ;;  %v636_v9 = vld [vmem:[#allocation3 + $0xe8] sm:$0xff]  }
  0x1f   :  { %v630_v3 = vld [vmem:[#allocation3 + $0xb8] sm:$0xff]   ;;  %568 = vmatpush3.bf16.msra.mxu0 %v629_v2  ;;  %v634_v7 = vld [vmem:[#allocation3 + $0xb0] sm:$0xff]   ;;  %v637_v10 = vld [vmem:[#allocation3 + $0x28] sm:$0xff]  }
  0x20   :  { %596 = vmatpush3.bf16.msra.mxu1 %v630_v3  ;;  %569 = vmatprep.subr.bf16.mxu0 %v631_v4  ;;  %v638_v11 = vld [vmem:[#allocation3 + $0xa8] sm:$0xff]   ;;  %v639_v12 = vld [vmem:[#allocation3 + $0x60] sm:$0xff]   ;;  %v643_v16 = vld [vmem:[#allocation3 + $0x58] sm:$0xff]  }
  0x21   :  { %597 = vmatprep.subr.bf16.mxu1 %v632_v5  ;;  %v640_v13 = vld [vmem:[#allocation3 + $0xe0] sm:$0xff]   ;;  %v644_v17 = vld [vmem:[#allocation3 + $0xd8] sm:$0xff]   ;;  %v647_v20 = vld [vmem:[#allocation3 + $0x50] sm:$0xff]  }
  0x22   :  { %v641_v14 = vld [vmem:[#allocation3 + $0x20] sm:$0xff]   ;;  %v645_v18 = vld [vmem:[#allocation3 + $0x18] sm:$0xff]   ;;  %v648_v21 = vld [vmem:[#allocation3 + $0xd0] sm:$0xff]  }
  0x23   :  { %570 = vmatpush3.bf16.msra.mxu0 %v633_v6  ;;  %v642_v15 = vld [vmem:[#allocation3 + $0xa0] sm:$0xff]   ;;  %v646_v19 = vld [vmem:[#allocation3 + $0x98] sm:$0xff]   ;;  %v649_v22 = vld [vmem:[#allocation3 + $0x10] sm:$0xff]  }
  0x24   :  { %598 = vmatpush3.bf16.msra.mxu1 %v634_v7  ;;  %571 = vmatprep.subr.bf16.mxu0 %v635_v8  ;;  %v650_v23 = vld [vmem:[#allocation3 + $0x90] sm:$0xff]   ;;  %v651_v24 = vld [vmem:[#allocation3 + $0x48] sm:$0xff]   ;;  %v655_v28 = vld [vmem:[#allocation3 + $0x40] sm:$0xff]  }
  0x25   :  { %599 = vmatprep.subr.bf16.mxu1 %v636_v9  ;;  %v652_v25 = vld [vmem:[#allocation3 + $0xc8] sm:$0xff]   ;;  %v656_v29 = vld [vmem:[#allocation3 + $0xc0] sm:$0xff]  }
  0x26   :  { %v653_v26 = vld [vmem:[#allocation3 + $0x8] sm:$0xff]   ;;  %v657_v30 = vld [vmem:[#allocation3] sm:$0xff]  }
  0x27   :  { %572 = vmatpush3.bf16.msra.mxu0 %v637_v10  ;;  %v654_v27 = vld [vmem:[#allocation3 + $0x88] sm:$0xff]   ;;  %v658_v31 = vld [vmem:[#allocation3 + $0x80] sm:$0xff]  }
  0x28   :  { %600 = vmatpush3.bf16.msra.mxu1 %v638_v11  ;;  %573 = vmatprep.subr.bf16.mxu0 %v639_v12  ;;  %v659_v32 = vld [vmem:[%s775_s0] ss:$16 sps:$4 sm:$0xff]   ;;  %v661_v33 = vld [vmem:[%s775_s0 + $0x4] ss:$16 sps:$4 sm:$0xff]   ;;  %v662_v34 = vld [vmem:[%s775_s0 + $0x8] ss:$16 sps:$4 sm:$0xff]  }
  0x29   :  { %601 = vmatprep.subr.bf16.mxu1 %v640_v13  ;;  %v664_v35 = vld [vmem:[%s775_s0 + $0xc] ss:$16 sps:$4 sm:$0xff]   ;;  %389 = vmatprep.mubr.bf16.mxu0 %v661_v33  ;;  %v665_v36 = vld [vmem:[%s775_s0 + $0x24] ss:$16 sps:$4 sm:$0xff]   ;;  %v669_v38 = vld [vmem:[%s775_s0 + $0x20] ss:$16 sps:$4 sm:$0xff]  }
  0x2a   :  { %438 = vmatprep.mubr.bf16.mxu1 %v664_v35  ;;  %v667_v37 = vld [vmem:[%s775_s0 + $0x2c] ss:$16 sps:$4 sm:$0xff]   ;;  %v670_v39 = vld [vmem:[%s775_s0 + $0x28] ss:$16 sps:$4 sm:$0xff]   ;;  %v547_v54 = vld [vmem:[#allocation5] ss:$0 sm:$0xff] }
  0x2b   :  { %574 = vmatpush3.bf16.msra.mxu0 %v641_v14 }
  0x2c   :  { %602 = vmatpush3.bf16.msra.mxu1 %v642_v15  ;;  %575 = vmatprep.subr.bf16.mxu0 %v643_v16 }
  0x2d   :  { %603 = vmatprep.subr.bf16.mxu1 %v644_v17 }
  0x2f   :  { %576 = vmatpush3.bf16.msra.mxu0 %v645_v18 }
  0x30   :  { %604 = vmatpush3.bf16.msra.mxu1 %v646_v19  ;;  %577 = vmatprep.subr.bf16.mxu0 %v647_v20 }
  0x31   :  { %605 = vmatprep.subr.bf16.mxu1 %v648_v21 }
  0x33   :  { %578 = vmatpush3.bf16.msra.mxu0 %v649_v22 }
  0x34   :  { %606 = vmatpush3.bf16.msra.mxu1 %v650_v23  ;;  %579 = vmatprep.subr.bf16.mxu0 %v651_v24 }
  0x35   :  { %607 = vmatprep.subr.bf16.mxu1 %v652_v25 }
  0x37   :  { %580 = vmatpush3.bf16.msra.mxu0 %v653_v26 }
  0x38   :  { %608 = vmatpush3.bf16.msra.mxu1 %v654_v27  ;;  %581 = vmatprep.subr.bf16.mxu0 %v655_v28 }
  0x39   :  { %609 = vmatprep.subr.bf16.mxu1 %v656_v29 }
  0x3b   :  { %582 = vmatpush3.bf16.msra.mxu0 %v657_v30 }
  0x3c   :  { %610 = vmatpush3.bf16.msra.mxu1 %v658_v31 }
  0x3e   :  { %390 = vmatmul.mubr.bf16.vlgmr.msra.gmra.mxu0 %v659_v32 }
  0x3f   :  { %439 = vmatmul.mubr.bf16.vlgmr.msra.gmra.mxu1 %v662_v34  ;;  %397 = vmatprep.mubr.bf16.mxu0 %v665_v36 }
  0x40   :  { %446 = vmatprep.mubr.bf16.mxu1 %v667_v37 }
  0x46   :  { %398 = vmatmul.mubr.bf16.gmra.mxu0 %v669_v38 }
  0x47   :  { %447 = vmatmul.mubr.bf16.gmra.mxu1 %v670_v39 }
  0xfe   :  { %v583_v40 = vpop.f32.mrf.mxu0 }
  0xff   :  { %v611_v41 = vpop.f32.mrf.mxu1 }
 0x100   :  { %v584_v42 = vpop.f32.mrf.mxu0 }
 0x101   :  { %v612_v43 = vpop.f32.mrf.mxu1  ;;  %v585_v44 = vadd.f32 %v584_v42, %v583_v40 }
 0x102   :  { %v613_v45 = vadd.f32 %v612_v43, %v611_v41  ;;  %v586_v46 = vpop.f32.mrf.mxu0 }
 0x103   :  { %v614_v47 = vpop.f32.mrf.mxu1 }
 0x104   :  { %v587_v48 = vpop.f32.mrf.mxu0  ;;  %v441_v51 = vadd.f32 %v613_v45, %v585_v44 }
 0x105   :  { %v588_v49 = vadd.f32 %v587_v48, %v586_v46  ;;  %v615_v50 = vpop.f32.mrf.mxu1 }
 0x106   :  { %v616_v52 = vadd.f32 %v615_v50, %v614_v47  ;;  %v589_v53 = vpop.f32.mrf.mxu0  ;;  %v477_v59 = vadd.f32 %v547_v54, %v441_v51 }
 0x107   :  { %v617_v55 = vpop.f32.mrf.mxu1 }
 0x108   :  { %v444_v56 = vadd.f32 %v616_v52, %v588_v49  ;;  %v590_v57 = vpop.f32.mrf.mxu0 }
 0x109   :  { %v618_v58 = vpop.f32.mrf.mxu1  ;;  %v591_v61 = vadd.f32 %v590_v57, %v589_v53 }
 0x10a   :  { %v478_v60 = vadd.f32 %v547_v54, %v444_v56  ;;  %v619_v62 = vadd.f32 %v618_v58, %v617_v55  ;;  %v592_v63 = vpop.f32.mrf.mxu0 }
 0x10b   :  { %v620_v0 = vpop.f32.mrf.mxu1 }
 0x10c   :  { %v559_v1 = vpack.c.bf16 %v478_v60, %v477_v59  ;;  %v593_v2 = vpop.f32.mrf.mxu0  ;;  %v449_v5 = vadd.f32 %v619_v62, %v591_v61 }
 0x10d   :  { %v594_v3 = vadd.f32 %v593_v2, %v592_v63  ;;  %v621_v4 = vpop.f32.mrf.mxu1 }
 0x10e   :  { %560 = vst [vmem:[%s778_s3] sm:$0xff] %v559_v1   ;;  %v622_v6 = vadd.f32 %v621_v4, %v620_v0  ;;  %v479_v8 = vadd.f32 %v547_v54, %v449_v5 }
 0x110   :  { %v452_v7 = vadd.f32 %v622_v6, %v594_v3 }
 0x112   :  { %v480_v9 = vadd.f32 %v547_v54, %v452_v7 }
 0x114   :  { %v564_v10 = vpack.c.bf16 %v480_v9, %v479_v8 }
 0x116   :  { %566 = vst [vmem:[%s778_s3 + $0x8] sm:$0xff] %v564_v10  }
 0x117   :  { %505 = vsyncpa [#allocation4], 1 }
 0x118   :  { %506 = vsyncpa [#allocation6], 1 }

// kernel: data_generator_img.28
= control target key start
LH: loop header
LB: loop body
LE: loop exit
PB: predicated region body
PF: predicated region fallthrough
CT: control target
= control target key end

     0   :  { %11 = vsyncpa [#allocation4], 0  ;;  %s1039_s0 = inlined_call_operand.vmem [shape: bf16[128,128], index: 0, kind: input, shape index: {}]   ;;  %s1040_s1 = inlined_call_operand.hbm [shape: bf16[128,128], index: 1, kind: input, shape index: {}]   ;;  %s1041_s2 = inlined_call_operand.hbm [shape: f32[1,128], index: 2, kind: input, shape index: {}]   ;;  %s1042_s3 = inlined_call_operand.hbm [shape: f32[1,128], index: 3, kind: input, shape index: {}]   ;;  %s1043_s4 = inlined_call_operand.hbm [shape: f32[1,128], index: 4, kind: input, shape index: {}]   ;;  %s1044_s5 = inlined_call_operand.hbm [shape: f32[1,128], index: 5, kind: input, shape index: {}]   ;;  %s1045_s6 = inlined_call_operand.vmem [shape: bf16[128,128], index: 6, kind: output, shape index: {}]  }
   0x1   :  { %12 = vsyncpa [#allocation6], 0 }
   0x2   :  { %13 = vsyncpa [#allocation9], 0  ;;  %s898_s21 = smov [#allocation5]   ;;  %s899_s23 = smov [#allocation8]  }
   0x3   :  { %s34_s22 = sshll.u32 %s898_s21, 4  ;;  %s54_s24 = sshll.u32 %s899_s23, 4  ;;  %s35_s22 = int_to_ptr.vmem [resolvable:$true] %s34_s22  ;;  %s55_s24 = int_to_ptr.vmem [resolvable:$true] %s54_s24 }
   0x4   :  { %s800_s25 = scalar_lea.vmem %s35_s22, 16  ;;  %s804_s26 = scalar_lea.vmem %s35_s22, 32 }
   0x5   :  { %p801_p0 = scmp.ne.s32.totalorder %s35_s22, %s800_s25  ;;  %p805_p1 = scmp.lt.s32.totalorder %s35_s22, %s35_s22 }
   0x6   :  { %p806_p2 = scmp.lt.s32.totalorder %s804_s26, %s800_s25 }
   0x8   :  { %p807_p3 = por %p806_p2, %p805_p1 }
   0xa   :  { %p808_p4 = pnand %p807_p3, %p801_p0 }
   0xc   :  { %811 = shalt.err (!%p808_p4)
}
   0xd   :  { %37 = dma.hbm_to_vmem [thread:$0]  %s1041_s2, 16, %s35_s22, [#allocation6]  }
   0xe   :  { %s820_s29 = scalar_lea.vmem %s55_s24, 16  ;;  %s824_s30 = scalar_lea.vmem %s55_s24, 32 }
   0xf   :  { %p821_p5 = scmp.ne.s32.totalorder %s55_s24, %s820_s29  ;;  %p825_p6 = scmp.lt.s32.totalorder %s55_s24, %s55_s24 }
  0x10   :  { %p826_p7 = scmp.lt.s32.totalorder %s824_s30, %s820_s29 }
  0x12   :  { %p827_p8 = por %p826_p7, %p825_p6 }
  0x14   :  { %p828_p9 = pnand %p827_p8, %p821_p5 }
  0x16   :  { %831 = shalt.err (!%p828_p9)
}
  0x17   :  { %57 = dma.hbm_to_vmem [thread:$0]  %s1043_s4, 16, %s55_s24, [#allocation9]  }
  0x18   :  { %s900_s9 = smov [#allocation3]  }
  0x19   :  { %s21_s10 = sshll.u32 %s900_s9, 4  ;;  %s22_s10 = int_to_ptr.vmem [resolvable:$true] %s21_s10 }
  0x1a   :  { %s840_s11 = scalar_lea.vmem %s22_s10, 1024  ;;  %p845_p11 = scmp.lt.s32.totalorder %s22_s10, %s22_s10 }
  0x1b   :  { %p841_p10 = scmp.ne.s32.totalorder %s22_s10, %s840_s11  ;;  %p846_p12 = scmp.lt.s32.totalorder %s840_s11, %s840_s11 }
  0x1d   :  { %p847_p13 = por %p846_p12, %p845_p11 }
  0x1f   :  { %p848_p0 = pnand %p847_p13, %p841_p10 }
  0x21   :  { %851 = shalt.err (!%p848_p0)
}
  0x22   :  { %s901_s2 = smov 64   ;;  %s902_s12 = smov 4  }
  0x23   :  { %27 = dma.hbm_to_vmem [thread:$0]  %s1040_s1, 1024, %s22_s10, [#allocation4], %s901_s2, %s901_s2, %s902_s12  }
  0x24   :  { %s903_s15 = smov [#allocation7]   ;;  %s904_s4 = smov [#allocation10]  }
  0x25   :  { %s44_s16 = sshll.u32 %s903_s15, 4  ;;  %s64_s17 = sshll.u32 %s904_s4, 4  ;;  %s45_s16 = int_to_ptr.vmem [resolvable:$true] %s44_s16  ;;  %s65_s17 = int_to_ptr.vmem [resolvable:$true] %s64_s17 }
  0x26   :  { %s860_s18 = scalar_lea.vmem %s45_s16, 16  ;;  %s864_s19 = scalar_lea.vmem %s45_s16, 32 }
  0x27   :  { %p861_p1 = scmp.ne.s32.totalorder %s45_s16, %s860_s18  ;;  %p865_p2 = scmp.lt.s32.totalorder %s45_s16, %s45_s16 }
  0x28   :  { %p866_p3 = scmp.lt.s32.totalorder %s864_s19, %s860_s18 }
  0x2a   :  { %p867_p4 = por %p866_p3, %p865_p2 }
  0x2c   :  { %p868_p5 = pnand %p867_p4, %p861_p1 }
  0x2e   :  { %871 = shalt.err (!%p868_p5)
}
  0x2f   :  { %47 = dma.hbm_to_vmem [thread:$0]  %s1042_s3, 16, %s45_s16, [#allocation6]  }
  0x30   :  { %s880_s22 = scalar_lea.vmem %s65_s17, 16  ;;  %s884_s1 = scalar_lea.vmem %s65_s17, 32 }
  0x31   :  { %p881_p6 = scmp.ne.s32.totalorder %s65_s17, %s880_s22  ;;  %p885_p7 = scmp.lt.s32.totalorder %s65_s17, %s65_s17 }
  0x32   :  { %p886_p8 = scmp.lt.s32.totalorder %s884_s1, %s880_s22 }
  0x34   :  { %p887_p9 = por %p886_p8, %p885_p7 }
  0x36   :  { %p888_p10 = pnand %p887_p9, %p881_p6 }
  0x38   :  { %891 = shalt.err (!%p888_p10)
}
  0x39   :  { %67 = dma.hbm_to_vmem [thread:$0]  %s1044_s5, 16, %s65_s17, [#allocation9]  }
  0x3a   :  { %892 = dma.done.wait [#allocation4], 1024  }
  0x3b   :  { %893 = vsyncadd [#allocation4], 4294966272 }
  0x3c   :  { %894 = dma.done.wait [#allocation6], 32  }
  0x3d   :  { %895 = vsyncadd [#allocation6], 4294967264 }
  0x3e   :  { %896 = dma.done.wait [#allocation9], 32  }
  0x3f   :  { %897 = vsyncadd [#allocation9], 4294967264  ;;  %v784_v0 = vld [vmem:[#allocation3 + $0x38] sm:$0xff]   ;;  %v785_v1 = vld [vmem:[#allocation3 + $0x30] sm:$0xff]  }
  0x40   :  { %729 = vmatprep.subr.bf16.mxu0 %v784_v0  ;;  %761 = vmatprep.subr.bf16.mxu1 %v784_v0  ;;  %v786_v2 = vld [vmem:[#allocation3 + $0x28] sm:$0xff]   ;;  %v787_v3 = vld [vmem:[#allocation3 + $0x20] sm:$0xff]   ;;  %v700_v16 = vld [vmem:[%s1039_s0 + $0x10] sm:$0xff]  }
  0x41   :  { %730 = vmatpush3.bf16.msra.mxu0 %v784_v0  ;;  %769 = vmatpush3.bf16.msra.mxu1 %v784_v0  ;;  %v628_v4 = vld [vmem:[%s1039_s0] sm:$0xff]   ;;  %v699_v9 = vld [vmem:[%s1039_s0 + $0x8] sm:$0xff]   ;;  %v788_v17 = vld [vmem:[#allocation3 + $0x18] sm:$0xff]   ;;  %v637_v28 = vunpack.c.l.bf16 %v700_v16  ;;  %v638_v40 = vunpack.c.h.bf16 %v700_v16 }
  0x42   :  { %731 = vmatprep.subr.bf16.mxu0 %v785_v1  ;;  %762 = vmatprep.subr.bf16.mxu1 %v785_v1  ;;  %v958_v5 = vld [vmem:[#allocation5] ss:$0 sm:$0xff]  ;;  %v629_v6 = vunpack.c.l.bf16 %v628_v4  ;;  %v630_v7 = vunpack.c.h.bf16 %v628_v4  ;;  %v966_v10 = vld [vmem:[#allocation7] ss:$0 sm:$0xff]  ;;  %v703_v13 = vld [vmem:[%s1039_s0 + $0x28] sm:$0xff]   ;;  %v633_v20 = vunpack.c.l.bf16 %v699_v9  ;;  %v634_v21 = vunpack.c.h.bf16 %v699_v9 }
  0x43   :  { %v702_v8 = vld [vmem:[%s1039_s0 + $0x20] sm:$0xff]   ;;  %v649_v24 = vunpack.c.l.bf16 %v703_v13  ;;  %v650_v25 = vunpack.c.h.bf16 %v703_v13  ;;  %v704_v31 = vld [vmem:[%s1039_s0 + $0x30] sm:$0xff]   ;;  %v147_v42 = vmul.f32 %v637_v28, %v958_v5  ;;  %v701_v44 = vld [vmem:[%s1039_s0 + $0x18] sm:$0xff]   ;;  %v148_v45 = vmul.f32 %v638_v40, %v958_v5 }
  0x44   :  { %v645_v11 = vunpack.c.l.bf16 %v702_v8  ;;  %v646_v12 = vunpack.c.h.bf16 %v702_v8  ;;  %v143_v14 = vmul.f32 %v629_v6, %v958_v5  ;;  %v144_v15 = vmul.f32 %v630_v7, %v958_v5  ;;  %v789_v32 = vld [vmem:[#allocation3 + $0x10] sm:$0xff]   ;;  %v705_v47 = vld [vmem:[%s1039_s0 + $0x38] sm:$0xff]   ;;  %v790_v48 = vld [vmem:[#allocation3 + $0x8] sm:$0xff]  }
  0x45   :  { %732 = vmatpush3.bf16.msra.mxu0 %v785_v1  ;;  %770 = vmatpush3.bf16.msra.mxu1 %v785_v1  ;;  %v145_v35 = vmul.f32 %v633_v20, %v958_v5  ;;  %v146_v36 = vmul.f32 %v634_v21, %v958_v5  ;;  %v153_v38 = vmul.f32 %v649_v24, %v958_v5  ;;  %v653_v43 = vunpack.c.l.bf16 %v704_v31  ;;  %v791_v63 = vld [vmem:[#allocation3] sm:$0xff]  }
  0x46   :  { %733 = vmatprep.subr.bf16.mxu0 %v786_v2  ;;  %763 = vmatprep.subr.bf16.mxu1 %v786_v2  ;;  %v151_v18 = vmul.f32 %v645_v11, %v958_v5  ;;  %v152_v19 = vmul.f32 %v646_v12, %v958_v5  ;;  %v166_v22 = vadd.f32 %v966_v10, %v143_v14  ;;  %v654_v46 = vunpack.c.h.bf16 %v704_v31  ;;  %v594_v31 = vld [vmem:[#allocation10] ss:$0 sm:$0xff] }
  0x47   :  { %v167_v23 = vadd.f32 %v966_v10, %v144_v15  ;;  %v154_v39 = vmul.f32 %v650_v25, %v958_v5  ;;  %v168_v49 = vadd.f32 %v966_v10, %v145_v35  ;;  %v169_v50 = vadd.f32 %v966_v10, %v146_v36 }
  0x48   :  { %v174_v26 = vadd.f32 %v966_v10, %v151_v18  ;;  %v175_v27 = vadd.f32 %v966_v10, %v152_v19  ;;  %v182_v29 = vmax.f32 %v166_v22, 0.0  ;;  %v155_v51 = vmul.f32 %v653_v43, %v958_v5 }
  0x49   :  { %734 = vmatpush3.bf16.msra.mxu0 %v786_v2  ;;  %771 = vmatpush3.bf16.msra.mxu1 %v786_v2  ;;  %v183_v30 = vmax.f32 %v167_v23, 0.0  ;;  %v176_v52 = vadd.f32 %v966_v10, %v153_v38  ;;  %v177_v53 = vadd.f32 %v966_v10, %v154_v39  ;;  %v156_v54 = vmul.f32 %v654_v46, %v958_v5 }
  0x4a   :  { %735 = vmatprep.subr.bf16.mxu0 %v787_v3  ;;  %764 = vmatprep.subr.bf16.mxu1 %v787_v3  ;;  %v190_v33 = vmax.f32 %v174_v26, 0.0  ;;  %v191_v34 = vmax.f32 %v175_v27, 0.0  ;;  %v641_v55 = vunpack.c.l.bf16 %v701_v44  ;;  %v170_v56 = vadd.f32 %v966_v10, %v147_v42  ;;  %v593_v27 = vld [vmem:[#allocation8] ss:$0 sm:$0xff] }
  0x4b   :  { %v198_v37 = vpack.c.bf16 %v183_v30, %v182_v29  ;;  %v642_v57 = vunpack.c.h.bf16 %v701_v44  ;;  %v657_v58 = vunpack.c.l.bf16 %v705_v47  ;;  %v658_v59 = vunpack.c.h.bf16 %v705_v47 }
  0x4c   :  { %v202_v41 = vpack.c.bf16 %v191_v34, %v190_v33  ;;  %v171_v60 = vadd.f32 %v966_v10, %v148_v45  ;;  %v178_v61 = vadd.f32 %v966_v10, %v155_v51  ;;  %v179_v62 = vadd.f32 %v966_v10, %v156_v54 }
  0x4d   :  { %736 = vmatpush3.bf16.msra.mxu0 %v787_v3  ;;  %772 = vmatpush3.bf16.msra.mxu1 %v787_v3  ;;  %v184_v0 = vmax.f32 %v168_v49, 0.0  ;;  %v185_v1 = vmax.f32 %v169_v50, 0.0  ;;  %v192_v2 = vmax.f32 %v176_v52, 0.0  ;;  %v193_v3 = vmax.f32 %v177_v53, 0.0 }
  0x4e   :  { %737 = vmatprep.subr.bf16.mxu0 %v788_v17  ;;  %765 = vmatprep.subr.bf16.mxu1 %v788_v17  ;;  %v149_v4 = vmul.f32 %v641_v55, %v958_v5  ;;  %v150_v6 = vmul.f32 %v642_v57, %v958_v5  ;;  %v157_v7 = vmul.f32 %v657_v58, %v958_v5  ;;  %v186_v9 = vmax.f32 %v170_v56, 0.0 }
  0x4f   :  { %745 = vmatprep.mubr.bf16.mxu0 %v198_v37  ;;  %753 = vmatprep.mubr.bf16.mxu1 %v202_v41  ;;  %v158_v8 = vmul.f32 %v658_v59, %v958_v5  ;;  %v187_v11 = vmax.f32 %v171_v60, 0.0  ;;  %v194_v12 = vmax.f32 %v178_v61, 0.0  ;;  %v195_v13 = vmax.f32 %v179_v62, 0.0 }
  0x50   :  { %v199_v14 = vpack.c.bf16 %v185_v1, %v184_v0  ;;  %v203_v15 = vpack.c.bf16 %v193_v3, %v192_v2  ;;  %v172_v16 = vadd.f32 %v966_v10, %v149_v4  ;;  %v180_v18 = vadd.f32 %v966_v10, %v157_v7 }
  0x51   :  { %738 = vmatpush3.bf16.msra.mxu0 %v788_v17  ;;  %773 = vmatpush3.bf16.msra.mxu1 %v788_v17  ;;  %v173_v17 = vadd.f32 %v966_v10, %v150_v6  ;;  %v181_v19 = vadd.f32 %v966_v10, %v158_v8  ;;  %v200_v5 = vpack.c.bf16 %v187_v11, %v186_v9 }
  0x52   :  { %739 = vmatprep.subr.bf16.mxu0 %v789_v32  ;;  %766 = vmatprep.subr.bf16.mxu1 %v789_v32  ;;  %v204_v20 = vpack.c.bf16 %v195_v13, %v194_v12  ;;  %v188_v21 = vmax.f32 %v172_v16, 0.0  ;;  %v196_v23 = vmax.f32 %v180_v18, 0.0 }
  0x53   :  { %v189_v22 = vmax.f32 %v173_v17, 0.0  ;;  %v197_v24 = vmax.f32 %v181_v19, 0.0 }
  0x55   :  { %740 = vmatpush3.bf16.msra.mxu0 %v789_v32  ;;  %774 = vmatpush3.bf16.msra.mxu1 %v789_v32  ;;  %v201_v25 = vpack.c.bf16 %v189_v22, %v188_v21  ;;  %v205_v26 = vpack.c.bf16 %v197_v24, %v196_v23 }
  0x56   :  { %741 = vmatprep.subr.bf16.mxu0 %v790_v48  ;;  %767 = vmatprep.subr.bf16.mxu1 %v790_v48 }
  0x59   :  { %742 = vmatpush3.bf16.msra.mxu0 %v790_v48  ;;  %775 = vmatpush3.bf16.msra.mxu1 %v790_v48 }
  0x5a   :  { %743 = vmatprep.subr.bf16.mxu0 %v791_v63  ;;  %768 = vmatprep.subr.bf16.mxu1 %v791_v63 }
  0x5d   :  { %744 = vmatpush3.bf16.msra.mxu0 %v791_v63  ;;  %776 = vmatpush3.bf16.msra.mxu1 %v791_v63 }
  0x60   :  { %746 = vmatmul.mubr.bf16.vlgmr.msra.gmra.mxu0 %v199_v14  ;;  %754 = vmatmul.mubr.bf16.vlgmr.msra.gmra.mxu1 %v203_v15 }
  0x61   :  { %749 = vmatprep.mubr.bf16.mxu0 %v200_v5  ;;  %757 = vmatprep.mubr.bf16.mxu1 %v204_v20 }
  0x68   :  { %750 = vmatmul.mubr.bf16.gmra.mxu0 %v201_v25  ;;  %758 = vmatmul.mubr.bf16.gmra.mxu1 %v205_v26 }
 0x120   :  { %v747_v28 = vpop.f32.mrf.mxu0  ;;  %v755_v29 = vpop.f32.mrf.mxu1 }
 0x121   :  { %v443_v10 = vmul.f32 %v747_v28, %v593_v27  ;;  %v451_v30 = vmul.f32 %v755_v29, %v593_v27 }
 0x122   :  { %v320_v32 = vpop.f32.mrf.mxu0  ;;  %v352_v33 = vpop.f32.mrf.mxu1 }
 0x123   :  { %v441_v34 = vmul.f32 %v593_v27, %v320_v32  ;;  %v449_v35 = vmul.f32 %v593_v27, %v352_v33  ;;  %v466_v38 = vadd.f32 %v594_v31, %v443_v10  ;;  %v474_v39 = vadd.f32 %v594_v31, %v451_v30 }
 0x124   :  { %v748_v36 = vpop.f32.mrf.mxu0  ;;  %v756_v37 = vpop.f32.mrf.mxu1 }
 0x125   :  { %v444_v40 = vmul.f32 %v748_v36, %v593_v27  ;;  %v452_v41 = vmul.f32 %v756_v37, %v593_v27  ;;  %v464_v44 = vadd.f32 %v594_v31, %v441_v34  ;;  %v472_v45 = vadd.f32 %v594_v31, %v449_v35 }
 0x126   :  { %v323_v42 = vpop.f32.mrf.mxu0  ;;  %v355_v43 = vpop.f32.mrf.mxu1  ;;  %v482_v52 = vmax.f32 %v466_v38, 0.0  ;;  %v490_v53 = vmax.f32 %v474_v39, 0.0 }
 0x127   :  { %v442_v46 = vmul.f32 %v593_v27, %v323_v42  ;;  %v450_v47 = vmul.f32 %v593_v27, %v355_v43  ;;  %v467_v48 = vadd.f32 %v594_v31, %v444_v40  ;;  %v475_v49 = vadd.f32 %v594_v31, %v452_v41 }
 0x128   :  { %v751_v50 = vpop.f32.mrf.mxu0  ;;  %v759_v51 = vpop.f32.mrf.mxu1  ;;  %v480_v62 = vmax.f32 %v464_v44, 0.0  ;;  %v488_v63 = vmax.f32 %v472_v45, 0.0 }
 0x129   :  { %v465_v54 = vadd.f32 %v594_v31, %v442_v46  ;;  %v473_v55 = vadd.f32 %v594_v31, %v450_v47  ;;  %v483_v56 = vmax.f32 %v467_v48, 0.0  ;;  %v491_v57 = vmax.f32 %v475_v49, 0.0 }
 0x12a   :  { %v447_v58 = vmul.f32 %v751_v50, %v593_v27  ;;  %v455_v59 = vmul.f32 %v759_v51, %v593_v27  ;;  %v336_v60 = vpop.f32.mrf.mxu0  ;;  %v368_v61 = vpop.f32.mrf.mxu1 }
 0x12b   :  { %v481_v0 = vmax.f32 %v465_v54, 0.0  ;;  %v489_v1 = vmax.f32 %v473_v55, 0.0  ;;  %v667_v2 = vpack.c.bf16 %v483_v56, %v482_v52  ;;  %v687_v3 = vpack.c.bf16 %v491_v57, %v490_v53 }
 0x12c   :  { %v445_v4 = vmul.f32 %v593_v27, %v336_v60  ;;  %v453_v6 = vmul.f32 %v593_v27, %v368_v61  ;;  %v752_v7 = vpop.f32.mrf.mxu0  ;;  %v760_v8 = vpop.f32.mrf.mxu1  ;;  %v470_v12 = vadd.f32 %v594_v31, %v447_v58  ;;  %v478_v13 = vadd.f32 %v594_v31, %v455_v59 }
 0x12d   :  { %v662_v9 = vpack.c.bf16 %v481_v0, %v480_v62  ;;  %v682_v11 = vpack.c.bf16 %v489_v1, %v488_v63  ;;  %706 = vst [vmem:[%s1045_s6 + $0x8] sm:$0xff] %v667_v2   ;;  %710 = vst [vmem:[%s1045_s6 + $0x28] sm:$0xff] %v687_v3   ;;  %v448_v14 = vmul.f32 %v752_v7, %v593_v27 }
 0x12e   :  { %v456_v15 = vmul.f32 %v760_v8, %v593_v27  ;;  %v339_v16 = vpop.f32.mrf.mxu0  ;;  %v371_v17 = vpop.f32.mrf.mxu1  ;;  %v468_v18 = vadd.f32 %v594_v31, %v445_v4  ;;  %v476_v19 = vadd.f32 %v594_v31, %v453_v6  ;;  %v486_v25 = vmax.f32 %v470_v12, 0.0 }
 0x12f   :  { %663 = vst [vmem:[%s1045_s6] sm:$0xff] %v662_v9   ;;  %709 = vst [vmem:[%s1045_s6 + $0x20] sm:$0xff] %v682_v11   ;;  %v446_v5 = vmul.f32 %v593_v27, %v339_v16  ;;  %v454_v20 = vmul.f32 %v593_v27, %v371_v17  ;;  %v471_v21 = vadd.f32 %v594_v31, %v448_v14  ;;  %v494_v26 = vmax.f32 %v478_v13, 0.0 }
 0x130   :  { %v479_v22 = vadd.f32 %v594_v31, %v456_v15  ;;  %v484_v10 = vmax.f32 %v468_v18, 0.0  ;;  %v492_v30 = vmax.f32 %v476_v19, 0.0 }
 0x131   :  { %v469_v23 = vadd.f32 %v594_v31, %v446_v5  ;;  %v477_v24 = vadd.f32 %v594_v31, %v454_v20  ;;  %v487_v28 = vmax.f32 %v471_v21, 0.0 }
 0x132   :  { %v495_v29 = vmax.f32 %v479_v22, 0.0 }
 0x133   :  { %v485_v32 = vmax.f32 %v469_v23, 0.0  ;;  %v493_v33 = vmax.f32 %v477_v24, 0.0  ;;  %v677_v34 = vpack.c.bf16 %v487_v28, %v486_v25 }
 0x134   :  { %v697_v35 = vpack.c.bf16 %v495_v29, %v494_v26 }
 0x135   :  { %v672_v36 = vpack.c.bf16 %v485_v32, %v484_v10  ;;  %v692_v37 = vpack.c.bf16 %v493_v33, %v492_v30  ;;  %708 = vst [vmem:[%s1045_s6 + $0x18] sm:$0xff] %v677_v34  }
 0x136   :  { %712 = vst [vmem:[%s1045_s6 + $0x38] sm:$0xff] %v697_v35  }
 0x137   :  { %707 = vst [vmem:[%s1045_s6 + $0x10] sm:$0xff] %v672_v36   ;;  %711 = vst [vmem:[%s1045_s6 + $0x30] sm:$0xff] %v692_v37  }
 0x138   :  { %580 = vsyncpa [#allocation4], 1 }
 0x139   :  { %581 = vsyncpa [#allocation6], 1 }
 0x13a   :  { %582 = vsyncpa [#allocation9], 1 }

// kernel: data_generator_img.31
= control target key start
LH: loop header
LB: loop body
LE: loop exit
PB: predicated region body
PF: predicated region fallthrough
CT: control target
= control target key end

     0   :  { %s1260_s1 = inlined_call_operand.vmem [shape: bf16[384,128], index: 1, kind: input, shape index: {}]   ;;  %s1261_s0 = inlined_call_operand.vmem [shape: bf16[128,384], index: 0, kind: input, shape index: {}]   ;;  %s1262_s2 = inlined_call_operand.vmem [shape: f32[1,128], index: 2, kind: input, shape index: {}]   ;;  %s1263_s3 = inlined_call_operand.vmem [shape: bf16[128,128], index: 3, kind: output, shape index: {}]  }
   0x1   :  { %v995_v0 = vld [vmem:[%s1260_s1 + $0x78] sm:$0xff]   ;;  %v998_v3 = vld [vmem:[%s1260_s1 + $0x70] sm:$0xff]   ;;  %v1001_v6 = vld [vmem:[%s1260_s1 + $0x68] sm:$0xff]  }
   0x2   :  { %v996_v1 = vld [vmem:[%s1260_s1 + $0x38] sm:$0xff]   ;;  %883 = vmatprep.subr.bf16.mxu0 %v995_v0  ;;  %v999_v4 = vld [vmem:[%s1260_s1 + $0x30] sm:$0xff]   ;;  %v1002_v7 = vld [vmem:[%s1260_s1 + $0x28] sm:$0xff]  }
   0x3   :  { %v997_v2 = vld [vmem:[%s1260_s1 + $0xb8] sm:$0xff]   ;;  %884 = vmatpush3.bf16.msra.mxu0 %v996_v1  ;;  %v1000_v5 = vld [vmem:[%s1260_s1 + $0xb0] sm:$0xff]   ;;  %v1003_v8 = vld [vmem:[%s1260_s1 + $0xa8] sm:$0xff]  }
   0x4   :  { %963 = vmatprep.subr.bf16.mxu1 %v997_v2  ;;  %885 = vmatprep.subr.bf16.mxu0 %v998_v3  ;;  %v1004_v9 = vld [vmem:[%s1260_s1 + $0x60] sm:$0xff]   ;;  %v1007_v12 = vld [vmem:[%s1260_s1 + $0x58] sm:$0xff]   ;;  %v1010_v15 = vld [vmem:[%s1260_s1 + $0x50] sm:$0xff]  }
   0x5   :  { %964 = vmatpush3.bf16.msra.mxu1 %v997_v2  ;;  %v1005_v10 = vld [vmem:[%s1260_s1 + $0x20] sm:$0xff]   ;;  %v1009_v13 = vld [vmem:[%s1260_s1 + $0x98] sm:$0xff]   ;;  %v1012_v16 = vld [vmem:[%s1260_s1 + $0x90] sm:$0xff]  }
   0x6   :  { %965 = vmatprep.subr.bf16.mxu1 %v1000_v5  ;;  %v1006_v11 = vld [vmem:[%s1260_s1 + $0xa0] sm:$0xff]   ;;  %v1008_v14 = vld [vmem:[%s1260_s1 + $0x18] sm:$0xff]   ;;  %v1011_v17 = vld [vmem:[%s1260_s1 + $0x10] sm:$0xff]  }
   0x7   :  { %886 = vmatpush3.bf16.msra.mxu0 %v999_v4  ;;  %v1013_v18 = vld [vmem:[%s1260_s1 + $0x48] sm:$0xff]   ;;  %v1016_v21 = vld [vmem:[%s1260_s1 + $0x40] sm:$0xff]   ;;  %v1031_v32 = vld [vmem:[%s1261_s0 + $0x50] ss:$12 sps:$4 sm:$0xff]  }
   0x8   :  { %887 = vmatprep.subr.bf16.mxu0 %v1001_v6  ;;  %v1014_v19 = vld [vmem:[%s1260_s1 + $0x8] sm:$0xff]   ;;  %v1018_v22 = vld [vmem:[%s1260_s1 + $0x80] sm:$0xff]   ;;  %v1029_v34 = vld [vmem:[%s1261_s0 + $0x30] ss:$12 sps:$4 sm:$0xff]  }
   0x9   :  { %966 = vmatpush3.bf16.msra.mxu1 %v1000_v5  ;;  %v1015_v20 = vld [vmem:[%s1260_s1 + $0x88] sm:$0xff]   ;;  %v1021_v23 = vld [vmem:[%s1261_s0 + $0x4] ss:$12 sps:$4 sm:$0xff]   ;;  %v1027_v31 = vld [vmem:[%s1261_s0 + $0x34] ss:$12 sps:$4 sm:$0xff]  }
   0xa   :  { %967 = vmatprep.subr.bf16.mxu1 %v1003_v8  ;;  %v1022_v24 = vld [vmem:[%s1261_s0 + $0x8] ss:$12 sps:$4 sm:$0xff]   ;;  %v1017_v25 = vld [vmem:[%s1260_s1] sm:$0xff]   ;;  %435 = vmatprep.mubr.bf16.mxu0 %v1021_v23  ;;  %v1032_v35 = vld [vmem:[%s1261_s0 + $0x4c] ss:$12 sps:$4 sm:$0xff]  }
   0xb   :  { %888 = vmatpush3.bf16.msra.mxu0 %v1002_v7  ;;  %979 = vmatprep.mubr.bf16.mxu1 %v1022_v24  ;;  %v1019_v26 = vld [vmem:[%s1261_s0] ss:$12 sps:$4 sm:$0xff]   ;;  %v1024_v27 = vld [vmem:[%s1261_s0 + $0x1c] ss:$12 sps:$4 sm:$0xff]   ;;  %v1030_v29 = vld [vmem:[%s1261_s0 + $0x38] ss:$12 sps:$4 sm:$0xff]  }
   0xc   :  { %889 = vmatprep.subr.bf16.mxu0 %v1004_v9  ;;  %v1023_v28 = vld [vmem:[%s1261_s0 + $0x20] ss:$12 sps:$4 sm:$0xff]   ;;  %v1026_v30 = vld [vmem:[%s1261_s0 + $0x18] ss:$12 sps:$4 sm:$0xff]   ;;  %v1038_v33 = vld [vmem:[%s1261_s0 + $0x68] ss:$12 sps:$4 sm:$0xff]  }
   0xd   :  { %968 = vmatpush3.bf16.msra.mxu1 %v1003_v8  ;;  %v1039_v36 = vld [vmem:[%s1261_s0 + $0x80] ss:$12 sps:$4 sm:$0xff]   ;;  %v1046_v37 = vld [vmem:[%s1261_s0 + $0x98] ss:$12 sps:$4 sm:$0xff]   ;;  %v1034_v38 = vld [vmem:[%s1261_s0 + $0x48] ss:$12 sps:$4 sm:$0xff]  }
   0xe   :  { %969 = vmatprep.subr.bf16.mxu1 %v1006_v11  ;;  %v1035_v39 = vld [vmem:[%s1261_s0 + $0x64] ss:$12 sps:$4 sm:$0xff]   ;;  %v1037_v41 = vld [vmem:[%s1261_s0 + $0x60] ss:$12 sps:$4 sm:$0xff]   ;;  %v1040_v42 = vld [vmem:[%s1261_s0 + $0x7c] ss:$12 sps:$4 sm:$0xff]  }
   0xf   :  { %890 = vmatpush3.bf16.msra.mxu0 %v1005_v10  ;;  %v1047_v40 = vld [vmem:[%s1261_s0 + $0xb0] ss:$12 sps:$4 sm:$0xff]   ;;  %v1042_v43 = vld [vmem:[%s1261_s0 + $0x78] ss:$12 sps:$4 sm:$0xff]   ;;  %v1043_v44 = vld [vmem:[%s1261_s0 + $0x94] ss:$12 sps:$4 sm:$0xff]  }
  0x10   :  { %891 = vmatprep.subr.bf16.mxu0 %v1007_v12  ;;  %v1045_v45 = vld [vmem:[%s1261_s0 + $0x90] ss:$12 sps:$4 sm:$0xff]   ;;  %v1048_v46 = vld [vmem:[%s1261_s0 + $0xac] ss:$12 sps:$4 sm:$0xff]   ;;  %v1050_v47 = vld [vmem:[%s1261_s0 + $0xa8] ss:$12 sps:$4 sm:$0xff]  }
  0x11   :  { %970 = vmatpush3.bf16.msra.mxu1 %v1006_v11  ;;  %v1218_v58 = vld [vmem:[%s1262_s2] ss:$0 sm:$0xff] }
  0x12   :  { %971 = vmatprep.subr.bf16.mxu1 %v1009_v13 }
  0x13   :  { %892 = vmatpush3.bf16.msra.mxu0 %v1008_v14 }
  0x14   :  { %893 = vmatprep.subr.bf16.mxu0 %v1010_v15 }
  0x15   :  { %972 = vmatpush3.bf16.msra.mxu1 %v1009_v13 }
  0x16   :  { %973 = vmatprep.subr.bf16.mxu1 %v1012_v16 }
  0x17   :  { %894 = vmatpush3.bf16.msra.mxu0 %v1011_v17 }
  0x18   :  { %895 = vmatprep.subr.bf16.mxu0 %v1013_v18 }
  0x19   :  { %974 = vmatpush3.bf16.msra.mxu1 %v1012_v16 }
  0x1a   :  { %975 = vmatprep.subr.bf16.mxu1 %v1015_v20 }
  0x1b   :  { %896 = vmatpush3.bf16.msra.mxu0 %v1014_v19 }
  0x1c   :  { %897 = vmatprep.subr.bf16.mxu0 %v1016_v21 }
  0x1d   :  { %976 = vmatpush3.bf16.msra.mxu1 %v1015_v20 }
  0x1e   :  { %977 = vmatprep.subr.bf16.mxu1 %v1018_v22 }
  0x1f   :  { %898 = vmatpush3.bf16.msra.mxu0 %v1017_v25 }
  0x21   :  { %978 = vmatpush3.bf16.msra.mxu1 %v1018_v22 }
  0x22   :  { %436 = vmatmul.mubr.bf16.vlgmr.msra.gmra.mxu0 %v1019_v26 }
  0x23   :  { %443 = vmatprep.mubr.bf16.mxu0 %v1024_v27 }
  0x24   :  { %980 = vmatmul.mubr.bf16.vlgmr.msra.gmra.mxu1 %v1023_v28 }
  0x25   :  { %983 = vmatprep.mubr.bf16.mxu1 %v1030_v29 }
  0x2a   :  { %444 = vmatmul.mubr.bf16.gmra.mxu0 %v1026_v30 }
  0x2b   :  { %451 = vmatprep.mubr.bf16.mxu0 %v1027_v31 }
  0x2c   :  { %984 = vmatmul.mubr.bf16.gmra.mxu1 %v1031_v32 }
  0x2d   :  { %987 = vmatprep.mubr.bf16.mxu1 %v1038_v33 }
  0x32   :  { %452 = vmatmul.mubr.bf16.gmra.mxu0 %v1029_v34 }
  0x33   :  { %459 = vmatprep.mubr.bf16.mxu0 %v1032_v35 }
  0x34   :  { %988 = vmatmul.mubr.bf16.gmra.mxu1 %v1039_v36 }
  0x35   :  { %991 = vmatprep.mubr.bf16.mxu1 %v1046_v37 }
  0x3a   :  { %460 = vmatmul.mubr.bf16.gmra.mxu0 %v1034_v38 }
  0x3b   :  { %467 = vmatprep.mubr.bf16.mxu0 %v1035_v39 }
  0x3c   :  { %992 = vmatmul.mubr.bf16.gmra.mxu1 %v1047_v40 }
  0x42   :  { %468 = vmatmul.mubr.bf16.gmra.mxu0 %v1037_v41 }
  0x43   :  { %475 = vmatprep.mubr.bf16.mxu0 %v1040_v42 }
  0x4a   :  { %476 = vmatmul.mubr.bf16.gmra.mxu0 %v1042_v43 }
  0x4b   :  { %483 = vmatprep.mubr.bf16.mxu0 %v1043_v44 }
  0x52   :  { %484 = vmatmul.mubr.bf16.gmra.mxu0 %v1045_v45 }
  0x53   :  { %491 = vmatprep.mubr.bf16.mxu0 %v1048_v46 }
  0x5a   :  { %492 = vmatmul.mubr.bf16.gmra.mxu0 %v1050_v47 }
  0xe2   :  { %v899_v48 = vpop.f32.mrf.mxu0 }
  0xe4   :  { %v900_v49 = vpop.f32.mrf.mxu0  ;;  %v981_v50 = vpop.f32.mrf.mxu1 }
  0xe5   :  { %v901_v51 = vadd.f32 %v900_v49, %v899_v48 }
  0xe6   :  { %v902_v52 = vpop.f32.mrf.mxu0  ;;  %v534_v53 = vpop.f32.mrf.mxu1 }
  0xe7   :  { %v535_v56 = vadd.f32 %v901_v51, %v534_v53 }
  0xe8   :  { %v903_v54 = vpop.f32.mrf.mxu0  ;;  %v982_v55 = vpop.f32.mrf.mxu1 }
  0xe9   :  { %v904_v57 = vadd.f32 %v903_v54, %v902_v52  ;;  %v655_v0 = vadd.f32 %v1218_v58, %v535_v56 }
  0xea   :  { %v905_v59 = vpop.f32.mrf.mxu0  ;;  %v537_v60 = vpop.f32.mrf.mxu1 }
  0xeb   :  { %v538_v61 = vadd.f32 %v904_v57, %v537_v60 }
  0xec   :  { %v906_v62 = vpop.f32.mrf.mxu0  ;;  %v985_v63 = vpop.f32.mrf.mxu1 }
  0xed   :  { %v656_v1 = vadd.f32 %v1218_v58, %v538_v61  ;;  %v907_v2 = vadd.f32 %v906_v62, %v905_v59 }
  0xee   :  { %v908_v3 = vpop.f32.mrf.mxu0  ;;  %v550_v6 = vpop.f32.mrf.mxu1 }
  0xef   :  { %v839_v4 = vpack.c.bf16 %v656_v1, %v655_v0  ;;  %v543_v7 = vadd.f32 %v981_v50, %v907_v2 }
  0xf0   :  { %v909_v5 = vpop.f32.mrf.mxu0  ;;  %v986_v12 = vpop.f32.mrf.mxu1 }
  0xf1   :  { %840 = vst [vmem:[%s1263_s3] sm:$0xff] %v839_v4   ;;  %v910_v8 = vadd.f32 %v909_v5, %v908_v3  ;;  %v657_v13 = vadd.f32 %v1218_v58, %v543_v7 }
  0xf2   :  { %v911_v9 = vpop.f32.mrf.mxu0  ;;  %v553_v19 = vpop.f32.mrf.mxu1 }
  0xf3   :  { %v546_v10 = vadd.f32 %v982_v55, %v910_v8 }
  0xf4   :  { %v912_v11 = vpop.f32.mrf.mxu0  ;;  %v989_v25 = vpop.f32.mrf.mxu1 }
  0xf5   :  { %v658_v14 = vadd.f32 %v1218_v58, %v546_v10  ;;  %v913_v15 = vadd.f32 %v912_v11, %v911_v9 }
  0xf6   :  { %v914_v16 = vpop.f32.mrf.mxu0  ;;  %v566_v32 = vpop.f32.mrf.mxu1 }
  0xf7   :  { %v844_v17 = vpack.c.bf16 %v658_v14, %v657_v13  ;;  %v551_v20 = vadd.f32 %v913_v15, %v550_v6 }
  0xf8   :  { %v915_v18 = vpop.f32.mrf.mxu0  ;;  %v990_v38 = vpop.f32.mrf.mxu1 }
  0xf9   :  { %876 = vst [vmem:[%s1263_s3 + $0x8] sm:$0xff] %v844_v17   ;;  %v916_v21 = vadd.f32 %v915_v18, %v914_v16  ;;  %v659_v26 = vadd.f32 %v1218_v58, %v551_v20 }
  0xfa   :  { %v917_v22 = vpop.f32.mrf.mxu0  ;;  %v569_v45 = vpop.f32.mrf.mxu1 }
  0xfb   :  { %v554_v23 = vadd.f32 %v916_v21, %v553_v19 }
  0xfc   :  { %v918_v24 = vpop.f32.mrf.mxu0  ;;  %v993_v51 = vpop.f32.mrf.mxu1 }
  0xfd   :  { %v660_v27 = vadd.f32 %v1218_v58, %v554_v23  ;;  %v919_v28 = vadd.f32 %v918_v24, %v917_v22 }
  0xfe   :  { %v920_v29 = vpop.f32.mrf.mxu0  ;;  %v582_v59 = vpop.f32.mrf.mxu1 }
  0xff   :  { %v849_v30 = vpack.c.bf16 %v660_v27, %v659_v26  ;;  %v559_v33 = vadd.f32 %v985_v63, %v919_v28 }
 0x100   :  { %v921_v31 = vpop.f32.mrf.mxu0  ;;  %v994_v1 = vpop.f32.mrf.mxu1 }
 0x101   :  { %877 = vst [vmem:[%s1263_s3 + $0x10] sm:$0xff] %v849_v30   ;;  %v922_v34 = vadd.f32 %v921_v31, %v920_v29  ;;  %v661_v39 = vadd.f32 %v1218_v58, %v559_v33 }
 0x102   :  { %v923_v35 = vpop.f32.mrf.mxu0  ;;  %v585_v8 = vpop.f32.mrf.mxu1 }
 0x103   :  { %v562_v36 = vadd.f32 %v986_v12, %v922_v34 }
 0x104   :  { %v924_v37 = vpop.f32.mrf.mxu0 }
 0x105   :  { %v662_v40 = vadd.f32 %v1218_v58, %v562_v36  ;;  %v925_v41 = vadd.f32 %v924_v37, %v923_v35 }
 0x106   :  { %v926_v42 = vpop.f32.mrf.mxu0 }
 0x107   :  { %v854_v43 = vpack.c.bf16 %v662_v40, %v661_v39  ;;  %v567_v46 = vadd.f32 %v925_v41, %v566_v32 }
 0x108   :  { %v927_v44 = vpop.f32.mrf.mxu0 }
 0x109   :  { %878 = vst [vmem:[%s1263_s3 + $0x18] sm:$0xff] %v854_v43   ;;  %v928_v47 = vadd.f32 %v927_v44, %v926_v42  ;;  %v663_v52 = vadd.f32 %v1218_v58, %v567_v46 }
 0x10a   :  { %v929_v48 = vpop.f32.mrf.mxu0 }
 0x10b   :  { %v570_v49 = vadd.f32 %v928_v47, %v569_v45 }
 0x10c   :  { %v930_v50 = vpop.f32.mrf.mxu0 }
 0x10d   :  { %v664_v53 = vadd.f32 %v1218_v58, %v570_v49  ;;  %v931_v54 = vadd.f32 %v930_v50, %v929_v48 }
 0x10e   :  { %v932_v55 = vpop.f32.mrf.mxu0 }
 0x10f   :  { %v859_v56 = vpack.c.bf16 %v664_v53, %v663_v52  ;;  %v575_v60 = vadd.f32 %v989_v25, %v931_v54 }
 0x110   :  { %v933_v57 = vpop.f32.mrf.mxu0 }
 0x111   :  { %879 = vst [vmem:[%s1263_s3 + $0x20] sm:$0xff] %v859_v56   ;;  %v934_v61 = vadd.f32 %v933_v57, %v932_v55  ;;  %v665_v2 = vadd.f32 %v1218_v58, %v575_v60 }
 0x112   :  { %v935_v62 = vpop.f32.mrf.mxu0 }
 0x113   :  { %v578_v63 = vadd.f32 %v990_v38, %v934_v61 }
 0x114   :  { %v936_v0 = vpop.f32.mrf.mxu0 }
 0x115   :  { %v666_v3 = vadd.f32 %v1218_v58, %v578_v63  ;;  %v937_v4 = vadd.f32 %v936_v0, %v935_v62 }
 0x116   :  { %v938_v5 = vpop.f32.mrf.mxu0 }
 0x117   :  { %v864_v6 = vpack.c.bf16 %v666_v3, %v665_v2  ;;  %v583_v9 = vadd.f32 %v937_v4, %v582_v59 }
 0x118   :  { %v939_v7 = vpop.f32.mrf.mxu0 }
 0x119   :  { %880 = vst [vmem:[%s1263_s3 + $0x28] sm:$0xff] %v864_v6   ;;  %v940_v10 = vadd.f32 %v939_v7, %v938_v5  ;;  %v667_v14 = vadd.f32 %v1218_v58, %v583_v9 }
 0x11a   :  { %v941_v11 = vpop.f32.mrf.mxu0 }
 0x11b   :  { %v586_v12 = vadd.f32 %v940_v10, %v585_v8 }
 0x11c   :  { %v942_v13 = vpop.f32.mrf.mxu0 }
 0x11d   :  { %v668_v15 = vadd.f32 %v1218_v58, %v586_v12  ;;  %v943_v16 = vadd.f32 %v942_v13, %v941_v11 }
 0x11e   :  { %v944_v17 = vpop.f32.mrf.mxu0 }
 0x11f   :  { %v869_v18 = vpack.c.bf16 %v668_v15, %v667_v14  ;;  %v591_v20 = vadd.f32 %v993_v51, %v943_v16 }
 0x120   :  { %v945_v19 = vpop.f32.mrf.mxu0 }
 0x121   :  { %881 = vst [vmem:[%s1263_s3 + $0x30] sm:$0xff] %v869_v18   ;;  %v946_v21 = vadd.f32 %v945_v19, %v944_v17  ;;  %v669_v23 = vadd.f32 %v1218_v58, %v591_v20 }
 0x123   :  { %v594_v22 = vadd.f32 %v994_v1, %v946_v21 }
 0x125   :  { %v670_v24 = vadd.f32 %v1218_v58, %v594_v22 }
 0x127   :  { %v874_v25 = vpack.c.bf16 %v670_v24, %v669_v23 }
 0x129   :  { %882 = vst [vmem:[%s1263_s3 + $0x38] sm:$0xff] %v874_v25  }

// kernel: data_generator_img.32
= control target key start
LH: loop header
LB: loop body
LE: loop exit
PB: predicated region body
PF: predicated region fallthrough
CT: control target
= control target key end

     0   :  { %8 = vsyncpa [#allocation4], 0  ;;  %s1271_s0 = inlined_call_operand.vmem [shape: bf16[128,384], index: 0, kind: input, shape index: {}]   ;;  %s1272_s1 = inlined_call_operand.hbm [shape: bf16[384,128], index: 1, kind: input, shape index: {}]   ;;  %s1273_s2 = inlined_call_operand.hbm [shape: f32[1,128], index: 2, kind: input, shape index: {}]   ;;  %s1274_s3 = inlined_call_operand.vmem [shape: bf16[128,128], index: 3, kind: output, shape index: {}]  }
   0x1   :  { %9 = vsyncpa [#allocation6], 0  ;;  %s1127_s12 = smov [#allocation3]  }
   0x2   :  { %s17_s13 = sshll.u32 %s1127_s12, 4  ;;  %s18_s13 = int_to_ptr.vmem [resolvable:$true] %s17_s13 }
   0x3   :  { %s1091_s14 = scalar_lea.vmem %s18_s13, 3072  ;;  %p1096_p1 = scmp.lt.s32.totalorder %s18_s13, %s18_s13 }
   0x4   :  { %p1092_p0 = scmp.ne.s32.totalorder %s18_s13, %s1091_s14  ;;  %p1097_p2 = scmp.lt.s32.totalorder %s1091_s14, %s1091_s14 }
   0x6   :  { %p1098_p3 = por %p1097_p2, %p1096_p1 }
   0x8   :  { %p1099_p4 = pnand %p1098_p3, %p1092_p0 }
   0xa   :  { %1102 = shalt.err (!%p1099_p4)
}
   0xb   :  { %s1128_s15 = smov 64   ;;  %s1129_s16 = smov 4  }
   0xc   :  { %23 = dma.hbm_to_vmem [thread:$0]  %s1272_s1, 3072, %s18_s13, [#allocation4], %s1128_s15, %s1128_s15, %s1129_s16  }
   0xd   :  { %s1130_s19 = smov [#allocation5]  }
   0xe   :  { %s30_s20 = sshll.u32 %s1130_s19, 4  ;;  %s31_s20 = int_to_ptr.vmem [resolvable:$true] %s30_s20 }
   0xf   :  { %s1111_s21 = scalar_lea.vmem %s31_s20, 16  ;;  %s1115_s22 = scalar_lea.vmem %s31_s20, 32 }
  0x10   :  { %p1112_p5 = scmp.ne.s32.totalorder %s31_s20, %s1111_s21  ;;  %p1116_p6 = scmp.lt.s32.totalorder %s31_s20, %s31_s20 }
  0x11   :  { %p1117_p7 = scmp.lt.s32.totalorder %s1115_s22, %s1111_s21 }
  0x13   :  { %p1118_p8 = por %p1117_p7, %p1116_p6 }
  0x15   :  { %p1119_p9 = pnand %p1118_p8, %p1112_p5 }
  0x17   :  { %1122 = shalt.err (!%p1119_p9)
}
  0x18   :  { %33 = dma.hbm_to_vmem [thread:$0]  %s1273_s2, 16, %s31_s20, [#allocation6]  }
  0x19   :  { %1123 = dma.done.wait [#allocation4], 3072  }
  0x1a   :  { %1124 = vsyncadd [#allocation4], 4294964224 }
  0x1b   :  { %1125 = dma.done.wait [#allocation6], 16  }
  0x1c   :  { %1126 = vsyncadd [#allocation6], 4294967280  ;;  %v1027_v0 = vld [vmem:[#allocation3 + $0x78] sm:$0xff]   ;;  %v1030_v3 = vld [vmem:[#allocation3 + $0x70] sm:$0xff]  }
  0x1d   :  { %v1028_v1 = vld [vmem:[#allocation3 + $0x38] sm:$0xff]   ;;  %911 = vmatprep.subr.bf16.mxu0 %v1027_v0  ;;  %v1031_v4 = vld [vmem:[#allocation3 + $0x30] sm:$0xff]   ;;  %v1033_v6 = vld [vmem:[#allocation3 + $0x68] sm:$0xff]  }
  0x1e   :  { %v1029_v2 = vld [vmem:[#allocation3 + $0xb8] sm:$0xff]   ;;  %912 = vmatpush3.bf16.msra.mxu0 %v1028_v1  ;;  %v1032_v5 = vld [vmem:[#allocation3 + $0xb0] sm:$0xff]   ;;  %v1034_v7 = vld [vmem:[#allocation3 + $0x28] sm:$0xff]  }
  0x1f   :  { %991 = vmatprep.subr.bf16.mxu1 %v1029_v2  ;;  %913 = vmatprep.subr.bf16.mxu0 %v1030_v3  ;;  %v1035_v8 = vld [vmem:[#allocation3 + $0xa8] sm:$0xff]   ;;  %v1036_v9 = vld [vmem:[#allocation3 + $0x60] sm:$0xff]   ;;  %v1039_v12 = vld [vmem:[#allocation3 + $0x58] sm:$0xff]  }
  0x20   :  { %992 = vmatpush3.bf16.msra.mxu1 %v1029_v2  ;;  %v1037_v10 = vld [vmem:[#allocation3 + $0x20] sm:$0xff]   ;;  %v1041_v13 = vld [vmem:[#allocation3 + $0x98] sm:$0xff]   ;;  %v1042_v15 = vld [vmem:[#allocation3 + $0x50] sm:$0xff]  }
  0x21   :  { %993 = vmatprep.subr.bf16.mxu1 %v1032_v5  ;;  %v1038_v11 = vld [vmem:[#allocation3 + $0xa0] sm:$0xff]   ;;  %v1040_v14 = vld [vmem:[#allocation3 + $0x18] sm:$0xff]   ;;  %v1044_v16 = vld [vmem:[#allocation3 + $0x90] sm:$0xff]  }
  0x22   :  { %914 = vmatpush3.bf16.msra.mxu0 %v1031_v4  ;;  %v1043_v17 = vld [vmem:[#allocation3 + $0x10] sm:$0xff]   ;;  %v1045_v18 = vld [vmem:[#allocation3 + $0x48] sm:$0xff]   ;;  %v1048_v21 = vld [vmem:[#allocation3 + $0x40] sm:$0xff]  }
  0x23   :  { %915 = vmatprep.subr.bf16.mxu0 %v1033_v6  ;;  %v1046_v19 = vld [vmem:[#allocation3 + $0x8] sm:$0xff]   ;;  %v1050_v22 = vld [vmem:[#allocation3 + $0x80] sm:$0xff]   ;;  %v1063_v32 = vld [vmem:[%s1271_s0 + $0x50] ss:$12 sps:$4 sm:$0xff]  }
  0x24   :  { %994 = vmatpush3.bf16.msra.mxu1 %v1032_v5  ;;  %v1047_v20 = vld [vmem:[#allocation3 + $0x88] sm:$0xff]   ;;  %v1053_v23 = vld [vmem:[%s1271_s0 + $0x4] ss:$12 sps:$4 sm:$0xff]   ;;  %v1059_v31 = vld [vmem:[%s1271_s0 + $0x34] ss:$12 sps:$4 sm:$0xff]  }
  0x25   :  { %995 = vmatprep.subr.bf16.mxu1 %v1035_v8  ;;  %v1054_v24 = vld [vmem:[%s1271_s0 + $0x8] ss:$12 sps:$4 sm:$0xff]   ;;  %v1049_v25 = vld [vmem:[#allocation3] sm:$0xff]   ;;  %461 = vmatprep.mubr.bf16.mxu0 %v1053_v23  ;;  %v1061_v34 = vld [vmem:[%s1271_s0 + $0x30] ss:$12 sps:$4 sm:$0xff]  }
  0x26   :  { %916 = vmatpush3.bf16.msra.mxu0 %v1034_v7  ;;  %1007 = vmatprep.mubr.bf16.mxu1 %v1054_v24  ;;  %v1051_v26 = vld [vmem:[%s1271_s0] ss:$12 sps:$4 sm:$0xff]   ;;  %v1056_v27 = vld [vmem:[%s1271_s0 + $0x1c] ss:$12 sps:$4 sm:$0xff]   ;;  %v1062_v29 = vld [vmem:[%s1271_s0 + $0x38] ss:$12 sps:$4 sm:$0xff]  }
  0x27   :  { %917 = vmatprep.subr.bf16.mxu0 %v1036_v9  ;;  %v1055_v28 = vld [vmem:[%s1271_s0 + $0x20] ss:$12 sps:$4 sm:$0xff]   ;;  %v1058_v30 = vld [vmem:[%s1271_s0 + $0x18] ss:$12 sps:$4 sm:$0xff]   ;;  %v1070_v33 = vld [vmem:[%s1271_s0 + $0x68] ss:$12 sps:$4 sm:$0xff]  }
  0x28   :  { %996 = vmatpush3.bf16.msra.mxu1 %v1035_v8  ;;  %v1064_v35 = vld [vmem:[%s1271_s0 + $0x4c] ss:$12 sps:$4 sm:$0xff]   ;;  %v1066_v38 = vld [vmem:[%s1271_s0 + $0x48] ss:$12 sps:$4 sm:$0xff]   ;;  %v1067_v39 = vld [vmem:[%s1271_s0 + $0x64] ss:$12 sps:$4 sm:$0xff]  }
  0x29   :  { %997 = vmatprep.subr.bf16.mxu1 %v1038_v11  ;;  %v1071_v36 = vld [vmem:[%s1271_s0 + $0x80] ss:$12 sps:$4 sm:$0xff]   ;;  %v1078_v37 = vld [vmem:[%s1271_s0 + $0x98] ss:$12 sps:$4 sm:$0xff]   ;;  %v1079_v40 = vld [vmem:[%s1271_s0 + $0xb0] ss:$12 sps:$4 sm:$0xff]  }
  0x2a   :  { %918 = vmatpush3.bf16.msra.mxu0 %v1037_v10  ;;  %v1069_v41 = vld [vmem:[%s1271_s0 + $0x60] ss:$12 sps:$4 sm:$0xff]   ;;  %v1072_v42 = vld [vmem:[%s1271_s0 + $0x7c] ss:$12 sps:$4 sm:$0xff]   ;;  %v1074_v43 = vld [vmem:[%s1271_s0 + $0x78] ss:$12 sps:$4 sm:$0xff]  }
  0x2b   :  { %919 = vmatprep.subr.bf16.mxu0 %v1039_v12  ;;  %v1075_v44 = vld [vmem:[%s1271_s0 + $0x94] ss:$12 sps:$4 sm:$0xff]   ;;  %v1077_v45 = vld [vmem:[%s1271_s0 + $0x90] ss:$12 sps:$4 sm:$0xff]   ;;  %v1080_v46 = vld [vmem:[%s1271_s0 + $0xac] ss:$12 sps:$4 sm:$0xff]  }
  0x2c   :  { %998 = vmatpush3.bf16.msra.mxu1 %v1038_v11  ;;  %v1082_v47 = vld [vmem:[%s1271_s0 + $0xa8] ss:$12 sps:$4 sm:$0xff]   ;;  %v1229_v58 = vld [vmem:[#allocation5] ss:$0 sm:$0xff] }
  0x2d   :  { %999 = vmatprep.subr.bf16.mxu1 %v1041_v13 }
  0x2e   :  { %920 = vmatpush3.bf16.msra.mxu0 %v1040_v14 }
  0x2f   :  { %921 = vmatprep.subr.bf16.mxu0 %v1042_v15 }
  0x30   :  { %1000 = vmatpush3.bf16.msra.mxu1 %v1041_v13 }
  0x31   :  { %1001 = vmatprep.subr.bf16.mxu1 %v1044_v16 }
  0x32   :  { %922 = vmatpush3.bf16.msra.mxu0 %v1043_v17 }
  0x33   :  { %923 = vmatprep.subr.bf16.mxu0 %v1045_v18 }
  0x34   :  { %1002 = vmatpush3.bf16.msra.mxu1 %v1044_v16 }
  0x35   :  { %1003 = vmatprep.subr.bf16.mxu1 %v1047_v20 }
  0x36   :  { %924 = vmatpush3.bf16.msra.mxu0 %v1046_v19 }
  0x37   :  { %925 = vmatprep.subr.bf16.mxu0 %v1048_v21 }
  0x38   :  { %1004 = vmatpush3.bf16.msra.mxu1 %v1047_v20 }
  0x39   :  { %1005 = vmatprep.subr.bf16.mxu1 %v1050_v22 }
  0x3a   :  { %926 = vmatpush3.bf16.msra.mxu0 %v1049_v25 }
  0x3c   :  { %1006 = vmatpush3.bf16.msra.mxu1 %v1050_v22 }
  0x3d   :  { %462 = vmatmul.mubr.bf16.vlgmr.msra.gmra.mxu0 %v1051_v26 }
  0x3e   :  { %469 = vmatprep.mubr.bf16.mxu0 %v1056_v27 }
  0x3f   :  { %1008 = vmatmul.mubr.bf16.vlgmr.msra.gmra.mxu1 %v1055_v28 }
  0x40   :  { %1011 = vmatprep.mubr.bf16.mxu1 %v1062_v29 }
  0x45   :  { %470 = vmatmul.mubr.bf16.gmra.mxu0 %v1058_v30 }
  0x46   :  { %477 = vmatprep.mubr.bf16.mxu0 %v1059_v31 }
  0x47   :  { %1012 = vmatmul.mubr.bf16.gmra.mxu1 %v1063_v32 }
  0x48   :  { %1015 = vmatprep.mubr.bf16.mxu1 %v1070_v33 }
  0x4d   :  { %478 = vmatmul.mubr.bf16.gmra.mxu0 %v1061_v34 }
  0x4e   :  { %485 = vmatprep.mubr.bf16.mxu0 %v1064_v35 }
  0x4f   :  { %1016 = vmatmul.mubr.bf16.gmra.mxu1 %v1071_v36 }
  0x50   :  { %1019 = vmatprep.mubr.bf16.mxu1 %v1078_v37 }
  0x55   :  { %486 = vmatmul.mubr.bf16.gmra.mxu0 %v1066_v38 }
  0x56   :  { %493 = vmatprep.mubr.bf16.mxu0 %v1067_v39 }
  0x57   :  { %1020 = vmatmul.mubr.bf16.gmra.mxu1 %v1079_v40 }
  0x5d   :  { %494 = vmatmul.mubr.bf16.gmra.mxu0 %v1069_v41 }
  0x5e   :  { %501 = vmatprep.mubr.bf16.mxu0 %v1072_v42 }
  0x65   :  { %502 = vmatmul.mubr.bf16.gmra.mxu0 %v1074_v43 }
  0x66   :  { %509 = vmatprep.mubr.bf16.mxu0 %v1075_v44 }
  0x6d   :  { %510 = vmatmul.mubr.bf16.gmra.mxu0 %v1077_v45 }
  0x6e   :  { %517 = vmatprep.mubr.bf16.mxu0 %v1080_v46 }
  0x75   :  { %518 = vmatmul.mubr.bf16.gmra.mxu0 %v1082_v47 }
  0xfd   :  { %v927_v48 = vpop.f32.mrf.mxu0 }
  0xff   :  { %v928_v49 = vpop.f32.mrf.mxu0  ;;  %v1009_v50 = vpop.f32.mrf.mxu1 }
 0x100   :  { %v929_v51 = vadd.f32 %v928_v49, %v927_v48 }
 0x101   :  { %v930_v52 = vpop.f32.mrf.mxu0  ;;  %v560_v53 = vpop.f32.mrf.mxu1 }
 0x102   :  { %v561_v56 = vadd.f32 %v929_v51, %v560_v53 }
 0x103   :  { %v931_v54 = vpop.f32.mrf.mxu0  ;;  %v1010_v55 = vpop.f32.mrf.mxu1 }
 0x104   :  { %v932_v57 = vadd.f32 %v931_v54, %v930_v52  ;;  %v681_v0 = vadd.f32 %v1229_v58, %v561_v56 }
 0x105   :  { %v933_v59 = vpop.f32.mrf.mxu0  ;;  %v563_v60 = vpop.f32.mrf.mxu1 }
 0x106   :  { %v564_v61 = vadd.f32 %v932_v57, %v563_v60 }
 0x107   :  { %v934_v62 = vpop.f32.mrf.mxu0  ;;  %v1013_v63 = vpop.f32.mrf.mxu1 }
 0x108   :  { %v682_v1 = vadd.f32 %v1229_v58, %v564_v61  ;;  %v935_v2 = vadd.f32 %v934_v62, %v933_v59 }
 0x109   :  { %v936_v3 = vpop.f32.mrf.mxu0  ;;  %v576_v6 = vpop.f32.mrf.mxu1 }
 0x10a   :  { %v867_v4 = vpack.c.bf16 %v682_v1, %v681_v0  ;;  %v569_v7 = vadd.f32 %v1009_v50, %v935_v2 }
 0x10b   :  { %v937_v5 = vpop.f32.mrf.mxu0  ;;  %v1014_v12 = vpop.f32.mrf.mxu1 }
 0x10c   :  { %868 = vst [vmem:[%s1274_s3] sm:$0xff] %v867_v4   ;;  %v938_v8 = vadd.f32 %v937_v5, %v936_v3  ;;  %v683_v13 = vadd.f32 %v1229_v58, %v569_v7 }
 0x10d   :  { %v939_v9 = vpop.f32.mrf.mxu0  ;;  %v579_v19 = vpop.f32.mrf.mxu1 }
 0x10e   :  { %v572_v10 = vadd.f32 %v1010_v55, %v938_v8 }
 0x10f   :  { %v940_v11 = vpop.f32.mrf.mxu0  ;;  %v1017_v25 = vpop.f32.mrf.mxu1 }
 0x110   :  { %v684_v14 = vadd.f32 %v1229_v58, %v572_v10  ;;  %v941_v15 = vadd.f32 %v940_v11, %v939_v9 }
 0x111   :  { %v942_v16 = vpop.f32.mrf.mxu0  ;;  %v592_v32 = vpop.f32.mrf.mxu1 }
 0x112   :  { %v872_v17 = vpack.c.bf16 %v684_v14, %v683_v13  ;;  %v577_v20 = vadd.f32 %v941_v15, %v576_v6 }
 0x113   :  { %v943_v18 = vpop.f32.mrf.mxu0  ;;  %v1018_v38 = vpop.f32.mrf.mxu1 }
 0x114   :  { %904 = vst [vmem:[%s1274_s3 + $0x8] sm:$0xff] %v872_v17   ;;  %v944_v21 = vadd.f32 %v943_v18, %v942_v16  ;;  %v685_v26 = vadd.f32 %v1229_v58, %v577_v20 }
 0x115   :  { %v945_v22 = vpop.f32.mrf.mxu0  ;;  %v595_v45 = vpop.f32.mrf.mxu1 }
 0x116   :  { %v580_v23 = vadd.f32 %v944_v21, %v579_v19 }
 0x117   :  { %v946_v24 = vpop.f32.mrf.mxu0  ;;  %v1021_v51 = vpop.f32.mrf.mxu1 }
 0x118   :  { %v686_v27 = vadd.f32 %v1229_v58, %v580_v23  ;;  %v947_v28 = vadd.f32 %v946_v24, %v945_v22 }
 0x119   :  { %v948_v29 = vpop.f32.mrf.mxu0  ;;  %v608_v59 = vpop.f32.mrf.mxu1 }
 0x11a   :  { %v877_v30 = vpack.c.bf16 %v686_v27, %v685_v26  ;;  %v585_v33 = vadd.f32 %v1013_v63, %v947_v28 }
 0x11b   :  { %v949_v31 = vpop.f32.mrf.mxu0  ;;  %v1022_v1 = vpop.f32.mrf.mxu1 }
 0x11c   :  { %905 = vst [vmem:[%s1274_s3 + $0x10] sm:$0xff] %v877_v30   ;;  %v950_v34 = vadd.f32 %v949_v31, %v948_v29  ;;  %v687_v39 = vadd.f32 %v1229_v58, %v585_v33 }
 0x11d   :  { %v951_v35 = vpop.f32.mrf.mxu0  ;;  %v611_v8 = vpop.f32.mrf.mxu1 }
 0x11e   :  { %v588_v36 = vadd.f32 %v1014_v12, %v950_v34 }
 0x11f   :  { %v952_v37 = vpop.f32.mrf.mxu0 }
 0x120   :  { %v688_v40 = vadd.f32 %v1229_v58, %v588_v36  ;;  %v953_v41 = vadd.f32 %v952_v37, %v951_v35 }
 0x121   :  { %v954_v42 = vpop.f32.mrf.mxu0 }
 0x122   :  { %v882_v43 = vpack.c.bf16 %v688_v40, %v687_v39  ;;  %v593_v46 = vadd.f32 %v953_v41, %v592_v32 }
 0x123   :  { %v955_v44 = vpop.f32.mrf.mxu0 }
 0x124   :  { %906 = vst [vmem:[%s1274_s3 + $0x18] sm:$0xff] %v882_v43   ;;  %v956_v47 = vadd.f32 %v955_v44, %v954_v42  ;;  %v689_v52 = vadd.f32 %v1229_v58, %v593_v46 }
 0x125   :  { %v957_v48 = vpop.f32.mrf.mxu0 }
 0x126   :  { %v596_v49 = vadd.f32 %v956_v47, %v595_v45 }
 0x127   :  { %v958_v50 = vpop.f32.mrf.mxu0 }
 0x128   :  { %v690_v53 = vadd.f32 %v1229_v58, %v596_v49  ;;  %v959_v54 = vadd.f32 %v958_v50, %v957_v48 }
 0x129   :  { %v960_v55 = vpop.f32.mrf.mxu0 }
 0x12a   :  { %v887_v56 = vpack.c.bf16 %v690_v53, %v689_v52  ;;  %v601_v60 = vadd.f32 %v1017_v25, %v959_v54 }
 0x12b   :  { %v961_v57 = vpop.f32.mrf.mxu0 }
 0x12c   :  { %907 = vst [vmem:[%s1274_s3 + $0x20] sm:$0xff] %v887_v56   ;;  %v962_v61 = vadd.f32 %v961_v57, %v960_v55  ;;  %v691_v2 = vadd.f32 %v1229_v58, %v601_v60 }
 0x12d   :  { %v963_v62 = vpop.f32.mrf.mxu0 }
 0x12e   :  { %v604_v63 = vadd.f32 %v1018_v38, %v962_v61 }
 0x12f   :  { %v964_v0 = vpop.f32.mrf.mxu0 }
 0x130   :  { %v692_v3 = vadd.f32 %v1229_v58, %v604_v63  ;;  %v965_v4 = vadd.f32 %v964_v0, %v963_v62 }
 0x131   :  { %v966_v5 = vpop.f32.mrf.mxu0 }
 0x132   :  { %v892_v6 = vpack.c.bf16 %v692_v3, %v691_v2  ;;  %v609_v9 = vadd.f32 %v965_v4, %v608_v59 }
 0x133   :  { %v967_v7 = vpop.f32.mrf.mxu0 }
 0x134   :  { %908 = vst [vmem:[%s1274_s3 + $0x28] sm:$0xff] %v892_v6   ;;  %v968_v10 = vadd.f32 %v967_v7, %v966_v5  ;;  %v693_v14 = vadd.f32 %v1229_v58, %v609_v9 }
 0x135   :  { %v969_v11 = vpop.f32.mrf.mxu0 }
 0x136   :  { %v612_v12 = vadd.f32 %v968_v10, %v611_v8 }
 0x137   :  { %v970_v13 = vpop.f32.mrf.mxu0 }
 0x138   :  { %v694_v15 = vadd.f32 %v1229_v58, %v612_v12  ;;  %v971_v16 = vadd.f32 %v970_v13, %v969_v11 }
 0x139   :  { %v972_v17 = vpop.f32.mrf.mxu0 }
 0x13a   :  { %v897_v18 = vpack.c.bf16 %v694_v15, %v693_v14  ;;  %v617_v20 = vadd.f32 %v1021_v51, %v971_v16 }
 0x13b   :  { %v973_v19 = vpop.f32.mrf.mxu0 }
 0x13c   :  { %909 = vst [vmem:[%s1274_s3 + $0x30] sm:$0xff] %v897_v18   ;;  %v974_v21 = vadd.f32 %v973_v19, %v972_v17  ;;  %v695_v23 = vadd.f32 %v1229_v58, %v617_v20 }
 0x13e   :  { %v620_v22 = vadd.f32 %v1022_v1, %v974_v21 }
 0x140   :  { %v696_v24 = vadd.f32 %v1229_v58, %v620_v22 }
 0x142   :  { %v902_v25 = vpack.c.bf16 %v696_v24, %v695_v23 }
 0x144   :  { %910 = vst [vmem:[%s1274_s3 + $0x38] sm:$0xff] %v902_v25  }
 0x145   :  { %781 = vsyncpa [#allocation4], 1 }
 0x146   :  { %782 = vsyncpa [#allocation6], 1 }

// kernel: data_generator_img.33
= control target key start
LH: loop header
LB: loop body
LE: loop exit
PB: predicated region body
PF: predicated region fallthrough
CT: control target
= control target key end

     0   :  { %s1827_s21 = smov 0   ;;  %s1829_s22 = smov 0   ;;  %s2075_s0 = inlined_call_operand.vmem [shape: bf16[512,128], index: 0, kind: input, shape index: {}]   ;;  %s2076_s1 = inlined_call_operand.vmem [shape: bf16[128,128], index: 1, kind: input, shape index: {}]   ;;  %s2077_s2 = inlined_call_operand.vmem [shape: f32[1,128], index: 2, kind: input, shape index: {}]   ;;  %s2078_s3 = inlined_call_operand.vmem [shape: f32[1,128], index: 3, kind: input, shape index: {}]   ;;  %s2079_s4 = inlined_call_operand.vmem [shape: f32[1,128], index: 4, kind: input, shape index: {}]   ;;  %s2080_s5 = inlined_call_operand.vmem [shape: f32[1,128], index: 5, kind: input, shape index: {}]   ;;  %s2081_s6 = inlined_call_operand.vmem [shape: bf16[512,128], index: 6, kind: output, shape index: {}]  }
   0x1   :  { %s1831_s23 = smov 0  }
   0x2 LB: > { %s35_s24 = sadd.s32 1, %s1786_s22  ;;  %p1391_p0 = scmp.ge.s32.totalorder %s1790_s23, 1  ;;  %s1790_s23 = sphi %s1831_s23, %s16_s23   ;;  %s1786_s22 = sphi %s1829_s22, %s2083_s22   ;;  %s1782_s21 = sphi %s1827_s21, %s2082_s21  }
   0x3   : > { %p37_p1 = scmp.ge.s32.totalorder %s35_s24, 2  ;;  %p287_p2 = scmp.lt.s32.totalorder %s1790_s23, 3 }
   0x5   : > { %s2085_s24 = smov (%p37_p1, %s35_s24), 0  ;;  %p288_p3 = pnand %p1391_p0, %p287_p2 }
   0x6   : > { %s1392_s27 = sshll.u32 (!%p288_p3), %s1782_s21, 5 }
   0x7   : > { %291 = sbr.rel (%p288_p3) target bundleno = 277 (0x115), region = 44  ;;  %p344_p4 = scmp.lt.s32.totalorder (!%p288_p3), %s1392_s27, 63 }
   0xc   : > { %v1760_v0 = vld [vmem:[%s2076_s1 + $0x38] sm:$0xff]   ;;  %v1761_v1 = vld [vmem:[%s2076_s1 + $0x30] sm:$0xff]   ;;  %s2087_s27 = smov (!%p344_p4, %s1392_s27), 63  ;;  %v1762_v2 = vld [vmem:[%s2076_s1 + $0x28] sm:$0xff]  }
   0xd   : > { %1672 = vmatprep.subr.bf16.mxu0 %v1760_v0  ;;  %1720 = vmatprep.subr.bf16.mxu1 %v1760_v0  ;;  %s1393_s8 = sshll.u32 %s2087_s27, 2  ;;  %v1763_v3 = vld [vmem:[%s2076_s1 + $0x20] sm:$0xff]   ;;  %v1764_v21 = vld [vmem:[%s2076_s1 + $0x18] sm:$0xff]   ;;  %v1765_v37 = vld [vmem:[%s2076_s1 + $0x10] sm:$0xff]  }
   0xe   : > { %1673 = vmatpush3.bf16.msra.mxu0 %v1760_v0  ;;  %1728 = vmatpush3.bf16.msra.mxu1 %v1760_v0  ;;  %s1862_s11 = scalar_lea.vmem %s2075_s0, %s1393_s8  ;;  %v1871_v5 = vld [vmem:[%s2077_s2] ss:$0 sm:$0xff]  ;;  %v1766_v54 = vld [vmem:[%s2076_s1 + $0x8] sm:$0xff]   ;;  %s2002_s13 = scalar_lea.vmem %s2081_s6, %s1393_s8 }
   0xf   : > { %1674 = vmatprep.subr.bf16.mxu0 %v1761_v1  ;;  %1721 = vmatprep.subr.bf16.mxu1 %v1761_v1  ;;  %v1475_v4 = vld [vmem:[%s1862_s11] sm:$0xff]   ;;  %v1618_v9 = vld [vmem:[%s1862_s11 + $0x8] sm:$0xff]   ;;  %v1619_v20 = vld [vmem:[%s1862_s11 + $0x10] sm:$0xff]  }
  0x10   : > { %v1476_v6 = vunpack.c.l.bf16 %v1475_v4  ;;  %v1477_v7 = vunpack.c.h.bf16 %v1475_v4  ;;  %v1625_v8 = vld [vmem:[%s1862_s11 + $0x40] sm:$0xff]   ;;  %v1626_v10 = vld [vmem:[%s1862_s11 + $0x48] sm:$0xff]   ;;  %v1480_v14 = vunpack.c.l.bf16 %v1618_v9  ;;  %v1481_v15 = vunpack.c.h.bf16 %v1618_v9  ;;  %v1627_v36 = vld [vmem:[%s1862_s11 + $0x50] sm:$0xff]  }
  0x11   : > { %v1879_v11 = vld [vmem:[%s2078_s3] ss:$0 sm:$0xff]  ;;  %v1508_v12 = vunpack.c.l.bf16 %v1625_v8  ;;  %v1509_v13 = vunpack.c.h.bf16 %v1625_v8  ;;  %v1512_v18 = vunpack.c.l.bf16 %v1626_v10  ;;  %v1513_v19 = vunpack.c.h.bf16 %v1626_v10  ;;  %v1620_v41 = vld [vmem:[%s1862_s11 + $0x18] sm:$0xff]  }
  0x12   : > { %1675 = vmatpush3.bf16.msra.mxu0 %v1761_v1  ;;  %1729 = vmatpush3.bf16.msra.mxu1 %v1761_v1  ;;  %v490_v16 = vmul.f32 %v1476_v6, %v1871_v5  ;;  %v491_v17 = vmul.f32 %v1477_v7, %v1871_v5  ;;  %v492_v24 = vmul.f32 %v1480_v14, %v1871_v5  ;;  %v1484_v32 = vunpack.c.l.bf16 %v1619_v20  ;;  %v1628_v49 = vld [vmem:[%s1862_s11 + $0x58] sm:$0xff]   ;;  %v1621_v63 = vld [vmem:[%s1862_s11 + $0x20] sm:$0xff]  }
  0x13   : > { %1676 = vmatprep.subr.bf16.mxu0 %v1762_v2  ;;  %1722 = vmatprep.subr.bf16.mxu1 %v1762_v2  ;;  %v506_v22 = vmul.f32 %v1508_v12, %v1871_v5  ;;  %v507_v23 = vmul.f32 %v1509_v13, %v1871_v5  ;;  %v493_v27 = vmul.f32 %v1481_v15, %v1871_v5  ;;  %v1485_v44 = vunpack.c.h.bf16 %v1619_v20  ;;  %v1767_v9 = vld [vmem:[%s2076_s1] sm:$0xff]  }
  0x14   : > { %v529_v25 = vadd.f32 %v1879_v11, %v490_v16  ;;  %v530_v26 = vadd.f32 %v1879_v11, %v491_v17  ;;  %v508_v28 = vmul.f32 %v1512_v18, %v1871_v5  ;;  %v531_v31 = vadd.f32 %v1879_v11, %v492_v24  ;;  %v1629_v15 = vld [vmem:[%s1862_s11 + $0x60] sm:$0xff]  }
  0x15   : > { %v545_v29 = vadd.f32 %v1879_v11, %v506_v22  ;;  %v546_v30 = vadd.f32 %v1879_v11, %v507_v23  ;;  %v509_v35 = vmul.f32 %v1513_v19, %v1871_v5  ;;  %v532_v40 = vadd.f32 %v1879_v11, %v493_v27  ;;  %v1622_v22 = vld [vmem:[%s1862_s11 + $0x28] sm:$0xff]  }
  0x16   : > { %1677 = vmatpush3.bf16.msra.mxu0 %v1762_v2  ;;  %1730 = vmatpush3.bf16.msra.mxu1 %v1762_v2  ;;  %v561_v33 = vmax.f32 %v529_v25, 0.0  ;;  %v562_v34 = vmax.f32 %v530_v26, 0.0  ;;  %v547_v43 = vadd.f32 %v1879_v11, %v508_v28  ;;  %v563_v46 = vmax.f32 %v531_v31, 0.0  ;;  %v1630_v27 = vld [vmem:[%s1862_s11 + $0x68] sm:$0xff]  }
  0x17   : > { %1678 = vmatprep.subr.bf16.mxu0 %v1763_v3  ;;  %1723 = vmatprep.subr.bf16.mxu1 %v1763_v3  ;;  %v577_v38 = vmax.f32 %v545_v29, 0.0  ;;  %v578_v39 = vmax.f32 %v546_v30, 0.0  ;;  %v494_v47 = vmul.f32 %v1484_v32, %v1871_v5  ;;  %v1516_v48 = vunpack.c.l.bf16 %v1627_v36 }
  0x18   : > { %v593_v42 = vpack.c.bf16 %v562_v34, %v561_v33  ;;  %v548_v50 = vadd.f32 %v1879_v11, %v509_v35  ;;  %v495_v51 = vmul.f32 %v1485_v44, %v1871_v5  ;;  %v1517_v52 = vunpack.c.h.bf16 %v1627_v36  ;;  %v1623_v36 = vld [vmem:[%s1862_s11 + $0x30] sm:$0xff]  }
  0x19   : > { %v601_v45 = vpack.c.bf16 %v578_v39, %v577_v38  ;;  %v1488_v53 = vunpack.c.l.bf16 %v1620_v41  ;;  %v564_v55 = vmax.f32 %v532_v40, 0.0  ;;  %v533_v56 = vadd.f32 %v1879_v11, %v494_v47 }
  0x1a   : > { %1679 = vmatpush3.bf16.msra.mxu0 %v1763_v3  ;;  %1731 = vmatpush3.bf16.msra.mxu1 %v1763_v3  ;;  %v510_v57 = vmul.f32 %v1516_v48, %v1871_v5  ;;  %v1489_v58 = vunpack.c.h.bf16 %v1620_v41  ;;  %v534_v59 = vadd.f32 %v1879_v11, %v495_v51  ;;  %v511_v60 = vmul.f32 %v1517_v52, %v1871_v5  ;;  %v1631_v52 = vld [vmem:[%s1862_s11 + $0x70] sm:$0xff]  }
  0x1b   : > { %1680 = vmatprep.subr.bf16.mxu0 %v1764_v21  ;;  %1724 = vmatprep.subr.bf16.mxu1 %v1764_v21  ;;  %v496_v61 = vmul.f32 %v1488_v53, %v1871_v5  ;;  %v1520_v62 = vunpack.c.l.bf16 %v1628_v49  ;;  %v579_v0 = vmax.f32 %v547_v43, 0.0  ;;  %v1521_v3 = vunpack.c.h.bf16 %v1628_v49 }
  0x1c   : > { %1688 = vmatprep.mubr.bf16.mxu0 %v593_v42  ;;  %1704 = vmatprep.mubr.bf16.mxu1 %v601_v45  ;;  %v549_v1 = vadd.f32 %v1879_v11, %v510_v57  ;;  %v497_v2 = vmul.f32 %v1489_v58, %v1871_v5  ;;  %v580_v4 = vmax.f32 %v548_v50, 0.0  ;;  %v565_v6 = vmax.f32 %v533_v56, 0.0 }
  0x1d   : > { %v566_v7 = vmax.f32 %v534_v59, 0.0  ;;  %v550_v8 = vadd.f32 %v1879_v11, %v511_v60  ;;  %v535_v10 = vadd.f32 %v1879_v11, %v496_v61  ;;  %v512_v12 = vmul.f32 %v1520_v62, %v1871_v5  ;;  %v1624_v60 = vld [vmem:[%s1862_s11 + $0x38] sm:$0xff]  }
  0x1e   : > { %1681 = vmatpush3.bf16.msra.mxu0 %v1764_v21  ;;  %1732 = vmatpush3.bf16.msra.mxu1 %v1764_v21  ;;  %v513_v13 = vmul.f32 %v1521_v3, %v1871_v5  ;;  %v1492_v14 = vunpack.c.l.bf16 %v1621_v63  ;;  %v594_v16 = vpack.c.bf16 %v564_v55, %v563_v46  ;;  %v581_v17 = vmax.f32 %v549_v1, 0.0 }
  0x1f   : > { %1682 = vmatprep.subr.bf16.mxu0 %v1765_v37  ;;  %1725 = vmatprep.subr.bf16.mxu1 %v1765_v37  ;;  %v582_v18 = vmax.f32 %v550_v8, 0.0  ;;  %v536_v19 = vadd.f32 %v1879_v11, %v497_v2  ;;  %v1493_v20 = vunpack.c.h.bf16 %v1621_v63  ;;  %v602_v23 = vpack.c.bf16 %v580_v4, %v579_v0 }
  0x20   : > { %v498_v21 = vmul.f32 %v1492_v14, %v1871_v5  ;;  %v595_v24 = vpack.c.bf16 %v566_v7, %v565_v6  ;;  %v1524_v25 = vunpack.c.l.bf16 %v1629_v15  ;;  %v1525_v26 = vunpack.c.h.bf16 %v1629_v15  ;;  %v1632_v6 = vld [vmem:[%s1862_s11 + $0x78] sm:$0xff]  }
  0x21   : > { %v567_v28 = vmax.f32 %v535_v10, 0.0  ;;  %v551_v29 = vadd.f32 %v1879_v11, %v512_v12  ;;  %v552_v30 = vadd.f32 %v1879_v11, %v513_v13  ;;  %v499_v31 = vmul.f32 %v1493_v20, %v1871_v5 }
  0x22   : > { %1683 = vmatpush3.bf16.msra.mxu0 %v1765_v37  ;;  %1733 = vmatpush3.bf16.msra.mxu1 %v1765_v37  ;;  %v514_v32 = vmul.f32 %v1524_v25, %v1871_v5  ;;  %v515_v33 = vmul.f32 %v1525_v26, %v1871_v5  ;;  %v1496_v34 = vunpack.c.l.bf16 %v1622_v22  ;;  %v1497_v35 = vunpack.c.h.bf16 %v1622_v22 }
  0x23   : > { %1684 = vmatprep.subr.bf16.mxu0 %v1766_v54  ;;  %1726 = vmatprep.subr.bf16.mxu1 %v1766_v54  ;;  %v603_v37 = vpack.c.bf16 %v582_v18, %v581_v17  ;;  %v568_v38 = vmax.f32 %v536_v19, 0.0  ;;  %v537_v39 = vadd.f32 %v1879_v11, %v498_v21  ;;  %v1528_v40 = vunpack.c.l.bf16 %v1630_v27 }
  0x24   : > { %v538_v41 = vadd.f32 %v1879_v11, %v499_v31  ;;  %v553_v42 = vadd.f32 %v1879_v11, %v514_v32  ;;  %v554_v43 = vadd.f32 %v1879_v11, %v515_v33  ;;  %v1529_v44 = vunpack.c.h.bf16 %v1630_v27 }
  0x25   : > { %v500_v45 = vmul.f32 %v1496_v34, %v1871_v5  ;;  %v501_v46 = vmul.f32 %v1497_v35, %v1871_v5  ;;  %v1500_v47 = vunpack.c.l.bf16 %v1623_v36  ;;  %v583_v48 = vmax.f32 %v551_v29, 0.0 }
  0x26   : > { %1685 = vmatpush3.bf16.msra.mxu0 %v1766_v54  ;;  %1734 = vmatpush3.bf16.msra.mxu1 %v1766_v54  ;;  %v584_v49 = vmax.f32 %v552_v30, 0.0  ;;  %v516_v50 = vmul.f32 %v1528_v40, %v1871_v5  ;;  %v517_v51 = vmul.f32 %v1529_v44, %v1871_v5  ;;  %v596_v53 = vpack.c.bf16 %v568_v38, %v567_v28 }
  0x27   : > { %1686 = vmatprep.subr.bf16.mxu0 %v1767_v9  ;;  %1727 = vmatprep.subr.bf16.mxu1 %v1767_v9  ;;  %v569_v54 = vmax.f32 %v537_v39, 0.0  ;;  %v1501_v55 = vunpack.c.h.bf16 %v1623_v36  ;;  %v570_v56 = vmax.f32 %v538_v41, 0.0  ;;  %v585_v57 = vmax.f32 %v553_v42, 0.0 }
  0x28   : > { %v586_v58 = vmax.f32 %v554_v43, 0.0  ;;  %v502_v59 = vmul.f32 %v1500_v47, %v1871_v5  ;;  %v539_v61 = vadd.f32 %v1879_v11, %v500_v45  ;;  %v540_v62 = vadd.f32 %v1879_v11, %v501_v46  ;;  %v1972_v45 = vld [vmem:[%s2079_s4] ss:$0 sm:$0xff] }
  0x29   : > { %v503_v63 = vmul.f32 %v1501_v55, %v1871_v5  ;;  %v1532_v0 = vunpack.c.l.bf16 %v1631_v52  ;;  %v604_v1 = vpack.c.bf16 %v584_v49, %v583_v48  ;;  %v555_v2 = vadd.f32 %v1879_v11, %v516_v50  ;;  %v1979_v49 = vld [vmem:[%s2080_s5] ss:$0 sm:$0xff] }
  0x2a   : > { %1687 = vmatpush3.bf16.msra.mxu0 %v1767_v9  ;;  %1735 = vmatpush3.bf16.msra.mxu1 %v1767_v9  ;;  %v556_v3 = vadd.f32 %v1879_v11, %v517_v51  ;;  %v1533_v4 = vunpack.c.h.bf16 %v1631_v52  ;;  %v541_v7 = vadd.f32 %v1879_v11, %v502_v59  ;;  %v1504_v9 = vunpack.c.l.bf16 %v1624_v60 }
  0x2b   : > { %v518_v8 = vmul.f32 %v1532_v0, %v1871_v5  ;;  %v1505_v10 = vunpack.c.h.bf16 %v1624_v60  ;;  %v597_v12 = vpack.c.bf16 %v570_v56, %v569_v54  ;;  %v605_v13 = vpack.c.bf16 %v586_v58, %v585_v57 }
  0x2c   : > { %v542_v14 = vadd.f32 %v1879_v11, %v503_v63  ;;  %v519_v15 = vmul.f32 %v1533_v4, %v1871_v5  ;;  %v572_v17 = vmax.f32 %v540_v62, 0.0  ;;  %v1536_v19 = vunpack.c.l.bf16 %v1632_v6 }
  0x2d   : > { %1689 = vmatmul.mubr.bf16.vlgmr.msra.gmra.mxu0 %v594_v16  ;;  %1705 = vmatmul.mubr.bf16.vlgmr.msra.gmra.mxu1 %v602_v23  ;;  %v571_v16 = vmax.f32 %v539_v61, 0.0  ;;  %v557_v18 = vadd.f32 %v1879_v11, %v518_v8  ;;  %v587_v20 = vmax.f32 %v555_v2, 0.0  ;;  %v588_v21 = vmax.f32 %v556_v3, 0.0 }
  0x2e   : > { %1692 = vmatprep.mubr.bf16.mxu0 %v595_v24  ;;  %1708 = vmatprep.mubr.bf16.mxu1 %v603_v37  ;;  %v558_v22 = vadd.f32 %v1879_v11, %v519_v15  ;;  %v1537_v23 = vunpack.c.h.bf16 %v1632_v6  ;;  %v573_v24 = vmax.f32 %v541_v7, 0.0  ;;  %v504_v25 = vmul.f32 %v1504_v9, %v1871_v5 }
  0x2f   : > { %v505_v26 = vmul.f32 %v1505_v10, %v1871_v5  ;;  %v520_v27 = vmul.f32 %v1536_v19, %v1871_v5  ;;  %v574_v28 = vmax.f32 %v542_v14, 0.0  ;;  %v589_v29 = vmax.f32 %v557_v18, 0.0 }
  0x30   : > { %v590_v30 = vmax.f32 %v558_v22, 0.0  ;;  %v521_v31 = vmul.f32 %v1537_v23, %v1871_v5  ;;  %v598_v32 = vpack.c.bf16 %v572_v17, %v571_v16  ;;  %v606_v33 = vpack.c.bf16 %v588_v21, %v587_v20 }
  0x31   : > { %v543_v34 = vadd.f32 %v1879_v11, %v504_v25  ;;  %v544_v35 = vadd.f32 %v1879_v11, %v505_v26  ;;  %v559_v36 = vadd.f32 %v1879_v11, %v520_v27  ;;  %v599_v38 = vpack.c.bf16 %v574_v28, %v573_v24 }
  0x32   : > { %v560_v37 = vadd.f32 %v1879_v11, %v521_v31  ;;  %v607_v39 = vpack.c.bf16 %v590_v30, %v589_v29 }
  0x33   : > { %v575_v40 = vmax.f32 %v543_v34, 0.0  ;;  %v576_v41 = vmax.f32 %v544_v35, 0.0  ;;  %v591_v42 = vmax.f32 %v559_v36, 0.0 }
  0x34   : > { %v592_v43 = vmax.f32 %v560_v37, 0.0 }
  0x35   : > { %1693 = vmatmul.mubr.bf16.gmra.mxu0 %v596_v53  ;;  %1709 = vmatmul.mubr.bf16.gmra.mxu1 %v604_v1  ;;  %v600_v5 = vpack.c.bf16 %v576_v41, %v575_v40 }
  0x36   : > { %1696 = vmatprep.mubr.bf16.mxu0 %v597_v12  ;;  %1712 = vmatprep.mubr.bf16.mxu1 %v605_v13  ;;  %v608_v44 = vpack.c.bf16 %v592_v43, %v591_v42 }
  0x3d   : > { %1697 = vmatmul.mubr.bf16.gmra.mxu0 %v598_v32  ;;  %1713 = vmatmul.mubr.bf16.gmra.mxu1 %v606_v33 }
  0x3e   : > { %1700 = vmatprep.mubr.bf16.mxu0 %v599_v38  ;;  %1716 = vmatprep.mubr.bf16.mxu1 %v607_v39 }
  0x45   : > { %1701 = vmatmul.mubr.bf16.gmra.mxu0 %v600_v5  ;;  %1717 = vmatmul.mubr.bf16.gmra.mxu1 %v608_v44 }
  0xed   : > { %v1690_v11 = vpop.f32.mrf.mxu0  ;;  %v1706_v46 = vpop.f32.mrf.mxu1 }
  0xee   : > { %v974_v47 = vmul.f32 %v1690_v11, %v1972_v45  ;;  %v990_v48 = vmul.f32 %v1706_v46, %v1972_v45 }
  0xef   : > { %v739_v50 = vpop.f32.mrf.mxu0  ;;  %v803_v51 = vpop.f32.mrf.mxu1 }
  0xf0   : > { %v972_v52 = vmul.f32 %v1972_v45, %v739_v50  ;;  %v988_v53 = vmul.f32 %v1972_v45, %v803_v51  ;;  %v1013_v56 = vadd.f32 %v1979_v49, %v974_v47  ;;  %v1029_v57 = vadd.f32 %v1979_v49, %v990_v48 }
  0xf1   : > { %v1691_v54 = vpop.f32.mrf.mxu0  ;;  %v1707_v55 = vpop.f32.mrf.mxu1 }
  0xf2   : > { %v975_v58 = vmul.f32 %v1691_v54, %v1972_v45  ;;  %v991_v59 = vmul.f32 %v1707_v55, %v1972_v45  ;;  %v1011_v62 = vadd.f32 %v1979_v49, %v972_v52  ;;  %v1027_v63 = vadd.f32 %v1979_v49, %v988_v53 }
  0xf3   : > { %v742_v60 = vpop.f32.mrf.mxu0  ;;  %v806_v61 = vpop.f32.mrf.mxu1  ;;  %v1045_v7 = vmax.f32 %v1013_v56, 0.0  ;;  %v1061_v8 = vmax.f32 %v1029_v57, 0.0 }
  0xf4   : > { %v973_v0 = vmul.f32 %v1972_v45, %v742_v60  ;;  %v989_v1 = vmul.f32 %v1972_v45, %v806_v61  ;;  %v1014_v2 = vadd.f32 %v1979_v49, %v975_v58  ;;  %v1030_v3 = vadd.f32 %v1979_v49, %v991_v59 }
  0xf5   : > { %v1694_v4 = vpop.f32.mrf.mxu0  ;;  %v1710_v6 = vpop.f32.mrf.mxu1  ;;  %v1043_v18 = vmax.f32 %v1011_v62, 0.0  ;;  %v1059_v19 = vmax.f32 %v1027_v63, 0.0 }
  0xf6   : > { %v1012_v9 = vadd.f32 %v1979_v49, %v973_v0  ;;  %v1028_v10 = vadd.f32 %v1979_v49, %v989_v1  ;;  %v1046_v12 = vmax.f32 %v1014_v2, 0.0  ;;  %v1062_v13 = vmax.f32 %v1030_v3, 0.0 }
  0xf7   : > { %v978_v14 = vmul.f32 %v1694_v4, %v1972_v45  ;;  %v994_v15 = vmul.f32 %v1710_v6, %v1972_v45  ;;  %v755_v16 = vpop.f32.mrf.mxu0  ;;  %v819_v17 = vpop.f32.mrf.mxu1 }
  0xf8   : > { %v1044_v20 = vmax.f32 %v1012_v9, 0.0  ;;  %v1060_v21 = vmax.f32 %v1028_v10, 0.0  ;;  %v1546_v22 = vpack.c.bf16 %v1046_v12, %v1045_v7  ;;  %v1586_v23 = vpack.c.bf16 %v1062_v13, %v1061_v8 }
  0xf9   : > { %v976_v24 = vmul.f32 %v1972_v45, %v755_v16  ;;  %v992_v25 = vmul.f32 %v1972_v45, %v819_v17  ;;  %v1695_v26 = vpop.f32.mrf.mxu0  ;;  %v1711_v27 = vpop.f32.mrf.mxu1  ;;  %v1017_v30 = vadd.f32 %v1979_v49, %v978_v14  ;;  %v1033_v31 = vadd.f32 %v1979_v49, %v994_v15 }
  0xfa   : > { %v1541_v28 = vpack.c.bf16 %v1044_v20, %v1043_v18  ;;  %v1581_v29 = vpack.c.bf16 %v1060_v21, %v1059_v19  ;;  %1633 = vst [vmem:[%s2002_s13 + $0x8] sm:$0xff] %v1546_v22   ;;  %1641 = vst [vmem:[%s2002_s13 + $0x48] sm:$0xff] %v1586_v23   ;;  %v979_v32 = vmul.f32 %v1695_v26, %v1972_v45 }
  0xfb   : > { %v995_v33 = vmul.f32 %v1711_v27, %v1972_v45  ;;  %v758_v34 = vpop.f32.mrf.mxu0  ;;  %v822_v35 = vpop.f32.mrf.mxu1  ;;  %v1015_v36 = vadd.f32 %v1979_v49, %v976_v24  ;;  %v1031_v37 = vadd.f32 %v1979_v49, %v992_v25  ;;  %v1049_v47 = vmax.f32 %v1017_v30, 0.0 }
  0xfc   : > { %1542 = vst [vmem:[%s2002_s13] sm:$0xff] %v1541_v28   ;;  %1640 = vst [vmem:[%s2002_s13 + $0x40] sm:$0xff] %v1581_v29   ;;  %v977_v38 = vmul.f32 %v1972_v45, %v758_v34  ;;  %v993_v39 = vmul.f32 %v1972_v45, %v822_v35  ;;  %v1018_v40 = vadd.f32 %v1979_v49, %v979_v32  ;;  %v1065_v48 = vmax.f32 %v1033_v31, 0.0 }
  0xfd   : > { %v1034_v41 = vadd.f32 %v1979_v49, %v995_v33  ;;  %v1698_v42 = vpop.f32.mrf.mxu0  ;;  %v1714_v43 = vpop.f32.mrf.mxu1  ;;  %v1047_v54 = vmax.f32 %v1015_v36, 0.0  ;;  %v1063_v55 = vmax.f32 %v1031_v37, 0.0 }
  0xfe   : > { %v1016_v5 = vadd.f32 %v1979_v49, %v977_v38  ;;  %v1032_v44 = vadd.f32 %v1979_v49, %v993_v39  ;;  %v982_v11 = vmul.f32 %v1698_v42, %v1972_v45  ;;  %v998_v46 = vmul.f32 %v1714_v43, %v1972_v45 }
  0xff   : > { %v1050_v50 = vmax.f32 %v1018_v40, 0.0  ;;  %v1066_v51 = vmax.f32 %v1034_v41, 0.0  ;;  %v771_v52 = vpop.f32.mrf.mxu0  ;;  %v835_v53 = vpop.f32.mrf.mxu1 }
 0x100   : > { %v1048_v56 = vmax.f32 %v1016_v5, 0.0  ;;  %v1064_v57 = vmax.f32 %v1032_v44, 0.0  ;;  %v980_v60 = vmul.f32 %v1972_v45, %v771_v52  ;;  %v996_v61 = vmul.f32 %v1972_v45, %v835_v53 }
 0x101   : > { %v1556_v58 = vpack.c.bf16 %v1050_v50, %v1049_v47  ;;  %v1596_v59 = vpack.c.bf16 %v1066_v51, %v1065_v48  ;;  %v1699_v62 = vpop.f32.mrf.mxu0  ;;  %v1715_v63 = vpop.f32.mrf.mxu1  ;;  %v1021_v2 = vadd.f32 %v1979_v49, %v982_v11  ;;  %v1037_v3 = vadd.f32 %v1979_v49, %v998_v46 }
 0x102   : > { %v1551_v0 = vpack.c.bf16 %v1048_v56, %v1047_v54  ;;  %v1591_v1 = vpack.c.bf16 %v1064_v57, %v1063_v55  ;;  %v983_v4 = vmul.f32 %v1699_v62, %v1972_v45  ;;  %v999_v6 = vmul.f32 %v1715_v63, %v1972_v45 }
 0x103   : > { %1635 = vst [vmem:[%s2002_s13 + $0x18] sm:$0xff] %v1556_v58   ;;  %1643 = vst [vmem:[%s2002_s13 + $0x58] sm:$0xff] %v1596_v59   ;;  %v774_v7 = vpop.f32.mrf.mxu0  ;;  %v838_v8 = vpop.f32.mrf.mxu1  ;;  %v1019_v9 = vadd.f32 %v1979_v49, %v980_v60  ;;  %v1035_v10 = vadd.f32 %v1979_v49, %v996_v61  ;;  %v1053_v18 = vmax.f32 %v1021_v2, 0.0  ;;  %v1069_v19 = vmax.f32 %v1037_v3, 0.0 }
 0x104   : > { %1634 = vst [vmem:[%s2002_s13 + $0x10] sm:$0xff] %v1551_v0   ;;  %1642 = vst [vmem:[%s2002_s13 + $0x50] sm:$0xff] %v1591_v1   ;;  %v981_v12 = vmul.f32 %v1972_v45, %v774_v7  ;;  %v997_v13 = vmul.f32 %v1972_v45, %v838_v8  ;;  %v1022_v14 = vadd.f32 %v1979_v49, %v983_v4 }
 0x105   : > { %v1038_v15 = vadd.f32 %v1979_v49, %v999_v6  ;;  %v1702_v16 = vpop.f32.mrf.mxu0  ;;  %v1718_v17 = vpop.f32.mrf.mxu1  ;;  %v1051_v28 = vmax.f32 %v1019_v9, 0.0  ;;  %v1067_v29 = vmax.f32 %v1035_v10, 0.0 }
 0x106   : > { %v1020_v20 = vadd.f32 %v1979_v49, %v981_v12  ;;  %v1036_v21 = vadd.f32 %v1979_v49, %v997_v13  ;;  %v1054_v22 = vmax.f32 %v1022_v14, 0.0  ;;  %v986_v24 = vmul.f32 %v1702_v16, %v1972_v45 }
 0x107   : > { %v1070_v23 = vmax.f32 %v1038_v15, 0.0  ;;  %v1002_v25 = vmul.f32 %v1718_v17, %v1972_v45  ;;  %v787_v26 = vpop.f32.mrf.mxu0  ;;  %v851_v27 = vpop.f32.mrf.mxu1 }
 0x108   : > { %v1052_v30 = vmax.f32 %v1020_v20, 0.0  ;;  %v1068_v31 = vmax.f32 %v1036_v21, 0.0  ;;  %v1566_v32 = vpack.c.bf16 %v1054_v22, %v1053_v18  ;;  %v984_v34 = vmul.f32 %v1972_v45, %v787_v26 }
 0x109   : > { %v1606_v33 = vpack.c.bf16 %v1070_v23, %v1069_v19  ;;  %v1000_v35 = vmul.f32 %v1972_v45, %v851_v27  ;;  %v1703_v36 = vpop.f32.mrf.mxu0  ;;  %v1719_v37 = vpop.f32.mrf.mxu1  ;;  %v1025_v40 = vadd.f32 %v1979_v49, %v986_v24  ;;  %v1041_v41 = vadd.f32 %v1979_v49, %v1002_v25 }
 0x10a   : > { %v1561_v38 = vpack.c.bf16 %v1052_v30, %v1051_v28  ;;  %v1601_v39 = vpack.c.bf16 %v1068_v31, %v1067_v29  ;;  %1637 = vst [vmem:[%s2002_s13 + $0x28] sm:$0xff] %v1566_v32   ;;  %v987_v42 = vmul.f32 %v1703_v36, %v1972_v45  ;;  %v1003_v43 = vmul.f32 %v1719_v37, %v1972_v45 }
 0x10b   : > { %1645 = vst [vmem:[%s2002_s13 + $0x68] sm:$0xff] %v1606_v33   ;;  %v790_v5 = vpop.f32.mrf.mxu0  ;;  %v854_v44 = vpop.f32.mrf.mxu1  ;;  %v1023_v11 = vadd.f32 %v1979_v49, %v984_v34  ;;  %v1039_v46 = vadd.f32 %v1979_v49, %v1000_v35  ;;  %v1057_v54 = vmax.f32 %v1025_v40, 0.0  ;;  %v1073_v55 = vmax.f32 %v1041_v41, 0.0 }
 0x10c   : > { %1636 = vst [vmem:[%s2002_s13 + $0x20] sm:$0xff] %v1561_v38   ;;  %1644 = vst [vmem:[%s2002_s13 + $0x60] sm:$0xff] %v1601_v39   ;;  %v985_v47 = vmul.f32 %v1972_v45, %v790_v5  ;;  %v1001_v48 = vmul.f32 %v1972_v45, %v854_v44  ;;  %v1026_v50 = vadd.f32 %v1979_v49, %v987_v42 }
 0x10d   : > { %v1042_v51 = vadd.f32 %v1979_v49, %v1003_v43  ;;  %v1055_v58 = vmax.f32 %v1023_v11, 0.0  ;;  %v1071_v59 = vmax.f32 %v1039_v46, 0.0 }
 0x10e   : > { %v1024_v52 = vadd.f32 %v1979_v49, %v985_v47  ;;  %v1040_v53 = vadd.f32 %v1979_v49, %v1001_v48  ;;  %v1058_v56 = vmax.f32 %v1026_v50, 0.0 }
 0x10f   : > { %v1074_v57 = vmax.f32 %v1042_v51, 0.0 }
 0x110   : > { %v1056_v60 = vmax.f32 %v1024_v52, 0.0  ;;  %v1072_v45 = vmax.f32 %v1040_v53, 0.0  ;;  %v1576_v61 = vpack.c.bf16 %v1058_v56, %v1057_v54 }
 0x111   : > { %v1616_v62 = vpack.c.bf16 %v1074_v57, %v1073_v55 }
 0x112   : > { %v1571_v63 = vpack.c.bf16 %v1056_v60, %v1055_v58  ;;  %v1611_v0 = vpack.c.bf16 %v1072_v45, %v1071_v59  ;;  %1639 = vst [vmem:[%s2002_s13 + $0x38] sm:$0xff] %v1576_v61  }
 0x113   : > { %1647 = vst [vmem:[%s2002_s13 + $0x78] sm:$0xff] %v1616_v62  }
 0x114   : > { %1638 = vst [vmem:[%s2002_s13 + $0x30] sm:$0xff] %v1571_v63   ;;  %1646 = vst [vmem:[%s2002_s13 + $0x70] sm:$0xff] %v1611_v0  }
 0x115 PF: > { %s16_s23 = sadd.s32 1, %s1790_s23   ;;  %s2082_s21 = smov %s1786_s22 }
 0x116   : > { %p13_p5 = scmp.ge.s32.totalorder %s16_s23, 4   ;;  %s2083_s22 = smov %s2085_s24 }
 0x118   :  { %15 = sbr.rel (!%p13_p5) target bundleno = 2 (0x2), region = 97 }

// kernel: data_generator_img.35
= control target key start
LH: loop header
LB: loop body
LE: loop exit
PB: predicated region body
PF: predicated region fallthrough
CT: control target
= control target key end

     0   :  { %s1712_s12 = smov 0   ;;  %s1714_s13 = smov 0   ;;  %s1886_s0 = inlined_call_operand.vmem [shape: bf16[512,256], index: 0, kind: input, shape index: {}]   ;;  %s1887_s1 = inlined_call_operand.vmem [shape: bf16[256,128], index: 1, kind: input, shape index: {}]   ;;  %s1888_s2 = inlined_call_operand.vmem [shape: f32[1,128], index: 2, kind: input, shape index: {}]   ;;  %s1889_s3 = inlined_call_operand.vmem [shape: bf16[512,128], index: 3, kind: output, shape index: {}]  }
   0x1   :  { %s1716_s14 = smov 0  }
   0x2 LB: > { %s32_s15 = sadd.s32 1, %s1686_s13  ;;  %p1235_p0 = scmp.ge.s32.totalorder %s1690_s14, 1  ;;  %s1690_s14 = sphi %s1716_s14, %s13_s14   ;;  %s1686_s13 = sphi %s1714_s13, %s1891_s13   ;;  %s1682_s12 = sphi %s1712_s12, %s1890_s12  }
   0x3   : > { %p34_p1 = scmp.ge.s32.totalorder %s32_s15, 2  ;;  %p191_p2 = scmp.lt.s32.totalorder %s1690_s14, 3 }
   0x5   : > { %s1893_s15 = smov (%p34_p1, %s32_s15), 0  ;;  %p192_p3 = pnand %p1235_p0, %p191_p2 }
   0x6   : > { %s1236_s18 = sshll.u32 (!%p192_p3), %s1682_s12, 5 }
   0x7   : > { %195 = sbr.rel (%p192_p3) target bundleno = 307 (0x133), region = 32  ;;  %p236_p4 = scmp.lt.s32.totalorder (!%p192_p3), %s1236_s18, 63 }
   0xc   : > { %v1604_v0 = vld [vmem:[%s1887_s1 + $0x78] sm:$0xff]   ;;  %v1606_v2 = vld [vmem:[%s1887_s1 + $0x70] sm:$0xff]   ;;  %v1608_v4 = vld [vmem:[%s1887_s1 + $0x68] sm:$0xff]   ;;  %s1895_s18 = smov (!%p236_p4, %s1236_s18), 63 }
   0xd   : > { %v1605_v1 = vld [vmem:[%s1887_s1 + $0x38] sm:$0xff]   ;;  %1452 = vmatprep.subr.bf16.mxu0 %v1604_v0  ;;  %1564 = vmatprep.subr.bf16.mxu1 %v1604_v0  ;;  %v1607_v3 = vld [vmem:[%s1887_s1 + $0x30] sm:$0xff]   ;;  %v1609_v5 = vld [vmem:[%s1887_s1 + $0x28] sm:$0xff]   ;;  %s1324_s6 = sshll.u32 %s1895_s18, 3  ;;  %s1240_s5 = sshll.u32 %s1895_s18, 2 }
   0xe   : > { %1453 = vmatpush3.bf16.msra.mxu0 %v1605_v1  ;;  %1572 = vmatpush3.bf16.msra.mxu1 %v1605_v1  ;;  %v1610_v6 = vld [vmem:[%s1887_s1 + $0x60] sm:$0xff]   ;;  %v1612_v8 = vld [vmem:[%s1887_s1 + $0x58] sm:$0xff]   ;;  %s1763_s11 = scalar_lea.vmem %s1886_s0, %s1324_s6  ;;  %v1614_v10 = vld [vmem:[%s1887_s1 + $0x50] sm:$0xff]   ;;  %s1831_s8 = scalar_lea.vmem %s1889_s3, %s1240_s5 }
   0xf   : > { %1454 = vmatprep.subr.bf16.mxu0 %v1606_v2  ;;  %1565 = vmatprep.subr.bf16.mxu1 %v1606_v2  ;;  %v1611_v7 = vld [vmem:[%s1887_s1 + $0x20] sm:$0xff]   ;;  %v1613_v9 = vld [vmem:[%s1887_s1 + $0x18] sm:$0xff]   ;;  %v1615_v13 = vld [vmem:[%s1887_s1 + $0x10] sm:$0xff]  }
  0x10   : > { %v1622_v11 = vld [vmem:[%s1763_s11 + $0x4] ss:$8 sps:$4 sm:$0xff]   ;;  %v1620_v18 = vld [vmem:[%s1763_s11] ss:$8 sps:$4 sm:$0xff]   ;;  %v1626_v20 = vld [vmem:[%s1763_s11 + $0x14] ss:$8 sps:$4 sm:$0xff]  }
  0x11   : > { %v1625_v12 = vld [vmem:[%s1763_s11 + $0x84] ss:$8 sps:$4 sm:$0xff]   ;;  %688 = vmatprep.mubr.bf16.mxu0 %v1622_v11  ;;  %v1623_v19 = vld [vmem:[%s1763_s11 + $0x80] ss:$8 sps:$4 sm:$0xff]   ;;  %v1628_v21 = vld [vmem:[%s1763_s11 + $0x94] ss:$8 sps:$4 sm:$0xff]  }
  0x12   : > { %1455 = vmatpush3.bf16.msra.mxu0 %v1607_v3  ;;  %1573 = vmatpush3.bf16.msra.mxu1 %v1607_v3  ;;  %v1616_v14 = vld [vmem:[%s1887_s1 + $0x48] sm:$0xff]   ;;  %v1618_v16 = vld [vmem:[%s1887_s1 + $0x40] sm:$0xff]   ;;  %v1630_v22 = vld [vmem:[%s1763_s11 + $0x10] ss:$8 sps:$4 sm:$0xff]  }
  0x13   : > { %1456 = vmatprep.subr.bf16.mxu0 %v1608_v4  ;;  %1566 = vmatprep.subr.bf16.mxu1 %v1608_v4  ;;  %v1617_v15 = vld [vmem:[%s1887_s1 + $0x8] sm:$0xff]   ;;  %v1619_v17 = vld [vmem:[%s1887_s1] sm:$0xff]   ;;  %v1631_v23 = vld [vmem:[%s1763_s11 + $0x90] ss:$8 sps:$4 sm:$0xff]  }
  0x14   : > { %752 = vmatprep.mubr.bf16.mxu1 %v1625_v12  ;;  %v1632_v24 = vld [vmem:[%s1763_s11 + $0x24] ss:$8 sps:$4 sm:$0xff]   ;;  %v1636_v26 = vld [vmem:[%s1763_s11 + $0x20] ss:$8 sps:$4 sm:$0xff]   ;;  %v1638_v28 = vld [vmem:[%s1763_s11 + $0x34] ss:$8 sps:$4 sm:$0xff]  }
  0x15   : > { %v1634_v25 = vld [vmem:[%s1763_s11 + $0xa4] ss:$8 sps:$4 sm:$0xff]   ;;  %v1637_v27 = vld [vmem:[%s1763_s11 + $0xa0] ss:$8 sps:$4 sm:$0xff]   ;;  %v1640_v29 = vld [vmem:[%s1763_s11 + $0xb4] ss:$8 sps:$4 sm:$0xff]  }
  0x16   : > { %1457 = vmatpush3.bf16.msra.mxu0 %v1609_v5  ;;  %1574 = vmatpush3.bf16.msra.mxu1 %v1609_v5  ;;  %v1642_v30 = vld [vmem:[%s1763_s11 + $0x30] ss:$8 sps:$4 sm:$0xff]   ;;  %v1644_v32 = vld [vmem:[%s1763_s11 + $0x44] ss:$8 sps:$4 sm:$0xff]   ;;  %v1648_v34 = vld [vmem:[%s1763_s11 + $0x40] ss:$8 sps:$4 sm:$0xff]  }
  0x17   : > { %1458 = vmatprep.subr.bf16.mxu0 %v1610_v6  ;;  %1567 = vmatprep.subr.bf16.mxu1 %v1610_v6  ;;  %v1643_v31 = vld [vmem:[%s1763_s11 + $0xb0] ss:$8 sps:$4 sm:$0xff]   ;;  %v1646_v33 = vld [vmem:[%s1763_s11 + $0xc4] ss:$8 sps:$4 sm:$0xff]   ;;  %v1649_v35 = vld [vmem:[%s1763_s11 + $0xc0] ss:$8 sps:$4 sm:$0xff]  }
  0x18   : > { %v1650_v36 = vld [vmem:[%s1763_s11 + $0x54] ss:$8 sps:$4 sm:$0xff]   ;;  %v1654_v38 = vld [vmem:[%s1763_s11 + $0x50] ss:$8 sps:$4 sm:$0xff]   ;;  %v1656_v40 = vld [vmem:[%s1763_s11 + $0x64] ss:$8 sps:$4 sm:$0xff]  }
  0x19   : > { %v1652_v37 = vld [vmem:[%s1763_s11 + $0xd4] ss:$8 sps:$4 sm:$0xff]   ;;  %v1655_v39 = vld [vmem:[%s1763_s11 + $0xd0] ss:$8 sps:$4 sm:$0xff]   ;;  %v1658_v41 = vld [vmem:[%s1763_s11 + $0xe4] ss:$8 sps:$4 sm:$0xff]  }
  0x1a   : > { %1459 = vmatpush3.bf16.msra.mxu0 %v1611_v7  ;;  %1575 = vmatpush3.bf16.msra.mxu1 %v1611_v7  ;;  %v1660_v42 = vld [vmem:[%s1763_s11 + $0x60] ss:$8 sps:$4 sm:$0xff]   ;;  %v1662_v44 = vld [vmem:[%s1763_s11 + $0x74] ss:$8 sps:$4 sm:$0xff]   ;;  %v1666_v46 = vld [vmem:[%s1763_s11 + $0x70] ss:$8 sps:$4 sm:$0xff]  }
  0x1b   : > { %1460 = vmatprep.subr.bf16.mxu0 %v1612_v8  ;;  %1568 = vmatprep.subr.bf16.mxu1 %v1612_v8  ;;  %v1661_v43 = vld [vmem:[%s1763_s11 + $0xe0] ss:$8 sps:$4 sm:$0xff]   ;;  %v1664_v45 = vld [vmem:[%s1763_s11 + $0xf4] ss:$8 sps:$4 sm:$0xff]   ;;  %v1667_v47 = vld [vmem:[%s1763_s11 + $0xf0] ss:$8 sps:$4 sm:$0xff]  }
  0x1c   : > { %v1821_v56 = vld [vmem:[%s1888_s2] ss:$0 sm:$0xff] }
  0x1e   : > { %1461 = vmatpush3.bf16.msra.mxu0 %v1613_v9  ;;  %1576 = vmatpush3.bf16.msra.mxu1 %v1613_v9 }
  0x1f   : > { %1462 = vmatprep.subr.bf16.mxu0 %v1614_v10  ;;  %1569 = vmatprep.subr.bf16.mxu1 %v1614_v10 }
  0x22   : > { %1463 = vmatpush3.bf16.msra.mxu0 %v1615_v13  ;;  %1577 = vmatpush3.bf16.msra.mxu1 %v1615_v13 }
  0x23   : > { %1464 = vmatprep.subr.bf16.mxu0 %v1616_v14  ;;  %1570 = vmatprep.subr.bf16.mxu1 %v1616_v14 }
  0x26   : > { %1465 = vmatpush3.bf16.msra.mxu0 %v1617_v15  ;;  %1578 = vmatpush3.bf16.msra.mxu1 %v1617_v15 }
  0x27   : > { %1466 = vmatprep.subr.bf16.mxu0 %v1618_v16  ;;  %1571 = vmatprep.subr.bf16.mxu1 %v1618_v16 }
  0x2a   : > { %1467 = vmatpush3.bf16.msra.mxu0 %v1619_v17  ;;  %1579 = vmatpush3.bf16.msra.mxu1 %v1619_v17 }
  0x2d   : > { %689 = vmatmul.mubr.bf16.vlgmr.msra.gmra.mxu0 %v1620_v18  ;;  %753 = vmatmul.mubr.bf16.vlgmr.msra.gmra.mxu1 %v1623_v19 }
  0x2e   : > { %696 = vmatprep.mubr.bf16.mxu0 %v1626_v20  ;;  %760 = vmatprep.mubr.bf16.mxu1 %v1628_v21 }
  0x35   : > { %697 = vmatmul.mubr.bf16.gmra.mxu0 %v1630_v22  ;;  %761 = vmatmul.mubr.bf16.gmra.mxu1 %v1631_v23 }
  0x36   : > { %704 = vmatprep.mubr.bf16.mxu0 %v1632_v24  ;;  %768 = vmatprep.mubr.bf16.mxu1 %v1634_v25 }
  0x3d   : > { %705 = vmatmul.mubr.bf16.gmra.mxu0 %v1636_v26  ;;  %769 = vmatmul.mubr.bf16.gmra.mxu1 %v1637_v27 }
  0x3e   : > { %712 = vmatprep.mubr.bf16.mxu0 %v1638_v28  ;;  %776 = vmatprep.mubr.bf16.mxu1 %v1640_v29 }
  0x45   : > { %713 = vmatmul.mubr.bf16.gmra.mxu0 %v1642_v30  ;;  %777 = vmatmul.mubr.bf16.gmra.mxu1 %v1643_v31 }
  0x46   : > { %720 = vmatprep.mubr.bf16.mxu0 %v1644_v32  ;;  %784 = vmatprep.mubr.bf16.mxu1 %v1646_v33 }
  0x4d   : > { %721 = vmatmul.mubr.bf16.gmra.mxu0 %v1648_v34  ;;  %785 = vmatmul.mubr.bf16.gmra.mxu1 %v1649_v35 }
  0x4e   : > { %728 = vmatprep.mubr.bf16.mxu0 %v1650_v36  ;;  %792 = vmatprep.mubr.bf16.mxu1 %v1652_v37 }
  0x55   : > { %729 = vmatmul.mubr.bf16.gmra.mxu0 %v1654_v38  ;;  %793 = vmatmul.mubr.bf16.gmra.mxu1 %v1655_v39 }
  0x56   : > { %736 = vmatprep.mubr.bf16.mxu0 %v1656_v40  ;;  %800 = vmatprep.mubr.bf16.mxu1 %v1658_v41 }
  0x5d   : > { %737 = vmatmul.mubr.bf16.gmra.mxu0 %v1660_v42  ;;  %801 = vmatmul.mubr.bf16.gmra.mxu1 %v1661_v43 }
  0x5e   : > { %744 = vmatprep.mubr.bf16.mxu0 %v1662_v44  ;;  %808 = vmatprep.mubr.bf16.mxu1 %v1664_v45 }
  0x65   : > { %745 = vmatmul.mubr.bf16.gmra.mxu0 %v1666_v46  ;;  %809 = vmatmul.mubr.bf16.gmra.mxu1 %v1667_v47 }
  0xed   : > { %v1468_v48 = vpop.f32.mrf.mxu0  ;;  %v1516_v49 = vpop.f32.mrf.mxu1 }
  0xef   : > { %v1469_v50 = vpop.f32.mrf.mxu0  ;;  %v1517_v51 = vpop.f32.mrf.mxu1 }
  0xf0   : > { %v1470_v54 = vadd.f32 %v1469_v50, %v1468_v48  ;;  %v1518_v55 = vadd.f32 %v1517_v51, %v1516_v49 }
  0xf1   : > { %v1471_v52 = vpop.f32.mrf.mxu0  ;;  %v1519_v53 = vpop.f32.mrf.mxu1 }
  0xf2   : > { %v923_v63 = vadd.f32 %v1470_v54, %v1821_v56  ;;  %v939_v0 = vadd.f32 %v1518_v55, %v1821_v56 }
  0xf3   : > { %v1472_v57 = vpop.f32.mrf.mxu0  ;;  %v1520_v58 = vpop.f32.mrf.mxu1 }
  0xf4   : > { %v1473_v59 = vadd.f32 %v1472_v57, %v1471_v52  ;;  %v1521_v60 = vadd.f32 %v1520_v58, %v1519_v53 }
  0xf5   : > { %v1474_v61 = vpop.f32.mrf.mxu0  ;;  %v1522_v62 = vpop.f32.mrf.mxu1 }
  0xf6   : > { %v924_v1 = vadd.f32 %v1473_v59, %v1821_v56  ;;  %v940_v2 = vadd.f32 %v1521_v60, %v1821_v56 }
  0xf7   : > { %v1475_v3 = vpop.f32.mrf.mxu0  ;;  %v1523_v4 = vpop.f32.mrf.mxu1 }
  0xf8   : > { %v1360_v5 = vpack.c.bf16 %v924_v1, %v923_v63  ;;  %v1400_v6 = vpack.c.bf16 %v940_v2, %v939_v0  ;;  %v1476_v9 = vadd.f32 %v1475_v3, %v1474_v61  ;;  %v1524_v10 = vadd.f32 %v1523_v4, %v1522_v62 }
  0xf9   : > { %v1477_v7 = vpop.f32.mrf.mxu0  ;;  %v1525_v8 = vpop.f32.mrf.mxu1 }
  0xfa   : > { %1361 = vst [vmem:[%s1831_s8] sm:$0xff] %v1360_v5   ;;  %1444 = vst [vmem:[%s1831_s8 + $0x40] sm:$0xff] %v1400_v6   ;;  %v925_v17 = vadd.f32 %v1476_v9, %v1821_v56  ;;  %v941_v18 = vadd.f32 %v1524_v10, %v1821_v56 }
  0xfb   : > { %v1478_v11 = vpop.f32.mrf.mxu0  ;;  %v1526_v12 = vpop.f32.mrf.mxu1 }
  0xfc   : > { %v1479_v13 = vadd.f32 %v1478_v11, %v1477_v7  ;;  %v1527_v14 = vadd.f32 %v1526_v12, %v1525_v8 }
  0xfd   : > { %v1480_v15 = vpop.f32.mrf.mxu0  ;;  %v1528_v16 = vpop.f32.mrf.mxu1 }
  0xfe   : > { %v926_v19 = vadd.f32 %v1479_v13, %v1821_v56  ;;  %v942_v20 = vadd.f32 %v1527_v14, %v1821_v56 }
  0xff   : > { %v1481_v21 = vpop.f32.mrf.mxu0  ;;  %v1529_v22 = vpop.f32.mrf.mxu1 }
 0x100   : > { %v1365_v23 = vpack.c.bf16 %v926_v19, %v925_v17  ;;  %v1405_v24 = vpack.c.bf16 %v942_v20, %v941_v18  ;;  %v1482_v27 = vadd.f32 %v1481_v21, %v1480_v15  ;;  %v1530_v28 = vadd.f32 %v1529_v22, %v1528_v16 }
 0x101   : > { %v1483_v25 = vpop.f32.mrf.mxu0  ;;  %v1531_v26 = vpop.f32.mrf.mxu1 }
 0x102   : > { %1437 = vst [vmem:[%s1831_s8 + $0x8] sm:$0xff] %v1365_v23   ;;  %1445 = vst [vmem:[%s1831_s8 + $0x48] sm:$0xff] %v1405_v24   ;;  %v927_v35 = vadd.f32 %v1482_v27, %v1821_v56  ;;  %v943_v36 = vadd.f32 %v1530_v28, %v1821_v56 }
 0x103   : > { %v1484_v29 = vpop.f32.mrf.mxu0  ;;  %v1532_v30 = vpop.f32.mrf.mxu1 }
 0x104   : > { %v1485_v31 = vadd.f32 %v1484_v29, %v1483_v25  ;;  %v1533_v32 = vadd.f32 %v1532_v30, %v1531_v26 }
 0x105   : > { %v1486_v33 = vpop.f32.mrf.mxu0  ;;  %v1534_v34 = vpop.f32.mrf.mxu1 }
 0x106   : > { %v928_v37 = vadd.f32 %v1485_v31, %v1821_v56  ;;  %v944_v38 = vadd.f32 %v1533_v32, %v1821_v56 }
 0x107   : > { %v1487_v39 = vpop.f32.mrf.mxu0  ;;  %v1535_v40 = vpop.f32.mrf.mxu1 }
 0x108   : > { %v1370_v41 = vpack.c.bf16 %v928_v37, %v927_v35  ;;  %v1410_v42 = vpack.c.bf16 %v944_v38, %v943_v36  ;;  %v1488_v45 = vadd.f32 %v1487_v39, %v1486_v33  ;;  %v1536_v46 = vadd.f32 %v1535_v40, %v1534_v34 }
 0x109   : > { %v1489_v43 = vpop.f32.mrf.mxu0  ;;  %v1537_v44 = vpop.f32.mrf.mxu1 }
 0x10a   : > { %1438 = vst [vmem:[%s1831_s8 + $0x10] sm:$0xff] %v1370_v41   ;;  %1446 = vst [vmem:[%s1831_s8 + $0x50] sm:$0xff] %v1410_v42   ;;  %v929_v53 = vadd.f32 %v1488_v45, %v1821_v56  ;;  %v945_v54 = vadd.f32 %v1536_v46, %v1821_v56 }
 0x10b   : > { %v1490_v47 = vpop.f32.mrf.mxu0  ;;  %v1538_v48 = vpop.f32.mrf.mxu1 }
 0x10c   : > { %v1491_v49 = vadd.f32 %v1490_v47, %v1489_v43  ;;  %v1539_v50 = vadd.f32 %v1538_v48, %v1537_v44 }
 0x10d   : > { %v1492_v51 = vpop.f32.mrf.mxu0  ;;  %v1540_v52 = vpop.f32.mrf.mxu1 }
 0x10e   : > { %v930_v55 = vadd.f32 %v1491_v49, %v1821_v56  ;;  %v946_v57 = vadd.f32 %v1539_v50, %v1821_v56 }
 0x10f   : > { %v1493_v58 = vpop.f32.mrf.mxu0  ;;  %v1541_v59 = vpop.f32.mrf.mxu1 }
 0x110   : > { %v1375_v60 = vpack.c.bf16 %v930_v55, %v929_v53  ;;  %v1415_v61 = vpack.c.bf16 %v946_v57, %v945_v54  ;;  %v1494_v0 = vadd.f32 %v1493_v58, %v1492_v51  ;;  %v1542_v1 = vadd.f32 %v1541_v59, %v1540_v52 }
 0x111   : > { %v1495_v62 = vpop.f32.mrf.mxu0  ;;  %v1543_v63 = vpop.f32.mrf.mxu1 }
 0x112   : > { %1439 = vst [vmem:[%s1831_s8 + $0x18] sm:$0xff] %v1375_v60   ;;  %1447 = vst [vmem:[%s1831_s8 + $0x58] sm:$0xff] %v1415_v61   ;;  %v931_v8 = vadd.f32 %v1494_v0, %v1821_v56  ;;  %v947_v9 = vadd.f32 %v1542_v1, %v1821_v56 }
 0x113   : > { %v1496_v2 = vpop.f32.mrf.mxu0  ;;  %v1544_v3 = vpop.f32.mrf.mxu1 }
 0x114   : > { %v1497_v4 = vadd.f32 %v1496_v2, %v1495_v62  ;;  %v1545_v5 = vadd.f32 %v1544_v3, %v1543_v63 }
 0x115   : > { %v1498_v6 = vpop.f32.mrf.mxu0  ;;  %v1546_v7 = vpop.f32.mrf.mxu1 }
 0x116   : > { %v932_v10 = vadd.f32 %v1497_v4, %v1821_v56  ;;  %v948_v11 = vadd.f32 %v1545_v5, %v1821_v56 }
 0x117   : > { %v1499_v12 = vpop.f32.mrf.mxu0  ;;  %v1547_v13 = vpop.f32.mrf.mxu1 }
 0x118   : > { %v1380_v14 = vpack.c.bf16 %v932_v10, %v931_v8  ;;  %v1420_v15 = vpack.c.bf16 %v948_v11, %v947_v9  ;;  %v1500_v18 = vadd.f32 %v1499_v12, %v1498_v6  ;;  %v1548_v19 = vadd.f32 %v1547_v13, %v1546_v7 }
 0x119   : > { %v1501_v16 = vpop.f32.mrf.mxu0  ;;  %v1549_v17 = vpop.f32.mrf.mxu1 }
 0x11a   : > { %1440 = vst [vmem:[%s1831_s8 + $0x20] sm:$0xff] %v1380_v14   ;;  %1448 = vst [vmem:[%s1831_s8 + $0x60] sm:$0xff] %v1420_v15   ;;  %v933_v26 = vadd.f32 %v1500_v18, %v1821_v56  ;;  %v949_v27 = vadd.f32 %v1548_v19, %v1821_v56 }
 0x11b   : > { %v1502_v20 = vpop.f32.mrf.mxu0  ;;  %v1550_v21 = vpop.f32.mrf.mxu1 }
 0x11c   : > { %v1503_v22 = vadd.f32 %v1502_v20, %v1501_v16  ;;  %v1551_v23 = vadd.f32 %v1550_v21, %v1549_v17 }
 0x11d   : > { %v1504_v24 = vpop.f32.mrf.mxu0  ;;  %v1552_v25 = vpop.f32.mrf.mxu1 }
 0x11e   : > { %v934_v28 = vadd.f32 %v1503_v22, %v1821_v56  ;;  %v950_v29 = vadd.f32 %v1551_v23, %v1821_v56 }
 0x11f   : > { %v1505_v30 = vpop.f32.mrf.mxu0  ;;  %v1553_v31 = vpop.f32.mrf.mxu1 }
 0x120   : > { %v1385_v32 = vpack.c.bf16 %v934_v28, %v933_v26  ;;  %v1425_v33 = vpack.c.bf16 %v950_v29, %v949_v27  ;;  %v1506_v36 = vadd.f32 %v1505_v30, %v1504_v24  ;;  %v1554_v37 = vadd.f32 %v1553_v31, %v1552_v25 }
 0x121   : > { %v1507_v34 = vpop.f32.mrf.mxu0  ;;  %v1555_v35 = vpop.f32.mrf.mxu1 }
 0x122   : > { %1441 = vst [vmem:[%s1831_s8 + $0x28] sm:$0xff] %v1385_v32   ;;  %1449 = vst [vmem:[%s1831_s8 + $0x68] sm:$0xff] %v1425_v33   ;;  %v935_v44 = vadd.f32 %v1506_v36, %v1821_v56  ;;  %v951_v45 = vadd.f32 %v1554_v37, %v1821_v56 }
 0x123   : > { %v1508_v38 = vpop.f32.mrf.mxu0  ;;  %v1556_v39 = vpop.f32.mrf.mxu1 }
 0x124   : > { %v1509_v40 = vadd.f32 %v1508_v38, %v1507_v34  ;;  %v1557_v41 = vadd.f32 %v1556_v39, %v1555_v35 }
 0x125   : > { %v1510_v42 = vpop.f32.mrf.mxu0  ;;  %v1558_v43 = vpop.f32.mrf.mxu1 }
 0x126   : > { %v936_v46 = vadd.f32 %v1509_v40, %v1821_v56  ;;  %v952_v47 = vadd.f32 %v1557_v41, %v1821_v56 }
 0x127   : > { %v1511_v48 = vpop.f32.mrf.mxu0  ;;  %v1559_v49 = vpop.f32.mrf.mxu1 }
 0x128   : > { %v1390_v50 = vpack.c.bf16 %v936_v46, %v935_v44  ;;  %v1430_v51 = vpack.c.bf16 %v952_v47, %v951_v45  ;;  %v1512_v54 = vadd.f32 %v1511_v48, %v1510_v42  ;;  %v1560_v55 = vadd.f32 %v1559_v49, %v1558_v43 }
 0x129   : > { %v1513_v52 = vpop.f32.mrf.mxu0  ;;  %v1561_v53 = vpop.f32.mrf.mxu1 }
 0x12a   : > { %1442 = vst [vmem:[%s1831_s8 + $0x30] sm:$0xff] %v1390_v50   ;;  %1450 = vst [vmem:[%s1831_s8 + $0x70] sm:$0xff] %v1430_v51   ;;  %v937_v61 = vadd.f32 %v1512_v54, %v1821_v56  ;;  %v953_v62 = vadd.f32 %v1560_v55, %v1821_v56 }
 0x12b   : > { %v1514_v57 = vpop.f32.mrf.mxu0  ;;  %v1562_v58 = vpop.f32.mrf.mxu1 }
 0x12c   : > { %v1515_v59 = vadd.f32 %v1514_v57, %v1513_v52  ;;  %v1563_v60 = vadd.f32 %v1562_v58, %v1561_v53 }
 0x12e   : > { %v938_v63 = vadd.f32 %v1515_v59, %v1821_v56  ;;  %v954_v0 = vadd.f32 %v1563_v60, %v1821_v56 }
 0x130   : > { %v1395_v1 = vpack.c.bf16 %v938_v63, %v937_v61  ;;  %v1435_v2 = vpack.c.bf16 %v954_v0, %v953_v62 }
 0x132   : > { %1443 = vst [vmem:[%s1831_s8 + $0x38] sm:$0xff] %v1395_v1   ;;  %1451 = vst [vmem:[%s1831_s8 + $0x78] sm:$0xff] %v1435_v2  }
 0x133 PF: > { %s13_s14 = sadd.s32 1, %s1690_s14   ;;  %s1890_s12 = smov %s1686_s13 }
 0x134   : > { %p10_p5 = scmp.ge.s32.totalorder %s13_s14, 4   ;;  %s1891_s13 = smov %s1893_s15 }
 0x136   :  { %12 = sbr.rel (!%p10_p5) target bundleno = 2 (0x2), region = 76 }

// kernel: data_generator_img.39
= control target key start
LH: loop header
LB: loop body
LE: loop exit
PB: predicated region body
PF: predicated region fallthrough
CT: control target
= control target key end

     0   :  { %s1467_s12 = smov 0   ;;  %s1469_s13 = smov 0   ;;  %s1604_s0 = inlined_call_operand.vmem [shape: bf16[2048,128], index: 0, kind: input, shape index: {}]   ;;  %s1605_s1 = inlined_call_operand.vmem [shape: bf16[128,128], index: 1, kind: input, shape index: {}]   ;;  %s1606_s2 = inlined_call_operand.vmem [shape: f32[1,128], index: 2, kind: input, shape index: {}]   ;;  %s1607_s3 = inlined_call_operand.vmem [shape: bf16[2048,128], index: 3, kind: output, shape index: {}]  }
   0x1   :  { %s1471_s14 = smov 0  }
   0x2 LB: > { %s32_s15 = sadd.s32 1, %s1441_s13  ;;  %p1096_p0 = scmp.ge.s32.totalorder %s1445_s14, 1  ;;  %s1445_s14 = sphi %s1471_s14, %s13_s14   ;;  %s1441_s13 = sphi %s1469_s13, %s1609_s13   ;;  %s1437_s12 = sphi %s1467_s12, %s1608_s12  }
   0x3   : > { %p34_p1 = scmp.ge.s32.totalorder %s32_s15, 8  ;;  %p188_p2 = scmp.lt.s32.totalorder %s1445_s14, 9 }
   0x5   : > { %s1611_s15 = smov (%p34_p1, %s32_s15), 0  ;;  %p189_p3 = pnand %p1096_p0, %p188_p2 }
   0x6   : > { %s1097_s18 = sshll.u32 (!%p189_p3), %s1437_s12, 5 }
   0x7   : > { %192 = sbr.rel (%p189_p3) target bundleno = 273 (0x111), region = 32  ;;  %p230_p4 = scmp.lt.s32.totalorder (!%p189_p3), %s1097_s18, 255 }
   0xc   : > { %v1399_v0 = vld [vmem:[%s1605_s1 + $0x38] sm:$0xff]   ;;  %v1400_v1 = vld [vmem:[%s1605_s1 + $0x30] sm:$0xff]   ;;  %s1613_s18 = smov (!%p230_p4, %s1097_s18), 255  ;;  %v1401_v2 = vld [vmem:[%s1605_s1 + $0x28] sm:$0xff]  }
   0xd   : > { %1311 = vmatprep.subr.bf16.mxu0 %v1399_v0  ;;  %1359 = vmatprep.subr.bf16.mxu1 %v1399_v0  ;;  %s1098_s23 = sshll.u32 %s1613_s18, 2  ;;  %v1402_v3 = vld [vmem:[%s1605_s1 + $0x20] sm:$0xff]   ;;  %v1403_v6 = vld [vmem:[%s1605_s1 + $0x18] sm:$0xff]   ;;  %v1404_v7 = vld [vmem:[%s1605_s1 + $0x10] sm:$0xff]  }
   0xe   : > { %1312 = vmatpush3.bf16.msra.mxu0 %v1399_v0  ;;  %1367 = vmatpush3.bf16.msra.mxu1 %v1399_v0  ;;  %s1502_s26 = scalar_lea.vmem %s1604_s0, %s1098_s23  ;;  %v1405_v8 = vld [vmem:[%s1605_s1 + $0x8] sm:$0xff]   ;;  %v1406_v9 = vld [vmem:[%s1605_s1] sm:$0xff]   ;;  %s1551_s17 = scalar_lea.vmem %s1607_s3, %s1098_s23 }
   0xf   : > { %1313 = vmatprep.subr.bf16.mxu0 %v1400_v1  ;;  %1360 = vmatprep.subr.bf16.mxu1 %v1400_v1  ;;  %v1407_v4 = vld [vmem:[%s1502_s26] sm:$0xff]   ;;  %v1409_v10 = vld [vmem:[%s1502_s26 + $0x8] sm:$0xff]   ;;  %v1411_v12 = vld [vmem:[%s1502_s26 + $0x10] sm:$0xff]  }
  0x10   : > { %v1408_v5 = vld [vmem:[%s1502_s26 + $0x40] sm:$0xff]   ;;  %1327 = vmatprep.mubr.bf16.mxu0 %v1407_v4  ;;  %v1410_v11 = vld [vmem:[%s1502_s26 + $0x48] sm:$0xff]   ;;  %v1412_v13 = vld [vmem:[%s1502_s26 + $0x50] sm:$0xff]  }
  0x11   : > { %1343 = vmatprep.mubr.bf16.mxu1 %v1408_v5  ;;  %v1413_v14 = vld [vmem:[%s1502_s26 + $0x18] sm:$0xff]   ;;  %v1415_v16 = vld [vmem:[%s1502_s26 + $0x20] sm:$0xff]   ;;  %v1417_v18 = vld [vmem:[%s1502_s26 + $0x28] sm:$0xff]  }
  0x12   : > { %1314 = vmatpush3.bf16.msra.mxu0 %v1400_v1  ;;  %1368 = vmatpush3.bf16.msra.mxu1 %v1400_v1  ;;  %v1414_v15 = vld [vmem:[%s1502_s26 + $0x58] sm:$0xff]   ;;  %v1416_v17 = vld [vmem:[%s1502_s26 + $0x60] sm:$0xff]   ;;  %v1418_v19 = vld [vmem:[%s1502_s26 + $0x68] sm:$0xff]  }
  0x13   : > { %1315 = vmatprep.subr.bf16.mxu0 %v1401_v2  ;;  %1361 = vmatprep.subr.bf16.mxu1 %v1401_v2  ;;  %v1419_v20 = vld [vmem:[%s1502_s26 + $0x30] sm:$0xff]   ;;  %v1421_v22 = vld [vmem:[%s1502_s26 + $0x38] sm:$0xff]   ;;  %v1538_v26 = vld [vmem:[%s1606_s2] ss:$0 sm:$0xff] }
  0x14   : > { %v1420_v21 = vld [vmem:[%s1502_s26 + $0x70] sm:$0xff]   ;;  %v1422_v23 = vld [vmem:[%s1502_s26 + $0x78] sm:$0xff]  }
  0x16   : > { %1316 = vmatpush3.bf16.msra.mxu0 %v1401_v2  ;;  %1369 = vmatpush3.bf16.msra.mxu1 %v1401_v2 }
  0x17   : > { %1317 = vmatprep.subr.bf16.mxu0 %v1402_v3  ;;  %1362 = vmatprep.subr.bf16.mxu1 %v1402_v3 }
  0x1a   : > { %1318 = vmatpush3.bf16.msra.mxu0 %v1402_v3  ;;  %1370 = vmatpush3.bf16.msra.mxu1 %v1402_v3 }
  0x1b   : > { %1319 = vmatprep.subr.bf16.mxu0 %v1403_v6  ;;  %1363 = vmatprep.subr.bf16.mxu1 %v1403_v6 }
  0x1e   : > { %1320 = vmatpush3.bf16.msra.mxu0 %v1403_v6  ;;  %1371 = vmatpush3.bf16.msra.mxu1 %v1403_v6 }
  0x1f   : > { %1321 = vmatprep.subr.bf16.mxu0 %v1404_v7  ;;  %1364 = vmatprep.subr.bf16.mxu1 %v1404_v7 }
  0x22   : > { %1322 = vmatpush3.bf16.msra.mxu0 %v1404_v7  ;;  %1372 = vmatpush3.bf16.msra.mxu1 %v1404_v7 }
  0x23   : > { %1323 = vmatprep.subr.bf16.mxu0 %v1405_v8  ;;  %1365 = vmatprep.subr.bf16.mxu1 %v1405_v8 }
  0x26   : > { %1324 = vmatpush3.bf16.msra.mxu0 %v1405_v8  ;;  %1373 = vmatpush3.bf16.msra.mxu1 %v1405_v8 }
  0x27   : > { %1325 = vmatprep.subr.bf16.mxu0 %v1406_v9  ;;  %1366 = vmatprep.subr.bf16.mxu1 %v1406_v9 }
  0x2a   : > { %1326 = vmatpush3.bf16.msra.mxu0 %v1406_v9  ;;  %1374 = vmatpush3.bf16.msra.mxu1 %v1406_v9 }
  0x2d   : > { %1328 = vmatmul.mubr.bf16.vlgmr.msra.gmra.mxu0 %v1409_v10  ;;  %1344 = vmatmul.mubr.bf16.vlgmr.msra.gmra.mxu1 %v1410_v11 }
  0x2e   : > { %1331 = vmatprep.mubr.bf16.mxu0 %v1411_v12  ;;  %1347 = vmatprep.mubr.bf16.mxu1 %v1412_v13 }
  0x35   : > { %1332 = vmatmul.mubr.bf16.gmra.mxu0 %v1413_v14  ;;  %1348 = vmatmul.mubr.bf16.gmra.mxu1 %v1414_v15 }
  0x36   : > { %1335 = vmatprep.mubr.bf16.mxu0 %v1415_v16  ;;  %1351 = vmatprep.mubr.bf16.mxu1 %v1416_v17 }
  0x3d   : > { %1336 = vmatmul.mubr.bf16.gmra.mxu0 %v1417_v18  ;;  %1352 = vmatmul.mubr.bf16.gmra.mxu1 %v1418_v19 }
  0x3e   : > { %1339 = vmatprep.mubr.bf16.mxu0 %v1419_v20  ;;  %1355 = vmatprep.mubr.bf16.mxu1 %v1420_v21 }
  0x45   : > { %1340 = vmatmul.mubr.bf16.gmra.mxu0 %v1421_v22  ;;  %1356 = vmatmul.mubr.bf16.gmra.mxu1 %v1422_v23 }
  0xed   : > { %v1329_v24 = vpop.f32.mrf.mxu0  ;;  %v1345_v25 = vpop.f32.mrf.mxu1 }
  0xee   : > { %v789_v31 = vadd.f32 %v1329_v24, %v1538_v26  ;;  %v805_v32 = vadd.f32 %v1345_v25, %v1538_v26 }
  0xef   : > { %v554_v27 = vpop.f32.mrf.mxu0  ;;  %v618_v28 = vpop.f32.mrf.mxu1 }
  0xf0   : > { %v787_v35 = vadd.f32 %v1538_v26, %v554_v27  ;;  %v803_v36 = vadd.f32 %v1538_v26, %v618_v28 }
  0xf1   : > { %v1330_v29 = vpop.f32.mrf.mxu0  ;;  %v1346_v30 = vpop.f32.mrf.mxu1 }
  0xf2   : > { %v790_v33 = vadd.f32 %v1330_v29, %v1538_v26  ;;  %v806_v34 = vadd.f32 %v1346_v30, %v1538_v26 }
  0xf3   : > { %v557_v37 = vpop.f32.mrf.mxu0  ;;  %v621_v38 = vpop.f32.mrf.mxu1 }
  0xf4   : > { %v1200_v39 = vpack.c.bf16 %v790_v33, %v789_v31  ;;  %v1240_v40 = vpack.c.bf16 %v806_v34, %v805_v32  ;;  %v788_v41 = vadd.f32 %v1538_v26, %v557_v37  ;;  %v804_v42 = vadd.f32 %v1538_v26, %v621_v38 }
  0xf5   : > { %v1333_v43 = vpop.f32.mrf.mxu0  ;;  %v1349_v44 = vpop.f32.mrf.mxu1 }
  0xf6   : > { %1272 = vst [vmem:[%s1551_s17 + $0x8] sm:$0xff] %v1200_v39   ;;  %1280 = vst [vmem:[%s1551_s17 + $0x48] sm:$0xff] %v1240_v40   ;;  %v1195_v45 = vpack.c.bf16 %v788_v41, %v787_v35  ;;  %v1235_v46 = vpack.c.bf16 %v804_v42, %v803_v36  ;;  %v793_v51 = vadd.f32 %v1333_v43, %v1538_v26 }
  0xf7   : > { %v570_v47 = vpop.f32.mrf.mxu0  ;;  %v634_v48 = vpop.f32.mrf.mxu1  ;;  %v809_v52 = vadd.f32 %v1349_v44, %v1538_v26 }
  0xf8   : > { %1196 = vst [vmem:[%s1551_s17] sm:$0xff] %v1195_v45   ;;  %1279 = vst [vmem:[%s1551_s17 + $0x40] sm:$0xff] %v1235_v46   ;;  %v791_v55 = vadd.f32 %v1538_v26, %v570_v47  ;;  %v807_v56 = vadd.f32 %v1538_v26, %v634_v48 }
  0xf9   : > { %v1334_v49 = vpop.f32.mrf.mxu0  ;;  %v1350_v50 = vpop.f32.mrf.mxu1 }
  0xfa   : > { %v794_v53 = vadd.f32 %v1334_v49, %v1538_v26  ;;  %v810_v54 = vadd.f32 %v1350_v50, %v1538_v26 }
  0xfb   : > { %v573_v57 = vpop.f32.mrf.mxu0  ;;  %v637_v58 = vpop.f32.mrf.mxu1 }
  0xfc   : > { %v1210_v59 = vpack.c.bf16 %v794_v53, %v793_v51  ;;  %v1250_v60 = vpack.c.bf16 %v810_v54, %v809_v52  ;;  %v792_v61 = vadd.f32 %v1538_v26, %v573_v57  ;;  %v808_v62 = vadd.f32 %v1538_v26, %v637_v58 }
  0xfd   : > { %v1337_v63 = vpop.f32.mrf.mxu0  ;;  %v1353_v0 = vpop.f32.mrf.mxu1 }
  0xfe   : > { %1274 = vst [vmem:[%s1551_s17 + $0x18] sm:$0xff] %v1210_v59   ;;  %1282 = vst [vmem:[%s1551_s17 + $0x58] sm:$0xff] %v1250_v60   ;;  %v1205_v1 = vpack.c.bf16 %v792_v61, %v791_v55  ;;  %v1245_v2 = vpack.c.bf16 %v808_v62, %v807_v56  ;;  %v797_v7 = vadd.f32 %v1337_v63, %v1538_v26 }
  0xff   : > { %v586_v3 = vpop.f32.mrf.mxu0  ;;  %v650_v4 = vpop.f32.mrf.mxu1  ;;  %v813_v8 = vadd.f32 %v1353_v0, %v1538_v26 }
 0x100   : > { %1273 = vst [vmem:[%s1551_s17 + $0x10] sm:$0xff] %v1205_v1   ;;  %1281 = vst [vmem:[%s1551_s17 + $0x50] sm:$0xff] %v1245_v2   ;;  %v795_v11 = vadd.f32 %v1538_v26, %v586_v3  ;;  %v811_v12 = vadd.f32 %v1538_v26, %v650_v4 }
 0x101   : > { %v1338_v5 = vpop.f32.mrf.mxu0  ;;  %v1354_v6 = vpop.f32.mrf.mxu1 }
 0x102   : > { %v798_v9 = vadd.f32 %v1338_v5, %v1538_v26  ;;  %v814_v10 = vadd.f32 %v1354_v6, %v1538_v26 }
 0x103   : > { %v589_v13 = vpop.f32.mrf.mxu0  ;;  %v653_v14 = vpop.f32.mrf.mxu1 }
 0x104   : > { %v1220_v15 = vpack.c.bf16 %v798_v9, %v797_v7  ;;  %v1260_v16 = vpack.c.bf16 %v814_v10, %v813_v8  ;;  %v796_v17 = vadd.f32 %v1538_v26, %v589_v13  ;;  %v812_v18 = vadd.f32 %v1538_v26, %v653_v14 }
 0x105   : > { %v1341_v19 = vpop.f32.mrf.mxu0  ;;  %v1357_v20 = vpop.f32.mrf.mxu1 }
 0x106   : > { %1276 = vst [vmem:[%s1551_s17 + $0x28] sm:$0xff] %v1220_v15   ;;  %1284 = vst [vmem:[%s1551_s17 + $0x68] sm:$0xff] %v1260_v16   ;;  %v1215_v21 = vpack.c.bf16 %v796_v17, %v795_v11  ;;  %v1255_v22 = vpack.c.bf16 %v812_v18, %v811_v12  ;;  %v801_v28 = vadd.f32 %v1341_v19, %v1538_v26 }
 0x107   : > { %v602_v23 = vpop.f32.mrf.mxu0  ;;  %v666_v24 = vpop.f32.mrf.mxu1  ;;  %v817_v29 = vadd.f32 %v1357_v20, %v1538_v26 }
 0x108   : > { %1275 = vst [vmem:[%s1551_s17 + $0x20] sm:$0xff] %v1215_v21   ;;  %1283 = vst [vmem:[%s1551_s17 + $0x60] sm:$0xff] %v1255_v22   ;;  %v799_v32 = vadd.f32 %v1538_v26, %v602_v23  ;;  %v815_v33 = vadd.f32 %v1538_v26, %v666_v24 }
 0x109   : > { %v1342_v25 = vpop.f32.mrf.mxu0  ;;  %v1358_v27 = vpop.f32.mrf.mxu1 }
 0x10a   : > { %v802_v30 = vadd.f32 %v1342_v25, %v1538_v26  ;;  %v818_v31 = vadd.f32 %v1358_v27, %v1538_v26 }
 0x10b   : > { %v605_v34 = vpop.f32.mrf.mxu0  ;;  %v669_v35 = vpop.f32.mrf.mxu1 }
 0x10c   : > { %v1230_v36 = vpack.c.bf16 %v802_v30, %v801_v28  ;;  %v1270_v37 = vpack.c.bf16 %v818_v31, %v817_v29  ;;  %v800_v38 = vadd.f32 %v1538_v26, %v605_v34  ;;  %v816_v39 = vadd.f32 %v1538_v26, %v669_v35 }
 0x10e   : > { %1278 = vst [vmem:[%s1551_s17 + $0x38] sm:$0xff] %v1230_v36   ;;  %1286 = vst [vmem:[%s1551_s17 + $0x78] sm:$0xff] %v1270_v37   ;;  %v1225_v40 = vpack.c.bf16 %v800_v38, %v799_v32  ;;  %v1265_v41 = vpack.c.bf16 %v816_v39, %v815_v33 }
 0x110   : > { %1277 = vst [vmem:[%s1551_s17 + $0x30] sm:$0xff] %v1225_v40   ;;  %1285 = vst [vmem:[%s1551_s17 + $0x70] sm:$0xff] %v1265_v41  }
 0x111 PF: > { %s13_s14 = sadd.s32 1, %s1445_s14   ;;  %s1608_s12 = smov %s1441_s13 }
 0x112   : > { %p10_p5 = scmp.ge.s32.totalorder %s13_s14, 10   ;;  %s1609_s13 = smov %s1611_s15 }
 0x114   :  { %12 = sbr.rel (!%p10_p5) target bundleno = 2 (0x2), region = 76 }

</bundles_post_ra>
